<compile_context>
chip_gen: v7x
topology: tpu7x:2x2x1
jax: 0.10.0
libtpu: 0.0.40
codegen_flags: <defaults>
</compile_context>

<pallas_src>
import math

import jax
import jax.numpy as jnp
from jax.experimental import pallas as pl
from jax.experimental.pallas import tpu as pltpu

# ---- model / problem sizes (small, consistent with the module) ----
INPUT_DIM = 16
HIDDEN = 32              # d_model, divisible by nhead
NHEAD = 8
HEAD_DIM = HIDDEN // NHEAD
FF_DIM = 2048            # nn.TransformerEncoderLayer default dim_feedforward
NUM_LAYERS = 2
SEQ = 8                  # power of two (needed for the XOR batch-mask trick)
HISTORY = 8              # history_length (>= SEQ so the embedding gather is valid)
BATCH = 2
BS = BATCH * SEQ
LN_EPS = 1e-5            # PyTorch LayerNorm default


def _layer_norm(x, g, b):
    mu = jnp.mean(x, axis=-1, keepdims=True)
    var = jnp.mean((x - mu) ** 2, axis=-1, keepdims=True)
    return (x - mu) * jax.lax.rsqrt(var + LN_EPS) * g + b


# ----------------------------- Pallas kernel -----------------------------
def transformer_encoder_kernel(
    x_ref, w_es_ref, b_es_ref, temb_ref, g_ln_ref, b_ln_ref,
    wqkv_ref, bqkv_ref, wo_ref, bo_ref,
    w1_ref, b1_ref, w2_ref, b2_ref,
    g1_ref, be1_ref, g2_ref, be2_ref,
    o_ref,
    qkv_sc, ao_sc,
):
    x = x_ref[...]                                                # (BS, IN) f32

    # state embedding + time embedding + embed_ln (batch fused into rows)
    h = jnp.dot(x, w_es_ref[...], preferred_element_type=jnp.float32) + b_es_ref[...]
    h = h + temb_ref[...]
    h = _layer_norm(h, g_ln_ref[...], b_ln_ref[...])              # (BS, D) f32

    # block-diagonal mask so fused-batch attention never mixes batch elements.
    # rows r, c belong to the same batch element iff (r ^ c) < SEQ (SEQ is a pow2).
    ri = jax.lax.broadcasted_iota(jnp.int32, (BS, BS), 0)
    ci = jax.lax.broadcasted_iota(jnp.int32, (BS, BS), 1)
    mask = jnp.where((ri ^ ci) < SEQ, 0.0, -1e30).astype(jnp.float32)

    for l in range(NUM_LAYERS):
        # ---- self-attention block (post-norm) ----
        hb = h.astype(jnp.bfloat16)
        qkv = jnp.dot(hb, wqkv_ref[l],
                      preferred_element_type=jnp.float32) + bqkv_ref[l]   # (BS, 3D)
        qkv_sc[...] = qkv            # park in VMEM; per-head columns read back below
        for hh in range(NHEAD):
            lo = hh * HEAD_DIM
            qh = qkv_sc[:, lo:lo + HEAD_DIM]                              # (BS, HD)
            kh = qkv_sc[:, HIDDEN + lo:HIDDEN + lo + HEAD_DIM]
            vh = qkv_sc[:, 2 * HIDDEN + lo:2 * HIDDEN + lo + HEAD_DIM]
            # 1/sqrt(head_dim) is pre-folded into the Q projection weights.
            s = jax.lax.dot_general(
                qh, kh, (((1,), (1,)), ((), ())),
                preferred_element_type=jnp.float32) + mask                # (BS, BS)
            s = s - jnp.max(s, axis=-1, keepdims=True)
            p = jnp.exp(s)
            p = p * pl.reciprocal(jnp.sum(p, axis=-1, keepdims=True), approx=True)
            ao_sc[:, lo:lo + HEAD_DIM] = jnp.dot(
                p, vh, preferred_element_type=jnp.float32)
        attn = jnp.dot(ao_sc[...].astype(jnp.bfloat16), wo_ref[l],
                       preferred_element_type=jnp.float32) + bo_ref[l]
        h = _layer_norm(h + attn, g1_ref[l], be1_ref[l])

        # output only reads the last token of each batch element, so the final
        # layer's FFN + norm2 only need those rows.
        if l == NUM_LAYERS - 1:
            h = jnp.concatenate(
                [h[b * SEQ + SEQ - 1:b * SEQ + SEQ, :] for b in range(BATCH)],
                axis=0)                                                   # (B, D)

        # ---- feed-forward block ----
        hb = h.astype(jnp.bfloat16)
        ff = jnp.dot(hb, w1_ref[l], preferred_element_type=jnp.float32) + b1_ref[l]
        ff = jnp.maximum(ff, 0.0).astype(jnp.bfloat16)                    # relu
        ff = jnp.dot(ff, w2_ref[l], preferred_element_type=jnp.float32) + b2_ref[l]
        h = _layer_norm(h + ff, g2_ref[l], be2_ref[l])

    o_ref[...] = h                                                        # (B, D)


# ----------------------------- wrapper -----------------------------
PARAM_ORDER = [
    "w_es", "b_es", "temb", "g_ln", "b_ln",
    "wqkv", "bqkv", "wo", "bo",
    "w1", "b1", "w2", "b2",
    "g1", "be1", "g2", "be2",
]


def _full_spec(a):
    nd = a.ndim
    return pl.BlockSpec(a.shape, lambda i, _n=nd: (0,) * _n)


@jax.jit
def transformer_encoder_forward(states, params):
    x = states.reshape(BATCH * SEQ, INPUT_DIM)     # fold batch into rows (free reshape)
    in_specs = [_full_spec(x)]
    args = [x]
    for name in PARAM_ORDER:
        a = params[name]
        in_specs.append(_full_spec(a))
        args.append(a)
    return pl.pallas_call(
        transformer_encoder_kernel,
        out_shape=jax.ShapeDtypeStruct((BATCH, HIDDEN), jnp.float32),
        grid_spec=pltpu.PrefetchScalarGridSpec(
            num_scalar_prefetch=0,
            grid=(1,),                              # single step: whole batch fused
            in_specs=in_specs,
            out_specs=pl.BlockSpec((BATCH, HIDDEN), lambda i: (0, 0)),
            scratch_shapes=[
                pltpu.VMEM((BS, 3 * HIDDEN), jnp.float32),   # qkv parking buffer
                pltpu.VMEM((BS, HIDDEN), jnp.float32),       # per-head attn outputs
            ],
        ),
        compiler_params=pltpu.CompilerParams(
            dimension_semantics=("arbitrary",)),
    )(*args)


# ----------------------------- params (deterministic, in-script) -----------------------------
def init_params(key):
    """Raw, PyTorch-layout parameters (f32) used by the reference."""
    def normal(k, shape, scale=0.05):
        return scale * jax.random.normal(k, shape, jnp.float32)

    keys = iter(jax.random.split(key, 64))
    raw = dict(
        w_es=normal(next(keys), (HIDDEN, INPUT_DIM)),     # nn.Linear weight (out, in)
        b_es=normal(next(keys), (HIDDEN,)),
        e_t=normal(next(keys), (HISTORY, HIDDEN)),        # nn.Embedding table
        g_ln=1.0 + normal(next(keys), (HIDDEN,), 0.01),
        b_ln=normal(next(keys), (HIDDEN,), 0.01),
        layers=[],
    )
    for _ in range(NUM_LAYERS):
        raw["layers"].append(dict(
            in_proj_w=normal(next(keys), (3 * HIDDEN, HIDDEN)),
            in_proj_b=normal(next(keys), (3 * HIDDEN,)),
            out_proj_w=normal(next(keys), (HIDDEN, HIDDEN)),
            out_proj_b=normal(next(keys), (HIDDEN,)),
            lin1_w=normal(next(keys), (FF_DIM, HIDDEN)),
            lin1_b=normal(next(keys), (FF_DIM,)),
            lin2_w=normal(next(keys), (HIDDEN, FF_DIM)),
            lin2_b=normal(next(keys), (HIDDEN,)),
            g1=1.0 + normal(next(keys), (HIDDEN,), 0.01),
            be1=normal(next(keys), (HIDDEN,), 0.01),
            g2=1.0 + normal(next(keys), (HIDDEN,), 0.01),
            be2=normal(next(keys), (HIDDEN,), 0.01),
        ))
    return raw


def pack_params(raw):
    """Kernel-layout params: (in, out) weights, bf16 matmul weights, folded scale."""
    scale = 1.0 / math.sqrt(HEAD_DIM)
    wqkv, bqkv, wo, bo = [], [], [], []
    w1, b1, w2, b2 = [], [], [], []
    g1, be1, g2, be2 = [], [], [], []
    for lyr in raw["layers"]:
        ipw = lyr["in_proj_w"].at[:HIDDEN].multiply(scale)   # fold 1/sqrt(hd) into Q
        ipb = lyr["in_proj_b"].at[:HIDDEN].multiply(scale)
        wqkv.append(ipw.T.astype(jnp.bfloat16))              # (D, 3D)
        bqkv.append(ipb[None])
        wo.append(lyr["out_proj_w"].T.astype(jnp.bfloat16))  # (D, D)
        bo.append(lyr["out_proj_b"][None])
        w1.append(lyr["lin1_w"].T.astype(jnp.bfloat16))      # (D, FF)
        b1.append(lyr["lin1_b"][None])
        w2.append(lyr["lin2_w"].T.astype(jnp.bfloat16))      # (FF, D)
        b2.append(lyr["lin2_b"][None])
        g1.append(lyr["g1"][None]); be1.append(lyr["be1"][None])
        g2.append(lyr["g2"][None]); be2.append(lyr["be2"][None])
    stack = lambda xs: jnp.stack(xs, axis=0)
    return dict(
        w_es=raw["w_es"].T, b_es=raw["b_es"][None],
        temb=jnp.tile(raw["e_t"][:SEQ], (BATCH, 1)),   # arange(S) gather + batch tile (glue)
        g_ln=raw["g_ln"][None], b_ln=raw["b_ln"][None],
        wqkv=stack(wqkv), bqkv=stack(bqkv), wo=stack(wo), bo=stack(bo),
        w1=stack(w1), b1=stack(b1), w2=stack(w2), b2=stack(b2),
        g1=stack(g1), be1=stack(be1), g2=stack(g2), be2=stack(be2),
    )


# ----------------------------- pure-JAX reference (PyTorch semantics, f32) -----------------------------
def reference_forward(states, raw):
    h = states @ raw["w_es"].T + raw["b_es"]
    h = h + raw["e_t"][:SEQ][None]
    h = _layer_norm(h, raw["g_ln"], raw["b_ln"])
    B, S, D = h.shape
    scale = 1.0 / math.sqrt(HEAD_DIM)
    for lyr in raw["layers"]:
        qkv = h @ lyr["in_proj_w"].T + lyr["in_proj_b"]
        q, k, v = jnp.split(qkv, 3, axis=-1)
        qh = q.reshape(B, S, NHEAD, HEAD_DIM).transpose(0, 2, 1, 3)
        kh = k.reshape(B, S, NHEAD, HEAD_DIM).transpose(0, 2, 1, 3)
        vh = v.reshape(B, S, NHEAD, HEAD_DIM).transpose(0, 2, 1, 3)
        s = jnp.einsum("bhqd,bhkd->bhqk", qh, kh) * scale
        pmat = jax.nn.softmax(s, axis=-1)
        a = jnp.einsum("bhqk,bhkd->bhqd", pmat, vh)
        a = a.transpose(0, 2, 1, 3).reshape(B, S, D)
        a = a @ lyr["out_proj_w"].T + lyr["out_proj_b"]
        h = _layer_norm(h + a, lyr["g1"], lyr["be1"])
        ff = jnp.maximum(h @ lyr["lin1_w"].T + lyr["lin1_b"], 0.0)
        ff = ff @ lyr["lin2_w"].T + lyr["lin2_b"]
        h = _layer_norm(h + ff, lyr["g2"], lyr["be2"])
    return h[:, -1, :]


if __name__ == "__main__":
    key = jax.random.PRNGKey(0)
    pkey, xkey = jax.random.split(key)
    raw = init_params(pkey)
    kparams = pack_params(raw)
    states = jax.random.normal(xkey, (BATCH, SEQ, INPUT_DIM), jnp.float32)

    out = transformer_encoder_forward(states, kparams)
    out = jax.block_until_ready(out)

    ref = reference_forward(states, raw)
    assert out.shape == (BATCH, HIDDEN), out.shape
    assert bool(jnp.all(jnp.isfinite(out)))
    if not jnp.allclose(out, ref, rtol=2e-2, atol=2e-2):
        err = float(jnp.max(jnp.abs(out - ref)))
        raise AssertionError(
            f"Pallas kernel output mismatch vs JAX reference (max abs err {err})")

    print("KERNEL_OK")
</pallas_src>

<mosaic_0001>
module attributes {stable_mosaic.version = 11 : i64} {
  func.func @transformer_encoder_kernel(%arg0: i32, %arg1: memref<16x16xf32, #tpu.memory_space<vmem>>, %arg2: memref<16x32xf32, #tpu.memory_space<vmem>>, %arg3: memref<1x32xf32, #tpu.memory_space<vmem>>, %arg4: memref<16x32xf32, #tpu.memory_space<vmem>>, %arg5: memref<1x32xf32, #tpu.memory_space<vmem>>, %arg6: memref<1x32xf32, #tpu.memory_space<vmem>>, %arg7: memref<2x32x96xbf16, #tpu.memory_space<vmem>>, %arg8: memref<2x1x96xf32, #tpu.memory_space<vmem>>, %arg9: memref<2x32x32xbf16, #tpu.memory_space<vmem>>, %arg10: memref<2x1x32xf32, #tpu.memory_space<vmem>>, %arg11: memref<2x32x2048xbf16, #tpu.memory_space<vmem>>, %arg12: memref<2x1x2048xf32, #tpu.memory_space<vmem>>, %arg13: memref<2x2048x32xbf16, #tpu.memory_space<vmem>>, %arg14: memref<2x1x32xf32, #tpu.memory_space<vmem>>, %arg15: memref<2x1x32xf32, #tpu.memory_space<vmem>>, %arg16: memref<2x1x32xf32, #tpu.memory_space<vmem>>, %arg17: memref<2x1x32xf32, #tpu.memory_space<vmem>>, %arg18: memref<2x1x32xf32, #tpu.memory_space<vmem>>, %arg19: memref<2x32xf32, #tpu.memory_space<vmem>>, %arg20: memref<16x96xf32, #tpu.memory_space<vmem>>, %arg21: memref<16x32xf32, #tpu.memory_space<vmem>>) attributes {dimension_semantics = [#tpu.dimension_semantics<arbitrary>], iteration_bounds = array<i64: 1>, scalar_prefetch = 0 : i64, scratch_operands = 2 : i64, tpu.core_type = #tpu.core_type<tc>, window_params = [{pipeline_mode = #tpu.pipeline_mode<synchronous>, transform_indices = @transform_0, window_bounds = array<i64: 16, 16>}, {pipeline_mode = #tpu.pipeline_mode<synchronous>, transform_indices = @transform_1, window_bounds = array<i64: 16, 32>}, {pipeline_mode = #tpu.pipeline_mode<synchronous>, transform_indices = @transform_2, window_bounds = array<i64: 1, 32>}, {pipeline_mode = #tpu.pipeline_mode<synchronous>, transform_indices = @transform_3, window_bounds = array<i64: 16, 32>}, {pipeline_mode = #tpu.pipeline_mode<synchronous>, transform_indices = @transform_4, window_bounds = array<i64: 1, 32>}, {pipeline_mode = #tpu.pipeline_mode<synchronous>, transform_indices = @transform_5, window_bounds = array<i64: 1, 32>}, {pipeline_mode = #tpu.pipeline_mode<synchronous>, transform_indices = @transform_6, window_bounds = array<i64: 2, 32, 96>}, {pipeline_mode = #tpu.pipeline_mode<synchronous>, transform_indices = @transform_7, window_bounds = array<i64: 2, 1, 96>}, {pipeline_mode = #tpu.pipeline_mode<synchronous>, transform_indices = @transform_8, window_bounds = array<i64: 2, 32, 32>}, {pipeline_mode = #tpu.pipeline_mode<synchronous>, transform_indices = @transform_9, window_bounds = array<i64: 2, 1, 32>}, {pipeline_mode = #tpu.pipeline_mode<synchronous>, transform_indices = @transform_10, window_bounds = array<i64: 2, 32, 2048>}, {pipeline_mode = #tpu.pipeline_mode<synchronous>, transform_indices = @transform_11, window_bounds = array<i64: 2, 1, 2048>}, {pipeline_mode = #tpu.pipeline_mode<synchronous>, transform_indices = @transform_12, window_bounds = array<i64: 2, 2048, 32>}, {pipeline_mode = #tpu.pipeline_mode<synchronous>, transform_indices = @transform_13, window_bounds = array<i64: 2, 1, 32>}, {pipeline_mode = #tpu.pipeline_mode<synchronous>, transform_indices = @transform_14, window_bounds = array<i64: 2, 1, 32>}, {pipeline_mode = #tpu.pipeline_mode<synchronous>, transform_indices = @transform_15, window_bounds = array<i64: 2, 1, 32>}, {pipeline_mode = #tpu.pipeline_mode<synchronous>, transform_indices = @transform_16, window_bounds = array<i64: 2, 1, 32>}, {pipeline_mode = #tpu.pipeline_mode<synchronous>, transform_indices = @transform_17, window_bounds = array<i64: 2, 1, 32>}, {pipeline_mode = #tpu.pipeline_mode<synchronous>, transform_indices = @transform_18, window_bounds = array<i64: 2, 32>}]} {
    %c0 = arith.constant 0 : index
    %c0_0 = arith.constant 0 : index
    %0 = vector.load %arg1[%c0, %c0_0] : memref<16x16xf32, #tpu.memory_space<vmem>>, vector<16x16xf32>
    %c0_1 = arith.constant 0 : index
    %c0_2 = arith.constant 0 : index
    %1 = vector.load %arg2[%c0_1, %c0_2] : memref<16x32xf32, #tpu.memory_space<vmem>>, vector<16x32xf32>
    %cst = arith.constant dense<0.000000e+00> : vector<16x32xf32>
    %2 = tpu.matmul %0, %1, %cst {dimension_numbers = #tpu.dot_dimension_numbers<[1], [0], [0], [1], [0, 0, 1, 1], [], []>} : vector<16x16xf32>, vector<16x32xf32>, vector<16x32xf32> -> vector<16x32xf32>
    %c0_3 = arith.constant 0 : index
    %c0_4 = arith.constant 0 : index
    %3 = vector.load %arg3[%c0_3, %c0_4] : memref<1x32xf32, #tpu.memory_space<vmem>>, vector<1x32xf32>
    %4 = vector.broadcast %3 : vector<1x32xf32> to vector<16x32xf32>
    %5 = arith.addf %2, %4 : vector<16x32xf32>
    %c0_5 = arith.constant 0 : index
    %c0_6 = arith.constant 0 : index
    %6 = vector.load %arg4[%c0_5, %c0_6] : memref<16x32xf32, #tpu.memory_space<vmem>>, vector<16x32xf32>
    %7 = arith.addf %5, %6 : vector<16x32xf32>
    %c0_7 = arith.constant 0 : index
    %c0_8 = arith.constant 0 : index
    %8 = vector.load %arg5[%c0_7, %c0_8] : memref<1x32xf32, #tpu.memory_space<vmem>>, vector<1x32xf32>
    %c0_9 = arith.constant 0 : index
    %c0_10 = arith.constant 0 : index
    %9 = vector.load %arg6[%c0_9, %c0_10] : memref<1x32xf32, #tpu.memory_space<vmem>>, vector<1x32xf32>
    %cst_11 = arith.constant dense<0.000000e+00> : vector<16xf32>
    %10 = vector.multi_reduction <add>, %7, %cst_11 [1] : vector<16x32xf32> to vector<16xf32>
    %11 = vector.shape_cast %10 : vector<16xf32> to vector<16x1xf32>
    %cst_12 = arith.constant 3.200000e+01 : f32
    %12 = vector.broadcast %cst_12 : f32 to vector<16x1xf32>
    %13 = arith.divf %11, %12 : vector<16x1xf32>
    %14 = vector.broadcast %13 : vector<16x1xf32> to vector<16x32xf32>
    %15 = arith.subf %7, %14 : vector<16x32xf32>
    %16 = arith.mulf %15, %15 : vector<16x32xf32>
    %cst_13 = arith.constant dense<0.000000e+00> : vector<16xf32>
    %17 = vector.multi_reduction <add>, %16, %cst_13 [1] : vector<16x32xf32> to vector<16xf32>
    %18 = vector.shape_cast %17 : vector<16xf32> to vector<16x1xf32>
    %cst_14 = arith.constant 3.200000e+01 : f32
    %19 = vector.broadcast %cst_14 : f32 to vector<16x1xf32>
    %20 = arith.divf %18, %19 : vector<16x1xf32>
    %21 = vector.broadcast %13 : vector<16x1xf32> to vector<16x32xf32>
    %22 = arith.subf %7, %21 : vector<16x32xf32>
    %cst_15 = arith.constant 9.99999974E-6 : f32
    %23 = vector.broadcast %cst_15 : f32 to vector<16x1xf32>
    %24 = arith.addf %20, %23 : vector<16x1xf32>
    %25 = math.rsqrt %24 : vector<16x1xf32>
    %26 = vector.broadcast %25 : vector<16x1xf32> to vector<16x32xf32>
    %27 = arith.mulf %22, %26 : vector<16x32xf32>
    %28 = vector.broadcast %8 : vector<1x32xf32> to vector<16x32xf32>
    %29 = arith.mulf %27, %28 : vector<16x32xf32>
    %30 = vector.broadcast %9 : vector<1x32xf32> to vector<16x32xf32>
    %31 = arith.addf %29, %30 : vector<16x32xf32>
    %32 = tpu.iota {dimensions = array<i32: 0>} : vector<16x16xi32>
    %33 = tpu.iota {dimensions = array<i32: 1>} : vector<16x16xi32>
    %34 = arith.xori %32, %33 : vector<16x16xi32>
    %c8_i32 = arith.constant 8 : i32
    %35 = vector.broadcast %c8_i32 : i32 to vector<16x16xi32>
    %36 = arith.cmpi slt, %34, %35 : vector<16x16xi32>
    %cst_16 = arith.constant 0.000000e+00 : f32
    %cst_17 = arith.constant -1.000000e+30 : f32
    %37 = vector.broadcast %cst_16 : f32 to vector<16x16xf32>
    %38 = vector.broadcast %cst_17 : f32 to vector<16x16xf32>
    %39 = arith.select %36, %37, %38 : vector<16x16xi1>, vector<16x16xf32>
    %40 = arith.truncf %31 : vector<16x32xf32> to vector<16x32xbf16>
    %c0_18 = arith.constant 0 : index
    %c0_19 = arith.constant 0 : index
    %c0_20 = arith.constant 0 : index
    %41 = vector.load %arg7[%c0_18, %c0_19, %c0_20] : memref<2x32x96xbf16, #tpu.memory_space<vmem>>, vector<1x32x96xbf16>
    %42 = vector.shape_cast %41 : vector<1x32x96xbf16> to vector<32x96xbf16>
    %cst_21 = arith.constant dense<0.000000e+00> : vector<16x96xf32>
    %43 = tpu.matmul %40, %42, %cst_21 {dimension_numbers = #tpu.dot_dimension_numbers<[1], [0], [0], [1], [0, 0, 1, 1], [], []>} : vector<16x32xbf16>, vector<32x96xbf16>, vector<16x96xf32> -> vector<16x96xf32>
    %c0_22 = arith.constant 0 : index
    %c0_23 = arith.constant 0 : index
    %c0_24 = arith.constant 0 : index
    %44 = vector.load %arg8[%c0_22, %c0_23, %c0_24] : memref<2x1x96xf32, #tpu.memory_space<vmem>>, vector<1x1x96xf32>
    %45 = vector.shape_cast %44 : vector<1x1x96xf32> to vector<1x96xf32>
    %46 = vector.broadcast %45 : vector<1x96xf32> to vector<16x96xf32>
    %47 = arith.addf %43, %46 : vector<16x96xf32>
    %c0_25 = arith.constant 0 : index
    %c0_26 = arith.constant 0 : index
    %48 = vector.load %arg20[%c0_25, %c0_26] : memref<16x96xf32, #tpu.memory_space<vmem>>, vector<16x96xf32>
    tpu.vector_store %arg20[%c0_25, %c0_26], %47 {strides = array<i32>} : memref<16x96xf32, #tpu.memory_space<vmem>>, vector<16x96xf32>,
    %c0_27 = arith.constant 0 : index
    %c0_28 = arith.constant 0 : index
    %49 = vector.load %arg20[%c0_27, %c0_28] : memref<16x96xf32, #tpu.memory_space<vmem>>, vector<16x4xf32>
    %c0_29 = arith.constant 0 : index
    %c32 = arith.constant 32 : index
    %50 = vector.load %arg20[%c0_29, %c32] : memref<16x96xf32, #tpu.memory_space<vmem>>, vector<16x4xf32>
    %c0_30 = arith.constant 0 : index
    %c64 = arith.constant 64 : index
    %51 = vector.load %arg20[%c0_30, %c64] : memref<16x96xf32, #tpu.memory_space<vmem>>, vector<16x4xf32>
    %cst_31 = arith.constant dense<0.000000e+00> : vector<16x16xf32>
    %52 = tpu.matmul %49, %50, %cst_31 {dimension_numbers = #tpu.dot_dimension_numbers<[1], [1], [0], [0], [0, 0, 1, 0], [], []>} : vector<16x4xf32>, vector<16x4xf32>, vector<16x16xf32> -> vector<16x16xf32>
    %53 = arith.addf %52, %39 : vector<16x16xf32>
    %cst_32 = arith.constant dense<0xFF800000> : vector<16xf32>
    %54 = vector.multi_reduction <maximumf>, %53, %cst_32 [1] : vector<16x16xf32> to vector<16xf32>
    %55 = vector.shape_cast %54 : vector<16xf32> to vector<16x1xf32>
    %56 = vector.broadcast %55 : vector<16x1xf32> to vector<16x16xf32>
    %57 = arith.subf %53, %56 : vector<16x16xf32>
    %58 = math.exp %57 : vector<16x16xf32>
    %cst_33 = arith.constant dense<0.000000e+00> : vector<16xf32>
    %59 = vector.multi_reduction <add>, %58, %cst_33 [1] : vector<16x16xf32> to vector<16xf32>
    %60 = vector.shape_cast %59 : vector<16xf32> to vector<16x1xf32>
    %61 = tpu.reciprocal %60 {approx = true} : vector<16x1xf32> -> vector<16x1xf32>
    %62 = vector.broadcast %61 : vector<16x1xf32> to vector<16x16xf32>
    %63 = arith.mulf %58, %62 : vector<16x16xf32>
    %cst_34 = arith.constant dense<0.000000e+00> : vector<16x4xf32>
    %64 = tpu.matmul %63, %51, %cst_34 {dimension_numbers = #tpu.dot_dimension_numbers<[1], [0], [0], [1], [0, 0, 1, 1], [], []>} : vector<16x16xf32>, vector<16x4xf32>, vector<16x4xf32> -> vector<16x4xf32>
    %c0_35 = arith.constant 0 : index
    %c0_36 = arith.constant 0 : index
    %65 = vector.load %arg21[%c0_35, %c0_36] : memref<16x32xf32, #tpu.memory_space<vmem>>, vector<16x4xf32>
    tpu.vector_store %arg21[%c0_35, %c0_36], %64 {strides = array<i32>} : memref<16x32xf32, #tpu.memory_space<vmem>>, vector<16x4xf32>,
    %c0_37 = arith.constant 0 : index
    %c4 = arith.constant 4 : index
    %66 = vector.load %arg20[%c0_37, %c4] : memref<16x96xf32, #tpu.memory_space<vmem>>, vector<16x4xf32>
    %c0_38 = arith.constant 0 : index
    %c36 = arith.constant 36 : index
    %67 = vector.load %arg20[%c0_38, %c36] : memref<16x96xf32, #tpu.memory_space<vmem>>, vector<16x4xf32>
    %c0_39 = arith.constant 0 : index
    %c68 = arith.constant 68 : index
    %68 = vector.load %arg20[%c0_39, %c68] : memref<16x96xf32, #tpu.memory_space<vmem>>, vector<16x4xf32>
    %cst_40 = arith.constant dense<0.000000e+00> : vector<16x16xf32>
    %69 = tpu.matmul %66, %67, %cst_40 {dimension_numbers = #tpu.dot_dimension_numbers<[1], [1], [0], [0], [0, 0, 1, 0], [], []>} : vector<16x4xf32>, vector<16x4xf32>, vector<16x16xf32> -> vector<16x16xf32>
    %70 = arith.addf %69, %39 : vector<16x16xf32>
    %cst_41 = arith.constant dense<0xFF800000> : vector<16xf32>
    %71 = vector.multi_reduction <maximumf>, %70, %cst_41 [1] : vector<16x16xf32> to vector<16xf32>
    %72 = vector.shape_cast %71 : vector<16xf32> to vector<16x1xf32>
    %73 = vector.broadcast %72 : vector<16x1xf32> to vector<16x16xf32>
    %74 = arith.subf %70, %73 : vector<16x16xf32>
    %75 = math.exp %74 : vector<16x16xf32>
    %cst_42 = arith.constant dense<0.000000e+00> : vector<16xf32>
    %76 = vector.multi_reduction <add>, %75, %cst_42 [1] : vector<16x16xf32> to vector<16xf32>
    %77 = vector.shape_cast %76 : vector<16xf32> to vector<16x1xf32>
    %78 = tpu.reciprocal %77 {approx = true} : vector<16x1xf32> -> vector<16x1xf32>
    %79 = vector.broadcast %78 : vector<16x1xf32> to vector<16x16xf32>
    %80 = arith.mulf %75, %79 : vector<16x16xf32>
    %cst_43 = arith.constant dense<0.000000e+00> : vector<16x4xf32>
    %81 = tpu.matmul %80, %68, %cst_43 {dimension_numbers = #tpu.dot_dimension_numbers<[1], [0], [0], [1], [0, 0, 1, 1], [], []>} : vector<16x16xf32>, vector<16x4xf32>, vector<16x4xf32> -> vector<16x4xf32>
    %c0_44 = arith.constant 0 : index
    %c4_45 = arith.constant 4 : index
    %82 = vector.load %arg21[%c0_44, %c4_45] : memref<16x32xf32, #tpu.memory_space<vmem>>, vector<16x4xf32>
    tpu.vector_store %arg21[%c0_44, %c4_45], %81 {strides = array<i32>} : memref<16x32xf32, #tpu.memory_space<vmem>>, vector<16x4xf32>,
    %c0_46 = arith.constant 0 : index
    %c8 = arith.constant 8 : index
    %83 = vector.load %arg20[%c0_46, %c8] : memref<16x96xf32, #tpu.memory_space<vmem>>, vector<16x4xf32>
    %c0_47 = arith.constant 0 : index
    %c40 = arith.constant 40 : index
    %84 = vector.load %arg20[%c0_47, %c40] : memref<16x96xf32, #tpu.memory_space<vmem>>, vector<16x4xf32>
    %c0_48 = arith.constant 0 : index
    %c72 = arith.constant 72 : index
    %85 = vector.load %arg20[%c0_48, %c72] : memref<16x96xf32, #tpu.memory_space<vmem>>, vector<16x4xf32>
    %cst_49 = arith.constant dense<0.000000e+00> : vector<16x16xf32>
    %86 = tpu.matmul %83, %84, %cst_49 {dimension_numbers = #tpu.dot_dimension_numbers<[1], [1], [0], [0], [0, 0, 1, 0], [], []>} : vector<16x4xf32>, vector<16x4xf32>, vector<16x16xf32> -> vector<16x16xf32>
    %87 = arith.addf %86, %39 : vector<16x16xf32>
    %cst_50 = arith.constant dense<0xFF800000> : vector<16xf32>
    %88 = vector.multi_reduction <maximumf>, %87, %cst_50 [1] : vector<16x16xf32> to vector<16xf32>
    %89 = vector.shape_cast %88 : vector<16xf32> to vector<16x1xf32>
    %90 = vector.broadcast %89 : vector<16x1xf32> to vector<16x16xf32>
    %91 = arith.subf %87, %90 : vector<16x16xf32>
    %92 = math.exp %91 : vector<16x16xf32>
    %cst_51 = arith.constant dense<0.000000e+00> : vector<16xf32>
    %93 = vector.multi_reduction <add>, %92, %cst_51 [1] : vector<16x16xf32> to vector<16xf32>
    %94 = vector.shape_cast %93 : vector<16xf32> to vector<16x1xf32>
    %95 = tpu.reciprocal %94 {approx = true} : vector<16x1xf32> -> vector<16x1xf32>
    %96 = vector.broadcast %95 : vector<16x1xf32> to vector<16x16xf32>
    %97 = arith.mulf %92, %96 : vector<16x16xf32>
    %cst_52 = arith.constant dense<0.000000e+00> : vector<16x4xf32>
    %98 = tpu.matmul %97, %85, %cst_52 {dimension_numbers = #tpu.dot_dimension_numbers<[1], [0], [0], [1], [0, 0, 1, 1], [], []>} : vector<16x16xf32>, vector<16x4xf32>, vector<16x4xf32> -> vector<16x4xf32>
    %c0_53 = arith.constant 0 : index
    %c8_54 = arith.constant 8 : index
    %99 = vector.load %arg21[%c0_53, %c8_54] : memref<16x32xf32, #tpu.memory_space<vmem>>, vector<16x4xf32>
    tpu.vector_store %arg21[%c0_53, %c8_54], %98 {strides = array<i32>} : memref<16x32xf32, #tpu.memory_space<vmem>>, vector<16x4xf32>,
    %c0_55 = arith.constant 0 : index
    %c12 = arith.constant 12 : index
    %100 = vector.load %arg20[%c0_55, %c12] : memref<16x96xf32, #tpu.memory_space<vmem>>, vector<16x4xf32>
    %c0_56 = arith.constant 0 : index
    %c44 = arith.constant 44 : index
    %101 = vector.load %arg20[%c0_56, %c44] : memref<16x96xf32, #tpu.memory_space<vmem>>, vector<16x4xf32>
    %c0_57 = arith.constant 0 : index
    %c76 = arith.constant 76 : index
    %102 = vector.load %arg20[%c0_57, %c76] : memref<16x96xf32, #tpu.memory_space<vmem>>, vector<16x4xf32>
    %cst_58 = arith.constant dense<0.000000e+00> : vector<16x16xf32>
    %103 = tpu.matmul %100, %101, %cst_58 {dimension_numbers = #tpu.dot_dimension_numbers<[1], [1], [0], [0], [0, 0, 1, 0], [], []>} : vector<16x4xf32>, vector<16x4xf32>, vector<16x16xf32> -> vector<16x16xf32>
    %104 = arith.addf %103, %39 : vector<16x16xf32>
    %cst_59 = arith.constant dense<0xFF800000> : vector<16xf32>
    %105 = vector.multi_reduction <maximumf>, %104, %cst_59 [1] : vector<16x16xf32> to vector<16xf32>
    %106 = vector.shape_cast %105 : vector<16xf32> to vector<16x1xf32>
    %107 = vector.broadcast %106 : vector<16x1xf32> to vector<16x16xf32>
    %108 = arith.subf %104, %107 : vector<16x16xf32>
    %109 = math.exp %108 : vector<16x16xf32>
    %cst_60 = arith.constant dense<0.000000e+00> : vector<16xf32>
    %110 = vector.multi_reduction <add>, %109, %cst_60 [1] : vector<16x16xf32> to vector<16xf32>
    %111 = vector.shape_cast %110 : vector<16xf32> to vector<16x1xf32>
    %112 = tpu.reciprocal %111 {approx = true} : vector<16x1xf32> -> vector<16x1xf32>
    %113 = vector.broadcast %112 : vector<16x1xf32> to vector<16x16xf32>
    %114 = arith.mulf %109, %113 : vector<16x16xf32>
    %cst_61 = arith.constant dense<0.000000e+00> : vector<16x4xf32>
    %115 = tpu.matmul %114, %102, %cst_61 {dimension_numbers = #tpu.dot_dimension_numbers<[1], [0], [0], [1], [0, 0, 1, 1], [], []>} : vector<16x16xf32>, vector<16x4xf32>, vector<16x4xf32> -> vector<16x4xf32>
    %c0_62 = arith.constant 0 : index
    %c12_63 = arith.constant 12 : index
    %116 = vector.load %arg21[%c0_62, %c12_63] : memref<16x32xf32, #tpu.memory_space<vmem>>, vector<16x4xf32>
    tpu.vector_store %arg21[%c0_62, %c12_63], %115 {strides = array<i32>} : memref<16x32xf32, #tpu.memory_space<vmem>>, vector<16x4xf32>,
    %c0_64 = arith.constant 0 : index
    %c16 = arith.constant 16 : index
    %117 = vector.load %arg20[%c0_64, %c16] : memref<16x96xf32, #tpu.memory_space<vmem>>, vector<16x4xf32>
    %c0_65 = arith.constant 0 : index
    %c48 = arith.constant 48 : index
    %118 = vector.load %arg20[%c0_65, %c48] : memref<16x96xf32, #tpu.memory_space<vmem>>, vector<16x4xf32>
    %c0_66 = arith.constant 0 : index
    %c80 = arith.constant 80 : index
    %119 = vector.load %arg20[%c0_66, %c80] : memref<16x96xf32, #tpu.memory_space<vmem>>, vector<16x4xf32>
    %cst_67 = arith.constant dense<0.000000e+00> : vector<16x16xf32>
    %120 = tpu.matmul %117, %118, %cst_67 {dimension_numbers = #tpu.dot_dimension_numbers<[1], [1], [0], [0], [0, 0, 1, 0], [], []>} : vector<16x4xf32>, vector<16x4xf32>, vector<16x16xf32> -> vector<16x16xf32>
    %121 = arith.addf %120, %39 : vector<16x16xf32>
    %cst_68 = arith.constant dense<0xFF800000> : vector<16xf32>
    %122 = vector.multi_reduction <maximumf>, %121, %cst_68 [1] : vector<16x16xf32> to vector<16xf32>
    %123 = vector.shape_cast %122 : vector<16xf32> to vector<16x1xf32>
    %124 = vector.broadcast %123 : vector<16x1xf32> to vector<16x16xf32>
    %125 = arith.subf %121, %124 : vector<16x16xf32>
    %126 = math.exp %125 : vector<16x16xf32>
    %cst_69 = arith.constant dense<0.000000e+00> : vector<16xf32>
    %127 = vector.multi_reduction <add>, %126, %cst_69 [1] : vector<16x16xf32> to vector<16xf32>
    %128 = vector.shape_cast %127 : vector<16xf32> to vector<16x1xf32>
    %129 = tpu.reciprocal %128 {approx = true} : vector<16x1xf32> -> vector<16x1xf32>
    %130 = vector.broadcast %129 : vector<16x1xf32> to vector<16x16xf32>
    %131 = arith.mulf %126, %130 : vector<16x16xf32>
    %cst_70 = arith.constant dense<0.000000e+00> : vector<16x4xf32>
    %132 = tpu.matmul %131, %119, %cst_70 {dimension_numbers = #tpu.dot_dimension_numbers<[1], [0], [0], [1], [0, 0, 1, 1], [], []>} : vector<16x16xf32>, vector<16x4xf32>, vector<16x4xf32> -> vector<16x4xf32>
    %c0_71 = arith.constant 0 : index
    %c16_72 = arith.constant 16 : index
    %133 = vector.load %arg21[%c0_71, %c16_72] : memref<16x32xf32, #tpu.memory_space<vmem>>, vector<16x4xf32>
    tpu.vector_store %arg21[%c0_71, %c16_72], %132 {strides = array<i32>} : memref<16x32xf32, #tpu.memory_space<vmem>>, vector<16x4xf32>,
    %c0_73 = arith.constant 0 : index
    %c20 = arith.constant 20 : index
    %134 = vector.load %arg20[%c0_73, %c20] : memref<16x96xf32, #tpu.memory_space<vmem>>, vector<16x4xf32>
    %c0_74 = arith.constant 0 : index
    %c52 = arith.constant 52 : index
    %135 = vector.load %arg20[%c0_74, %c52] : memref<16x96xf32, #tpu.memory_space<vmem>>, vector<16x4xf32>
    %c0_75 = arith.constant 0 : index
    %c84 = arith.constant 84 : index
    %136 = vector.load %arg20[%c0_75, %c84] : memref<16x96xf32, #tpu.memory_space<vmem>>, vector<16x4xf32>
    %cst_76 = arith.constant dense<0.000000e+00> : vector<16x16xf32>
    %137 = tpu.matmul %134, %135, %cst_76 {dimension_numbers = #tpu.dot_dimension_numbers<[1], [1], [0], [0], [0, 0, 1, 0], [], []>} : vector<16x4xf32>, vector<16x4xf32>, vector<16x16xf32> -> vector<16x16xf32>
    %138 = arith.addf %137, %39 : vector<16x16xf32>
    %cst_77 = arith.constant dense<0xFF800000> : vector<16xf32>
    %139 = vector.multi_reduction <maximumf>, %138, %cst_77 [1] : vector<16x16xf32> to vector<16xf32>
    %140 = vector.shape_cast %139 : vector<16xf32> to vector<16x1xf32>
    %141 = vector.broadcast %140 : vector<16x1xf32> to vector<16x16xf32>
    %142 = arith.subf %138, %141 : vector<16x16xf32>
    %143 = math.exp %142 : vector<16x16xf32>
    %cst_78 = arith.constant dense<0.000000e+00> : vector<16xf32>
    %144 = vector.multi_reduction <add>, %143, %cst_78 [1] : vector<16x16xf32> to vector<16xf32>
    %145 = vector.shape_cast %144 : vector<16xf32> to vector<16x1xf32>
    %146 = tpu.reciprocal %145 {approx = true} : vector<16x1xf32> -> vector<16x1xf32>
    %147 = vector.broadcast %146 : vector<16x1xf32> to vector<16x16xf32>
    %148 = arith.mulf %143, %147 : vector<16x16xf32>
    %cst_79 = arith.constant dense<0.000000e+00> : vector<16x4xf32>
    %149 = tpu.matmul %148, %136, %cst_79 {dimension_numbers = #tpu.dot_dimension_numbers<[1], [0], [0], [1], [0, 0, 1, 1], [], []>} : vector<16x16xf32>, vector<16x4xf32>, vector<16x4xf32> -> vector<16x4xf32>
    %c0_80 = arith.constant 0 : index
    %c20_81 = arith.constant 20 : index
    %150 = vector.load %arg21[%c0_80, %c20_81] : memref<16x32xf32, #tpu.memory_space<vmem>>, vector<16x4xf32>
    tpu.vector_store %arg21[%c0_80, %c20_81], %149 {strides = array<i32>} : memref<16x32xf32, #tpu.memory_space<vmem>>, vector<16x4xf32>,
    %c0_82 = arith.constant 0 : index
    %c24 = arith.constant 24 : index
    %151 = vector.load %arg20[%c0_82, %c24] : memref<16x96xf32, #tpu.memory_space<vmem>>, vector<16x4xf32>
    %c0_83 = arith.constant 0 : index
    %c56 = arith.constant 56 : index
    %152 = vector.load %arg20[%c0_83, %c56] : memref<16x96xf32, #tpu.memory_space<vmem>>, vector<16x4xf32>
    %c0_84 = arith.constant 0 : index
    %c88 = arith.constant 88 : index
    %153 = vector.load %arg20[%c0_84, %c88] : memref<16x96xf32, #tpu.memory_space<vmem>>, vector<16x4xf32>
    %cst_85 = arith.constant dense<0.000000e+00> : vector<16x16xf32>
    %154 = tpu.matmul %151, %152, %cst_85 {dimension_numbers = #tpu.dot_dimension_numbers<[1], [1], [0], [0], [0, 0, 1, 0], [], []>} : vector<16x4xf32>, vector<16x4xf32>, vector<16x16xf32> -> vector<16x16xf32>
    %155 = arith.addf %154, %39 : vector<16x16xf32>
    %cst_86 = arith.constant dense<0xFF800000> : vector<16xf32>
    %156 = vector.multi_reduction <maximumf>, %155, %cst_86 [1] : vector<16x16xf32> to vector<16xf32>
    %157 = vector.shape_cast %156 : vector<16xf32> to vector<16x1xf32>
    %158 = vector.broadcast %157 : vector<16x1xf32> to vector<16x16xf32>
    %159 = arith.subf %155, %158 : vector<16x16xf32>
    %160 = math.exp %159 : vector<16x16xf32>
    %cst_87 = arith.constant dense<0.000000e+00> : vector<16xf32>
    %161 = vector.multi_reduction <add>, %160, %cst_87 [1] : vector<16x16xf32> to vector<16xf32>
    %162 = vector.shape_cast %161 : vector<16xf32> to vector<16x1xf32>
    %163 = tpu.reciprocal %162 {approx = true} : vector<16x1xf32> -> vector<16x1xf32>
    %164 = vector.broadcast %163 : vector<16x1xf32> to vector<16x16xf32>
    %165 = arith.mulf %160, %164 : vector<16x16xf32>
    %cst_88 = arith.constant dense<0.000000e+00> : vector<16x4xf32>
    %166 = tpu.matmul %165, %153, %cst_88 {dimension_numbers = #tpu.dot_dimension_numbers<[1], [0], [0], [1], [0, 0, 1, 1], [], []>} : vector<16x16xf32>, vector<16x4xf32>, vector<16x4xf32> -> vector<16x4xf32>
    %c0_89 = arith.constant 0 : index
    %c24_90 = arith.constant 24 : index
    %167 = vector.load %arg21[%c0_89, %c24_90] : memref<16x32xf32, #tpu.memory_space<vmem>>, vector<16x4xf32>
    tpu.vector_store %arg21[%c0_89, %c24_90], %166 {strides = array<i32>} : memref<16x32xf32, #tpu.memory_space<vmem>>, vector<16x4xf32>,
    %c0_91 = arith.constant 0 : index
    %c28 = arith.constant 28 : index
    %168 = vector.load %arg20[%c0_91, %c28] : memref<16x96xf32, #tpu.memory_space<vmem>>, vector<16x4xf32>
    %c0_92 = arith.constant 0 : index
    %c60 = arith.constant 60 : index
    %169 = vector.load %arg20[%c0_92, %c60] : memref<16x96xf32, #tpu.memory_space<vmem>>, vector<16x4xf32>
    %c0_93 = arith.constant 0 : index
    %c92 = arith.constant 92 : index
    %170 = vector.load %arg20[%c0_93, %c92] : memref<16x96xf32, #tpu.memory_space<vmem>>, vector<16x4xf32>
    %cst_94 = arith.constant dense<0.000000e+00> : vector<16x16xf32>
    %171 = tpu.matmul %168, %169, %cst_94 {dimension_numbers = #tpu.dot_dimension_numbers<[1], [1], [0], [0], [0, 0, 1, 0], [], []>} : vector<16x4xf32>, vector<16x4xf32>, vector<16x16xf32> -> vector<16x16xf32>
    %172 = arith.addf %171, %39 : vector<16x16xf32>
    %cst_95 = arith.constant dense<0xFF800000> : vector<16xf32>
    %173 = vector.multi_reduction <maximumf>, %172, %cst_95 [1] : vector<16x16xf32> to vector<16xf32>
    %174 = vector.shape_cast %173 : vector<16xf32> to vector<16x1xf32>
    %175 = vector.broadcast %174 : vector<16x1xf32> to vector<16x16xf32>
    %176 = arith.subf %172, %175 : vector<16x16xf32>
    %177 = math.exp %176 : vector<16x16xf32>
    %cst_96 = arith.constant dense<0.000000e+00> : vector<16xf32>
    %178 = vector.multi_reduction <add>, %177, %cst_96 [1] : vector<16x16xf32> to vector<16xf32>
    %179 = vector.shape_cast %178 : vector<16xf32> to vector<16x1xf32>
    %180 = tpu.reciprocal %179 {approx = true} : vector<16x1xf32> -> vector<16x1xf32>
    %181 = vector.broadcast %180 : vector<16x1xf32> to vector<16x16xf32>
    %182 = arith.mulf %177, %181 : vector<16x16xf32>
    %cst_97 = arith.constant dense<0.000000e+00> : vector<16x4xf32>
    %183 = tpu.matmul %182, %170, %cst_97 {dimension_numbers = #tpu.dot_dimension_numbers<[1], [0], [0], [1], [0, 0, 1, 1], [], []>} : vector<16x16xf32>, vector<16x4xf32>, vector<16x4xf32> -> vector<16x4xf32>
    %c0_98 = arith.constant 0 : index
    %c28_99 = arith.constant 28 : index
    %184 = vector.load %arg21[%c0_98, %c28_99] : memref<16x32xf32, #tpu.memory_space<vmem>>, vector<16x4xf32>
    tpu.vector_store %arg21[%c0_98, %c28_99], %183 {strides = array<i32>} : memref<16x32xf32, #tpu.memory_space<vmem>>, vector<16x4xf32>,
    %c0_100 = arith.constant 0 : index
    %c0_101 = arith.constant 0 : index
    %185 = vector.load %arg21[%c0_100, %c0_101] : memref<16x32xf32, #tpu.memory_space<vmem>>, vector<16x32xf32>
    %186 = arith.truncf %185 : vector<16x32xf32> to vector<16x32xbf16>
    %c0_102 = arith.constant 0 : index
    %c0_103 = arith.constant 0 : index
    %c0_104 = arith.constant 0 : index
    %187 = vector.load %arg9[%c0_102, %c0_103, %c0_104] : memref<2x32x32xbf16, #tpu.memory_space<vmem>>, vector<1x32x32xbf16>
    %188 = vector.shape_cast %187 : vector<1x32x32xbf16> to vector<32x32xbf16>
    %cst_105 = arith.constant dense<0.000000e+00> : vector<16x32xf32>
    %189 = tpu.matmul %186, %188, %cst_105 {dimension_numbers = #tpu.dot_dimension_numbers<[1], [0], [0], [1], [0, 0, 1, 1], [], []>} : vector<16x32xbf16>, vector<32x32xbf16>, vector<16x32xf32> -> vector<16x32xf32>
    %c0_106 = arith.constant 0 : index
    %c0_107 = arith.constant 0 : index
    %c0_108 = arith.constant 0 : index
    %190 = vector.load %arg10[%c0_106, %c0_107, %c0_108] : memref<2x1x32xf32, #tpu.memory_space<vmem>>, vector<1x1x32xf32>
    %191 = vector.shape_cast %190 : vector<1x1x32xf32> to vector<1x32xf32>
    %192 = vector.broadcast %191 : vector<1x32xf32> to vector<16x32xf32>
    %193 = arith.addf %189, %192 : vector<16x32xf32>
    %194 = arith.addf %31, %193 : vector<16x32xf32>
    %c0_109 = arith.constant 0 : index
    %c0_110 = arith.constant 0 : index
    %c0_111 = arith.constant 0 : index
    %195 = vector.load %arg15[%c0_109, %c0_110, %c0_111] : memref<2x1x32xf32, #tpu.memory_space<vmem>>, vector<1x1x32xf32>
    %196 = vector.shape_cast %195 : vector<1x1x32xf32> to vector<1x32xf32>
    %c0_112 = arith.constant 0 : index
    %c0_113 = arith.constant 0 : index
    %c0_114 = arith.constant 0 : index
    %197 = vector.load %arg16[%c0_112, %c0_113, %c0_114] : memref<2x1x32xf32, #tpu.memory_space<vmem>>, vector<1x1x32xf32>
    %198 = vector.shape_cast %197 : vector<1x1x32xf32> to vector<1x32xf32>
    %cst_115 = arith.constant dense<0.000000e+00> : vector<16xf32>
    %199 = vector.multi_reduction <add>, %194, %cst_115 [1] : vector<16x32xf32> to vector<16xf32>
    %200 = vector.shape_cast %199 : vector<16xf32> to vector<16x1xf32>
    %cst_116 = arith.constant 3.200000e+01 : f32
    %201 = vector.broadcast %cst_116 : f32 to vector<16x1xf32>
    %202 = arith.divf %200, %201 : vector<16x1xf32>
    %203 = vector.broadcast %202 : vector<16x1xf32> to vector<16x32xf32>
    %204 = arith.subf %194, %203 : vector<16x32xf32>
    %205 = arith.mulf %204, %204 : vector<16x32xf32>
    %cst_117 = arith.constant dense<0.000000e+00> : vector<16xf32>
    %206 = vector.multi_reduction <add>, %205, %cst_117 [1] : vector<16x32xf32> to vector<16xf32>
    %207 = vector.shape_cast %206 : vector<16xf32> to vector<16x1xf32>
    %cst_118 = arith.constant 3.200000e+01 : f32
    %208 = vector.broadcast %cst_118 : f32 to vector<16x1xf32>
    %209 = arith.divf %207, %208 : vector<16x1xf32>
    %210 = vector.broadcast %202 : vector<16x1xf32> to vector<16x32xf32>
    %211 = arith.subf %194, %210 : vector<16x32xf32>
    %cst_119 = arith.constant 9.99999974E-6 : f32
    %212 = vector.broadcast %cst_119 : f32 to vector<16x1xf32>
    %213 = arith.addf %209, %212 : vector<16x1xf32>
    %214 = math.rsqrt %213 : vector<16x1xf32>
    %215 = vector.broadcast %214 : vector<16x1xf32> to vector<16x32xf32>
    %216 = arith.mulf %211, %215 : vector<16x32xf32>
    %217 = vector.broadcast %196 : vector<1x32xf32> to vector<16x32xf32>
    %218 = arith.mulf %216, %217 : vector<16x32xf32>
    %219 = vector.broadcast %198 : vector<1x32xf32> to vector<16x32xf32>
    %220 = arith.addf %218, %219 : vector<16x32xf32>
    %221 = arith.truncf %220 : vector<16x32xf32> to vector<16x32xbf16>
    %c0_120 = arith.constant 0 : index
    %c0_121 = arith.constant 0 : index
    %c0_122 = arith.constant 0 : index
    %222 = vector.load %arg11[%c0_120, %c0_121, %c0_122] : memref<2x32x2048xbf16, #tpu.memory_space<vmem>>, vector<1x32x2048xbf16>
    %223 = vector.shape_cast %222 : vector<1x32x2048xbf16> to vector<32x2048xbf16>
    %cst_123 = arith.constant dense<0.000000e+00> : vector<16x2048xf32>
    %224 = tpu.matmul %221, %223, %cst_123 {dimension_numbers = #tpu.dot_dimension_numbers<[1], [0], [0], [1], [0, 0, 1, 1], [], []>} : vector<16x32xbf16>, vector<32x2048xbf16>, vector<16x2048xf32> -> vector<16x2048xf32>
    %c0_124 = arith.constant 0 : index
    %c0_125 = arith.constant 0 : index
    %c0_126 = arith.constant 0 : index
    %225 = vector.load %arg12[%c0_124, %c0_125, %c0_126] : memref<2x1x2048xf32, #tpu.memory_space<vmem>>, vector<1x1x2048xf32>
    %226 = vector.shape_cast %225 : vector<1x1x2048xf32> to vector<1x2048xf32>
    %227 = vector.broadcast %226 : vector<1x2048xf32> to vector<16x2048xf32>
    %228 = arith.addf %224, %227 : vector<16x2048xf32>
    %cst_127 = arith.constant 0.000000e+00 : f32
    %229 = vector.broadcast %cst_127 : f32 to vector<16x2048xf32>
    %230 = arith.maximumf %228, %229 : vector<16x2048xf32>
    %231 = arith.truncf %230 : vector<16x2048xf32> to vector<16x2048xbf16>
    %c0_128 = arith.constant 0 : index
    %c0_129 = arith.constant 0 : index
    %c0_130 = arith.constant 0 : index
    %232 = vector.load %arg13[%c0_128, %c0_129, %c0_130] : memref<2x2048x32xbf16, #tpu.memory_space<vmem>>, vector<1x2048x32xbf16>
    %233 = vector.shape_cast %232 : vector<1x2048x32xbf16> to vector<2048x32xbf16>
    %cst_131 = arith.constant dense<0.000000e+00> : vector<16x32xf32>
    %234 = tpu.matmul %231, %233, %cst_131 {dimension_numbers = #tpu.dot_dimension_numbers<[1], [0], [0], [1], [0, 0, 1, 1], [], []>} : vector<16x2048xbf16>, vector<2048x32xbf16>, vector<16x32xf32> -> vector<16x32xf32>
    %c0_132 = arith.constant 0 : index
    %c0_133 = arith.constant 0 : index
    %c0_134 = arith.constant 0 : index
    %235 = vector.load %arg14[%c0_132, %c0_133, %c0_134] : memref<2x1x32xf32, #tpu.memory_space<vmem>>, vector<1x1x32xf32>
    %236 = vector.shape_cast %235 : vector<1x1x32xf32> to vector<1x32xf32>
    %237 = vector.broadcast %236 : vector<1x32xf32> to vector<16x32xf32>
    %238 = arith.addf %234, %237 : vector<16x32xf32>
    %239 = arith.addf %220, %238 : vector<16x32xf32>
    %c0_135 = arith.constant 0 : index
    %c0_136 = arith.constant 0 : index
    %c0_137 = arith.constant 0 : index
    %240 = vector.load %arg17[%c0_135, %c0_136, %c0_137] : memref<2x1x32xf32, #tpu.memory_space<vmem>>, vector<1x1x32xf32>
    %241 = vector.shape_cast %240 : vector<1x1x32xf32> to vector<1x32xf32>
    %c0_138 = arith.constant 0 : index
    %c0_139 = arith.constant 0 : index
    %c0_140 = arith.constant 0 : index
    %242 = vector.load %arg18[%c0_138, %c0_139, %c0_140] : memref<2x1x32xf32, #tpu.memory_space<vmem>>, vector<1x1x32xf32>
    %243 = vector.shape_cast %242 : vector<1x1x32xf32> to vector<1x32xf32>
    %cst_141 = arith.constant dense<0.000000e+00> : vector<16xf32>
    %244 = vector.multi_reduction <add>, %239, %cst_141 [1] : vector<16x32xf32> to vector<16xf32>
    %245 = vector.shape_cast %244 : vector<16xf32> to vector<16x1xf32>
    %cst_142 = arith.constant 3.200000e+01 : f32
    %246 = vector.broadcast %cst_142 : f32 to vector<16x1xf32>
    %247 = arith.divf %245, %246 : vector<16x1xf32>
    %248 = vector.broadcast %247 : vector<16x1xf32> to vector<16x32xf32>
    %249 = arith.subf %239, %248 : vector<16x32xf32>
    %250 = arith.mulf %249, %249 : vector<16x32xf32>
    %cst_143 = arith.constant dense<0.000000e+00> : vector<16xf32>
    %251 = vector.multi_reduction <add>, %250, %cst_143 [1] : vector<16x32xf32> to vector<16xf32>
    %252 = vector.shape_cast %251 : vector<16xf32> to vector<16x1xf32>
    %cst_144 = arith.constant 3.200000e+01 : f32
    %253 = vector.broadcast %cst_144 : f32 to vector<16x1xf32>
    %254 = arith.divf %252, %253 : vector<16x1xf32>
    %255 = vector.broadcast %247 : vector<16x1xf32> to vector<16x32xf32>
    %256 = arith.subf %239, %255 : vector<16x32xf32>
    %cst_145 = arith.constant 9.99999974E-6 : f32
    %257 = vector.broadcast %cst_145 : f32 to vector<16x1xf32>
    %258 = arith.addf %254, %257 : vector<16x1xf32>
    %259 = math.rsqrt %258 : vector<16x1xf32>
    %260 = vector.broadcast %259 : vector<16x1xf32> to vector<16x32xf32>
    %261 = arith.mulf %256, %260 : vector<16x32xf32>
    %262 = vector.broadcast %241 : vector<1x32xf32> to vector<16x32xf32>
    %263 = arith.mulf %261, %262 : vector<16x32xf32>
    %264 = vector.broadcast %243 : vector<1x32xf32> to vector<16x32xf32>
    %265 = arith.addf %263, %264 : vector<16x32xf32>
    %266 = arith.truncf %265 : vector<16x32xf32> to vector<16x32xbf16>
    %c1 = arith.constant 1 : index
    %c0_146 = arith.constant 0 : index
    %c0_147 = arith.constant 0 : index
    %267 = vector.load %arg7[%c1, %c0_146, %c0_147] : memref<2x32x96xbf16, #tpu.memory_space<vmem>>, vector<1x32x96xbf16>
    %268 = vector.shape_cast %267 : vector<1x32x96xbf16> to vector<32x96xbf16>
    %cst_148 = arith.constant dense<0.000000e+00> : vector<16x96xf32>
    %269 = tpu.matmul %266, %268, %cst_148 {dimension_numbers = #tpu.dot_dimension_numbers<[1], [0], [0], [1], [0, 0, 1, 1], [], []>} : vector<16x32xbf16>, vector<32x96xbf16>, vector<16x96xf32> -> vector<16x96xf32>
    %c1_149 = arith.constant 1 : index
    %c0_150 = arith.constant 0 : index
    %c0_151 = arith.constant 0 : index
    %270 = vector.load %arg8[%c1_149, %c0_150, %c0_151] : memref<2x1x96xf32, #tpu.memory_space<vmem>>, vector<1x1x96xf32>
    %271 = vector.shape_cast %270 : vector<1x1x96xf32> to vector<1x96xf32>
    %272 = vector.broadcast %271 : vector<1x96xf32> to vector<16x96xf32>
    %273 = arith.addf %269, %272 : vector<16x96xf32>
    %c0_152 = arith.constant 0 : index
    %c0_153 = arith.constant 0 : index
    %274 = vector.load %arg20[%c0_152, %c0_153] : memref<16x96xf32, #tpu.memory_space<vmem>>, vector<16x96xf32>
    tpu.vector_store %arg20[%c0_152, %c0_153], %273 {strides = array<i32>} : memref<16x96xf32, #tpu.memory_space<vmem>>, vector<16x96xf32>,
    %c0_154 = arith.constant 0 : index
    %c0_155 = arith.constant 0 : index
    %275 = vector.load %arg20[%c0_154, %c0_155] : memref<16x96xf32, #tpu.memory_space<vmem>>, vector<16x4xf32>
    %c0_156 = arith.constant 0 : index
    %c32_157 = arith.constant 32 : index
    %276 = vector.load %arg20[%c0_156, %c32_157] : memref<16x96xf32, #tpu.memory_space<vmem>>, vector<16x4xf32>
    %c0_158 = arith.constant 0 : index
    %c64_159 = arith.constant 64 : index
    %277 = vector.load %arg20[%c0_158, %c64_159] : memref<16x96xf32, #tpu.memory_space<vmem>>, vector<16x4xf32>
    %cst_160 = arith.constant dense<0.000000e+00> : vector<16x16xf32>
    %278 = tpu.matmul %275, %276, %cst_160 {dimension_numbers = #tpu.dot_dimension_numbers<[1], [1], [0], [0], [0, 0, 1, 0], [], []>} : vector<16x4xf32>, vector<16x4xf32>, vector<16x16xf32> -> vector<16x16xf32>
    %279 = arith.addf %278, %39 : vector<16x16xf32>
    %cst_161 = arith.constant dense<0xFF800000> : vector<16xf32>
    %280 = vector.multi_reduction <maximumf>, %279, %cst_161 [1] : vector<16x16xf32> to vector<16xf32>
    %281 = vector.shape_cast %280 : vector<16xf32> to vector<16x1xf32>
    %282 = vector.broadcast %281 : vector<16x1xf32> to vector<16x16xf32>
    %283 = arith.subf %279, %282 : vector<16x16xf32>
    %284 = math.exp %283 : vector<16x16xf32>
    %cst_162 = arith.constant dense<0.000000e+00> : vector<16xf32>
    %285 = vector.multi_reduction <add>, %284, %cst_162 [1] : vector<16x16xf32> to vector<16xf32>
    %286 = vector.shape_cast %285 : vector<16xf32> to vector<16x1xf32>
    %287 = tpu.reciprocal %286 {approx = true} : vector<16x1xf32> -> vector<16x1xf32>
    %288 = vector.broadcast %287 : vector<16x1xf32> to vector<16x16xf32>
    %289 = arith.mulf %284, %288 : vector<16x16xf32>
    %cst_163 = arith.constant dense<0.000000e+00> : vector<16x4xf32>
    %290 = tpu.matmul %289, %277, %cst_163 {dimension_numbers = #tpu.dot_dimension_numbers<[1], [0], [0], [1], [0, 0, 1, 1], [], []>} : vector<16x16xf32>, vector<16x4xf32>, vector<16x4xf32> -> vector<16x4xf32>
    %c0_164 = arith.constant 0 : index
    %c0_165 = arith.constant 0 : index
    %291 = vector.load %arg21[%c0_164, %c0_165] : memref<16x32xf32, #tpu.memory_space<vmem>>, vector<16x4xf32>
    tpu.vector_store %arg21[%c0_164, %c0_165], %290 {strides = array<i32>} : memref<16x32xf32, #tpu.memory_space<vmem>>, vector<16x4xf32>,
    %c0_166 = arith.constant 0 : index
    %c4_167 = arith.constant 4 : index
    %292 = vector.load %arg20[%c0_166, %c4_167] : memref<16x96xf32, #tpu.memory_space<vmem>>, vector<16x4xf32>
    %c0_168 = arith.constant 0 : index
    %c36_169 = arith.constant 36 : index
    %293 = vector.load %arg20[%c0_168, %c36_169] : memref<16x96xf32, #tpu.memory_space<vmem>>, vector<16x4xf32>
    %c0_170 = arith.constant 0 : index
    %c68_171 = arith.constant 68 : index
    %294 = vector.load %arg20[%c0_170, %c68_171] : memref<16x96xf32, #tpu.memory_space<vmem>>, vector<16x4xf32>
    %cst_172 = arith.constant dense<0.000000e+00> : vector<16x16xf32>
    %295 = tpu.matmul %292, %293, %cst_172 {dimension_numbers = #tpu.dot_dimension_numbers<[1], [1], [0], [0], [0, 0, 1, 0], [], []>} : vector<16x4xf32>, vector<16x4xf32>, vector<16x16xf32> -> vector<16x16xf32>
    %296 = arith.addf %295, %39 : vector<16x16xf32>
    %cst_173 = arith.constant dense<0xFF800000> : vector<16xf32>
    %297 = vector.multi_reduction <maximumf>, %296, %cst_173 [1] : vector<16x16xf32> to vector<16xf32>
    %298 = vector.shape_cast %297 : vector<16xf32> to vector<16x1xf32>
    %299 = vector.broadcast %298 : vector<16x1xf32> to vector<16x16xf32>
    %300 = arith.subf %296, %299 : vector<16x16xf32>
    %301 = math.exp %300 : vector<16x16xf32>
    %cst_174 = arith.constant dense<0.000000e+00> : vector<16xf32>
    %302 = vector.multi_reduction <add>, %301, %cst_174 [1] : vector<16x16xf32> to vector<16xf32>
    %303 = vector.shape_cast %302 : vector<16xf32> to vector<16x1xf32>
    %304 = tpu.reciprocal %303 {approx = true} : vector<16x1xf32> -> vector<16x1xf32>
    %305 = vector.broadcast %304 : vector<16x1xf32> to vector<16x16xf32>
    %306 = arith.mulf %301, %305 : vector<16x16xf32>
    %cst_175 = arith.constant dense<0.000000e+00> : vector<16x4xf32>
    %307 = tpu.matmul %306, %294, %cst_175 {dimension_numbers = #tpu.dot_dimension_numbers<[1], [0], [0], [1], [0, 0, 1, 1], [], []>} : vector<16x16xf32>, vector<16x4xf32>, vector<16x4xf32> -> vector<16x4xf32>
    %c0_176 = arith.constant 0 : index
    %c4_177 = arith.constant 4 : index
    %308 = vector.load %arg21[%c0_176, %c4_177] : memref<16x32xf32, #tpu.memory_space<vmem>>, vector<16x4xf32>
    tpu.vector_store %arg21[%c0_176, %c4_177], %307 {strides = array<i32>} : memref<16x32xf32, #tpu.memory_space<vmem>>, vector<16x4xf32>,
    %c0_178 = arith.constant 0 : index
    %c8_179 = arith.constant 8 : index
    %309 = vector.load %arg20[%c0_178, %c8_179] : memref<16x96xf32, #tpu.memory_space<vmem>>, vector<16x4xf32>
    %c0_180 = arith.constant 0 : index
    %c40_181 = arith.constant 40 : index
    %310 = vector.load %arg20[%c0_180, %c40_181] : memref<16x96xf32, #tpu.memory_space<vmem>>, vector<16x4xf32>
    %c0_182 = arith.constant 0 : index
    %c72_183 = arith.constant 72 : index
    %311 = vector.load %arg20[%c0_182, %c72_183] : memref<16x96xf32, #tpu.memory_space<vmem>>, vector<16x4xf32>
    %cst_184 = arith.constant dense<0.000000e+00> : vector<16x16xf32>
    %312 = tpu.matmul %309, %310, %cst_184 {dimension_numbers = #tpu.dot_dimension_numbers<[1], [1], [0], [0], [0, 0, 1, 0], [], []>} : vector<16x4xf32>, vector<16x4xf32>, vector<16x16xf32> -> vector<16x16xf32>
    %313 = arith.addf %312, %39 : vector<16x16xf32>
    %cst_185 = arith.constant dense<0xFF800000> : vector<16xf32>
    %314 = vector.multi_reduction <maximumf>, %313, %cst_185 [1] : vector<16x16xf32> to vector<16xf32>
    %315 = vector.shape_cast %314 : vector<16xf32> to vector<16x1xf32>
    %316 = vector.broadcast %315 : vector<16x1xf32> to vector<16x16xf32>
    %317 = arith.subf %313, %316 : vector<16x16xf32>
    %318 = math.exp %317 : vector<16x16xf32>
    %cst_186 = arith.constant dense<0.000000e+00> : vector<16xf32>
    %319 = vector.multi_reduction <add>, %318, %cst_186 [1] : vector<16x16xf32> to vector<16xf32>
    %320 = vector.shape_cast %319 : vector<16xf32> to vector<16x1xf32>
    %321 = tpu.reciprocal %320 {approx = true} : vector<16x1xf32> -> vector<16x1xf32>
    %322 = vector.broadcast %321 : vector<16x1xf32> to vector<16x16xf32>
    %323 = arith.mulf %318, %322 : vector<16x16xf32>
    %cst_187 = arith.constant dense<0.000000e+00> : vector<16x4xf32>
    %324 = tpu.matmul %323, %311, %cst_187 {dimension_numbers = #tpu.dot_dimension_numbers<[1], [0], [0], [1], [0, 0, 1, 1], [], []>} : vector<16x16xf32>, vector<16x4xf32>, vector<16x4xf32> -> vector<16x4xf32>
    %c0_188 = arith.constant 0 : index
    %c8_189 = arith.constant 8 : index
    %325 = vector.load %arg21[%c0_188, %c8_189] : memref<16x32xf32, #tpu.memory_space<vmem>>, vector<16x4xf32>
    tpu.vector_store %arg21[%c0_188, %c8_189], %324 {strides = array<i32>} : memref<16x32xf32, #tpu.memory_space<vmem>>, vector<16x4xf32>,
    %c0_190 = arith.constant 0 : index
    %c12_191 = arith.constant 12 : index
    %326 = vector.load %arg20[%c0_190, %c12_191] : memref<16x96xf32, #tpu.memory_space<vmem>>, vector<16x4xf32>
    %c0_192 = arith.constant 0 : index
    %c44_193 = arith.constant 44 : index
    %327 = vector.load %arg20[%c0_192, %c44_193] : memref<16x96xf32, #tpu.memory_space<vmem>>, vector<16x4xf32>
    %c0_194 = arith.constant 0 : index
    %c76_195 = arith.constant 76 : index
    %328 = vector.load %arg20[%c0_194, %c76_195] : memref<16x96xf32, #tpu.memory_space<vmem>>, vector<16x4xf32>
    %cst_196 = arith.constant dense<0.000000e+00> : vector<16x16xf32>
    %329 = tpu.matmul %326, %327, %cst_196 {dimension_numbers = #tpu.dot_dimension_numbers<[1], [1], [0], [0], [0, 0, 1, 0], [], []>} : vector<16x4xf32>, vector<16x4xf32>, vector<16x16xf32> -> vector<16x16xf32>
    %330 = arith.addf %329, %39 : vector<16x16xf32>
    %cst_197 = arith.constant dense<0xFF800000> : vector<16xf32>
    %331 = vector.multi_reduction <maximumf>, %330, %cst_197 [1] : vector<16x16xf32> to vector<16xf32>
    %332 = vector.shape_cast %331 : vector<16xf32> to vector<16x1xf32>
    %333 = vector.broadcast %332 : vector<16x1xf32> to vector<16x16xf32>
    %334 = arith.subf %330, %333 : vector<16x16xf32>
    %335 = math.exp %334 : vector<16x16xf32>
    %cst_198 = arith.constant dense<0.000000e+00> : vector<16xf32>
    %336 = vector.multi_reduction <add>, %335, %cst_198 [1] : vector<16x16xf32> to vector<16xf32>
    %337 = vector.shape_cast %336 : vector<16xf32> to vector<16x1xf32>
    %338 = tpu.reciprocal %337 {approx = true} : vector<16x1xf32> -> vector<16x1xf32>
    %339 = vector.broadcast %338 : vector<16x1xf32> to vector<16x16xf32>
    %340 = arith.mulf %335, %339 : vector<16x16xf32>
    %cst_199 = arith.constant dense<0.000000e+00> : vector<16x4xf32>
    %341 = tpu.matmul %340, %328, %cst_199 {dimension_numbers = #tpu.dot_dimension_numbers<[1], [0], [0], [1], [0, 0, 1, 1], [], []>} : vector<16x16xf32>, vector<16x4xf32>, vector<16x4xf32> -> vector<16x4xf32>
    %c0_200 = arith.constant 0 : index
    %c12_201 = arith.constant 12 : index
    %342 = vector.load %arg21[%c0_200, %c12_201] : memref<16x32xf32, #tpu.memory_space<vmem>>, vector<16x4xf32>
    tpu.vector_store %arg21[%c0_200, %c12_201], %341 {strides = array<i32>} : memref<16x32xf32, #tpu.memory_space<vmem>>, vector<16x4xf32>,
    %c0_202 = arith.constant 0 : index
    %c16_203 = arith.constant 16 : index
    %343 = vector.load %arg20[%c0_202, %c16_203] : memref<16x96xf32, #tpu.memory_space<vmem>>, vector<16x4xf32>
    %c0_204 = arith.constant 0 : index
    %c48_205 = arith.constant 48 : index
    %344 = vector.load %arg20[%c0_204, %c48_205] : memref<16x96xf32, #tpu.memory_space<vmem>>, vector<16x4xf32>
    %c0_206 = arith.constant 0 : index
    %c80_207 = arith.constant 80 : index
    %345 = vector.load %arg20[%c0_206, %c80_207] : memref<16x96xf32, #tpu.memory_space<vmem>>, vector<16x4xf32>
    %cst_208 = arith.constant dense<0.000000e+00> : vector<16x16xf32>
    %346 = tpu.matmul %343, %344, %cst_208 {dimension_numbers = #tpu.dot_dimension_numbers<[1], [1], [0], [0], [0, 0, 1, 0], [], []>} : vector<16x4xf32>, vector<16x4xf32>, vector<16x16xf32> -> vector<16x16xf32>
    %347 = arith.addf %346, %39 : vector<16x16xf32>
    %cst_209 = arith.constant dense<0xFF800000> : vector<16xf32>
    %348 = vector.multi_reduction <maximumf>, %347, %cst_209 [1] : vector<16x16xf32> to vector<16xf32>
    %349 = vector.shape_cast %348 : vector<16xf32> to vector<16x1xf32>
    %350 = vector.broadcast %349 : vector<16x1xf32> to vector<16x16xf32>
    %351 = arith.subf %347, %350 : vector<16x16xf32>
    %352 = math.exp %351 : vector<16x16xf32>
    %cst_210 = arith.constant dense<0.000000e+00> : vector<16xf32>
    %353 = vector.multi_reduction <add>, %352, %cst_210 [1] : vector<16x16xf32> to vector<16xf32>
    %354 = vector.shape_cast %353 : vector<16xf32> to vector<16x1xf32>
    %355 = tpu.reciprocal %354 {approx = true} : vector<16x1xf32> -> vector<16x1xf32>
    %356 = vector.broadcast %355 : vector<16x1xf32> to vector<16x16xf32>
    %357 = arith.mulf %352, %356 : vector<16x16xf32>
    %cst_211 = arith.constant dense<0.000000e+00> : vector<16x4xf32>
    %358 = tpu.matmul %357, %345, %cst_211 {dimension_numbers = #tpu.dot_dimension_numbers<[1], [0], [0], [1], [0, 0, 1, 1], [], []>} : vector<16x16xf32>, vector<16x4xf32>, vector<16x4xf32> -> vector<16x4xf32>
    %c0_212 = arith.constant 0 : index
    %c16_213 = arith.constant 16 : index
    %359 = vector.load %arg21[%c0_212, %c16_213] : memref<16x32xf32, #tpu.memory_space<vmem>>, vector<16x4xf32>
    tpu.vector_store %arg21[%c0_212, %c16_213], %358 {strides = array<i32>} : memref<16x32xf32, #tpu.memory_space<vmem>>, vector<16x4xf32>,
    %c0_214 = arith.constant 0 : index
    %c20_215 = arith.constant 20 : index
    %360 = vector.load %arg20[%c0_214, %c20_215] : memref<16x96xf32, #tpu.memory_space<vmem>>, vector<16x4xf32>
    %c0_216 = arith.constant 0 : index
    %c52_217 = arith.constant 52 : index
    %361 = vector.load %arg20[%c0_216, %c52_217] : memref<16x96xf32, #tpu.memory_space<vmem>>, vector<16x4xf32>
    %c0_218 = arith.constant 0 : index
    %c84_219 = arith.constant 84 : index
    %362 = vector.load %arg20[%c0_218, %c84_219] : memref<16x96xf32, #tpu.memory_space<vmem>>, vector<16x4xf32>
    %cst_220 = arith.constant dense<0.000000e+00> : vector<16x16xf32>
    %363 = tpu.matmul %360, %361, %cst_220 {dimension_numbers = #tpu.dot_dimension_numbers<[1], [1], [0], [0], [0, 0, 1, 0], [], []>} : vector<16x4xf32>, vector<16x4xf32>, vector<16x16xf32> -> vector<16x16xf32>
    %364 = arith.addf %363, %39 : vector<16x16xf32>
    %cst_221 = arith.constant dense<0xFF800000> : vector<16xf32>
    %365 = vector.multi_reduction <maximumf>, %364, %cst_221 [1] : vector<16x16xf32> to vector<16xf32>
    %366 = vector.shape_cast %365 : vector<16xf32> to vector<16x1xf32>
    %367 = vector.broadcast %366 : vector<16x1xf32> to vector<16x16xf32>
    %368 = arith.subf %364, %367 : vector<16x16xf32>
    %369 = math.exp %368 : vector<16x16xf32>
    %cst_222 = arith.constant dense<0.000000e+00> : vector<16xf32>
    %370 = vector.multi_reduction <add>, %369, %cst_222 [1] : vector<16x16xf32> to vector<16xf32>
    %371 = vector.shape_cast %370 : vector<16xf32> to vector<16x1xf32>
    %372 = tpu.reciprocal %371 {approx = true} : vector<16x1xf32> -> vector<16x1xf32>
    %373 = vector.broadcast %372 : vector<16x1xf32> to vector<16x16xf32>
    %374 = arith.mulf %369, %373 : vector<16x16xf32>
    %cst_223 = arith.constant dense<0.000000e+00> : vector<16x4xf32>
    %375 = tpu.matmul %374, %362, %cst_223 {dimension_numbers = #tpu.dot_dimension_numbers<[1], [0], [0], [1], [0, 0, 1, 1], [], []>} : vector<16x16xf32>, vector<16x4xf32>, vector<16x4xf32> -> vector<16x4xf32>
    %c0_224 = arith.constant 0 : index
    %c20_225 = arith.constant 20 : index
    %376 = vector.load %arg21[%c0_224, %c20_225] : memref<16x32xf32, #tpu.memory_space<vmem>>, vector<16x4xf32>
    tpu.vector_store %arg21[%c0_224, %c20_225], %375 {strides = array<i32>} : memref<16x32xf32, #tpu.memory_space<vmem>>, vector<16x4xf32>,
    %c0_226 = arith.constant 0 : index
    %c24_227 = arith.constant 24 : index
    %377 = vector.load %arg20[%c0_226, %c24_227] : memref<16x96xf32, #tpu.memory_space<vmem>>, vector<16x4xf32>
    %c0_228 = arith.constant 0 : index
    %c56_229 = arith.constant 56 : index
    %378 = vector.load %arg20[%c0_228, %c56_229] : memref<16x96xf32, #tpu.memory_space<vmem>>, vector<16x4xf32>
    %c0_230 = arith.constant 0 : index
    %c88_231 = arith.constant 88 : index
    %379 = vector.load %arg20[%c0_230, %c88_231] : memref<16x96xf32, #tpu.memory_space<vmem>>, vector<16x4xf32>
    %cst_232 = arith.constant dense<0.000000e+00> : vector<16x16xf32>
    %380 = tpu.matmul %377, %378, %cst_232 {dimension_numbers = #tpu.dot_dimension_numbers<[1], [1], [0], [0], [0, 0, 1, 0], [], []>} : vector<16x4xf32>, vector<16x4xf32>, vector<16x16xf32> -> vector<16x16xf32>
    %381 = arith.addf %380, %39 : vector<16x16xf32>
    %cst_233 = arith.constant dense<0xFF800000> : vector<16xf32>
    %382 = vector.multi_reduction <maximumf>, %381, %cst_233 [1] : vector<16x16xf32> to vector<16xf32>
    %383 = vector.shape_cast %382 : vector<16xf32> to vector<16x1xf32>
    %384 = vector.broadcast %383 : vector<16x1xf32> to vector<16x16xf32>
    %385 = arith.subf %381, %384 : vector<16x16xf32>
    %386 = math.exp %385 : vector<16x16xf32>
    %cst_234 = arith.constant dense<0.000000e+00> : vector<16xf32>
    %387 = vector.multi_reduction <add>, %386, %cst_234 [1] : vector<16x16xf32> to vector<16xf32>
    %388 = vector.shape_cast %387 : vector<16xf32> to vector<16x1xf32>
    %389 = tpu.reciprocal %388 {approx = true} : vector<16x1xf32> -> vector<16x1xf32>
    %390 = vector.broadcast %389 : vector<16x1xf32> to vector<16x16xf32>
    %391 = arith.mulf %386, %390 : vector<16x16xf32>
    %cst_235 = arith.constant dense<0.000000e+00> : vector<16x4xf32>
    %392 = tpu.matmul %391, %379, %cst_235 {dimension_numbers = #tpu.dot_dimension_numbers<[1], [0], [0], [1], [0, 0, 1, 1], [], []>} : vector<16x16xf32>, vector<16x4xf32>, vector<16x4xf32> -> vector<16x4xf32>
    %c0_236 = arith.constant 0 : index
    %c24_237 = arith.constant 24 : index
    %393 = vector.load %arg21[%c0_236, %c24_237] : memref<16x32xf32, #tpu.memory_space<vmem>>, vector<16x4xf32>
    tpu.vector_store %arg21[%c0_236, %c24_237], %392 {strides = array<i32>} : memref<16x32xf32, #tpu.memory_space<vmem>>, vector<16x4xf32>,
    %c0_238 = arith.constant 0 : index
    %c28_239 = arith.constant 28 : index
    %394 = vector.load %arg20[%c0_238, %c28_239] : memref<16x96xf32, #tpu.memory_space<vmem>>, vector<16x4xf32>
    %c0_240 = arith.constant 0 : index
    %c60_241 = arith.constant 60 : index
    %395 = vector.load %arg20[%c0_240, %c60_241] : memref<16x96xf32, #tpu.memory_space<vmem>>, vector<16x4xf32>
    %c0_242 = arith.constant 0 : index
    %c92_243 = arith.constant 92 : index
    %396 = vector.load %arg20[%c0_242, %c92_243] : memref<16x96xf32, #tpu.memory_space<vmem>>, vector<16x4xf32>
    %cst_244 = arith.constant dense<0.000000e+00> : vector<16x16xf32>
    %397 = tpu.matmul %394, %395, %cst_244 {dimension_numbers = #tpu.dot_dimension_numbers<[1], [1], [0], [0], [0, 0, 1, 0], [], []>} : vector<16x4xf32>, vector<16x4xf32>, vector<16x16xf32> -> vector<16x16xf32>
    %398 = arith.addf %397, %39 : vector<16x16xf32>
    %cst_245 = arith.constant dense<0xFF800000> : vector<16xf32>
    %399 = vector.multi_reduction <maximumf>, %398, %cst_245 [1] : vector<16x16xf32> to vector<16xf32>
    %400 = vector.shape_cast %399 : vector<16xf32> to vector<16x1xf32>
    %401 = vector.broadcast %400 : vector<16x1xf32> to vector<16x16xf32>
    %402 = arith.subf %398, %401 : vector<16x16xf32>
    %403 = math.exp %402 : vector<16x16xf32>
    %cst_246 = arith.constant dense<0.000000e+00> : vector<16xf32>
    %404 = vector.multi_reduction <add>, %403, %cst_246 [1] : vector<16x16xf32> to vector<16xf32>
    %405 = vector.shape_cast %404 : vector<16xf32> to vector<16x1xf32>
    %406 = tpu.reciprocal %405 {approx = true} : vector<16x1xf32> -> vector<16x1xf32>
    %407 = vector.broadcast %406 : vector<16x1xf32> to vector<16x16xf32>
    %408 = arith.mulf %403, %407 : vector<16x16xf32>
    %cst_247 = arith.constant dense<0.000000e+00> : vector<16x4xf32>
    %409 = tpu.matmul %408, %396, %cst_247 {dimension_numbers = #tpu.dot_dimension_numbers<[1], [0], [0], [1], [0, 0, 1, 1], [], []>} : vector<16x16xf32>, vector<16x4xf32>, vector<16x4xf32> -> vector<16x4xf32>
    %c0_248 = arith.constant 0 : index
    %c28_249 = arith.constant 28 : index
    %410 = vector.load %arg21[%c0_248, %c28_249] : memref<16x32xf32, #tpu.memory_space<vmem>>, vector<16x4xf32>
    tpu.vector_store %arg21[%c0_248, %c28_249], %409 {strides = array<i32>} : memref<16x32xf32, #tpu.memory_space<vmem>>, vector<16x4xf32>,
    %c0_250 = arith.constant 0 : index
    %c0_251 = arith.constant 0 : index
    %411 = vector.load %arg21[%c0_250, %c0_251] : memref<16x32xf32, #tpu.memory_space<vmem>>, vector<16x32xf32>
    %412 = arith.truncf %411 : vector<16x32xf32> to vector<16x32xbf16>
    %c1_252 = arith.constant 1 : index
    %c0_253 = arith.constant 0 : index
    %c0_254 = arith.constant 0 : index
    %413 = vector.load %arg9[%c1_252, %c0_253, %c0_254] : memref<2x32x32xbf16, #tpu.memory_space<vmem>>, vector<1x32x32xbf16>
    %414 = vector.shape_cast %413 : vector<1x32x32xbf16> to vector<32x32xbf16>
    %cst_255 = arith.constant dense<0.000000e+00> : vector<16x32xf32>
    %415 = tpu.matmul %412, %414, %cst_255 {dimension_numbers = #tpu.dot_dimension_numbers<[1], [0], [0], [1], [0, 0, 1, 1], [], []>} : vector<16x32xbf16>, vector<32x32xbf16>, vector<16x32xf32> -> vector<16x32xf32>
    %c1_256 = arith.constant 1 : index
    %c0_257 = arith.constant 0 : index
    %c0_258 = arith.constant 0 : index
    %416 = vector.load %arg10[%c1_256, %c0_257, %c0_258] : memref<2x1x32xf32, #tpu.memory_space<vmem>>, vector<1x1x32xf32>
    %417 = vector.shape_cast %416 : vector<1x1x32xf32> to vector<1x32xf32>
    %418 = vector.broadcast %417 : vector<1x32xf32> to vector<16x32xf32>
    %419 = arith.addf %415, %418 : vector<16x32xf32>
    %420 = arith.addf %265, %419 : vector<16x32xf32>
    %c1_259 = arith.constant 1 : index
    %c0_260 = arith.constant 0 : index
    %c0_261 = arith.constant 0 : index
    %421 = vector.load %arg15[%c1_259, %c0_260, %c0_261] : memref<2x1x32xf32, #tpu.memory_space<vmem>>, vector<1x1x32xf32>
    %422 = vector.shape_cast %421 : vector<1x1x32xf32> to vector<1x32xf32>
    %c1_262 = arith.constant 1 : index
    %c0_263 = arith.constant 0 : index
    %c0_264 = arith.constant 0 : index
    %423 = vector.load %arg16[%c1_262, %c0_263, %c0_264] : memref<2x1x32xf32, #tpu.memory_space<vmem>>, vector<1x1x32xf32>
    %424 = vector.shape_cast %423 : vector<1x1x32xf32> to vector<1x32xf32>
    %cst_265 = arith.constant dense<0.000000e+00> : vector<16xf32>
    %425 = vector.multi_reduction <add>, %420, %cst_265 [1] : vector<16x32xf32> to vector<16xf32>
    %426 = vector.shape_cast %425 : vector<16xf32> to vector<16x1xf32>
    %cst_266 = arith.constant 3.200000e+01 : f32
    %427 = vector.broadcast %cst_266 : f32 to vector<16x1xf32>
    %428 = arith.divf %426, %427 : vector<16x1xf32>
    %429 = vector.broadcast %428 : vector<16x1xf32> to vector<16x32xf32>
    %430 = arith.subf %420, %429 : vector<16x32xf32>
    %431 = arith.mulf %430, %430 : vector<16x32xf32>
    %cst_267 = arith.constant dense<0.000000e+00> : vector<16xf32>
    %432 = vector.multi_reduction <add>, %431, %cst_267 [1] : vector<16x32xf32> to vector<16xf32>
    %433 = vector.shape_cast %432 : vector<16xf32> to vector<16x1xf32>
    %cst_268 = arith.constant 3.200000e+01 : f32
    %434 = vector.broadcast %cst_268 : f32 to vector<16x1xf32>
    %435 = arith.divf %433, %434 : vector<16x1xf32>
    %436 = vector.broadcast %428 : vector<16x1xf32> to vector<16x32xf32>
    %437 = arith.subf %420, %436 : vector<16x32xf32>
    %cst_269 = arith.constant 9.99999974E-6 : f32
    %438 = vector.broadcast %cst_269 : f32 to vector<16x1xf32>
    %439 = arith.addf %435, %438 : vector<16x1xf32>
    %440 = math.rsqrt %439 : vector<16x1xf32>
    %441 = vector.broadcast %440 : vector<16x1xf32> to vector<16x32xf32>
    %442 = arith.mulf %437, %441 : vector<16x32xf32>
    %443 = vector.broadcast %422 : vector<1x32xf32> to vector<16x32xf32>
    %444 = arith.mulf %442, %443 : vector<16x32xf32>
    %445 = vector.broadcast %424 : vector<1x32xf32> to vector<16x32xf32>
    %446 = arith.addf %444, %445 : vector<16x32xf32>
    %447 = vector.extract_strided_slice %446 {offsets = [7, 0], sizes = [1, 32], strides = [1, 1]} : vector<16x32xf32> to vector<1x32xf32>
    %448 = vector.extract_strided_slice %446 {offsets = [15, 0], sizes = [1, 32], strides = [1, 1]} : vector<16x32xf32> to vector<1x32xf32>
    %449 = tpu.concatenate %447, %448 in 0 : vector<1x32xf32>, vector<1x32xf32> -> vector<2x32xf32>
    %450 = arith.truncf %449 : vector<2x32xf32> to vector<2x32xbf16>
    %c1_270 = arith.constant 1 : index
    %c0_271 = arith.constant 0 : index
    %c0_272 = arith.constant 0 : index
    %451 = vector.load %arg11[%c1_270, %c0_271, %c0_272] : memref<2x32x2048xbf16, #tpu.memory_space<vmem>>, vector<1x32x2048xbf16>
    %452 = vector.shape_cast %451 : vector<1x32x2048xbf16> to vector<32x2048xbf16>
    %cst_273 = arith.constant dense<0.000000e+00> : vector<2x2048xf32>
    %453 = tpu.matmul %450, %452, %cst_273 {dimension_numbers = #tpu.dot_dimension_numbers<[1], [0], [0], [1], [0, 0, 1, 1], [], []>} : vector<2x32xbf16>, vector<32x2048xbf16>, vector<2x2048xf32> -> vector<2x2048xf32>
    %c1_274 = arith.constant 1 : index
    %c0_275 = arith.constant 0 : index
    %c0_276 = arith.constant 0 : index
    %454 = vector.load %arg12[%c1_274, %c0_275, %c0_276] : memref<2x1x2048xf32, #tpu.memory_space<vmem>>, vector<1x1x2048xf32>
    %455 = vector.shape_cast %454 : vector<1x1x2048xf32> to vector<1x2048xf32>
    %456 = vector.broadcast %455 : vector<1x2048xf32> to vector<2x2048xf32>
    %457 = arith.addf %453, %456 : vector<2x2048xf32>
    %cst_277 = arith.constant 0.000000e+00 : f32
    %458 = vector.broadcast %cst_277 : f32 to vector<2x2048xf32>
    %459 = arith.maximumf %457, %458 : vector<2x2048xf32>
    %460 = arith.truncf %459 : vector<2x2048xf32> to vector<2x2048xbf16>
    %c1_278 = arith.constant 1 : index
    %c0_279 = arith.constant 0 : index
    %c0_280 = arith.constant 0 : index
    %461 = vector.load %arg13[%c1_278, %c0_279, %c0_280] : memref<2x2048x32xbf16, #tpu.memory_space<vmem>>, vector<1x2048x32xbf16>
    %462 = vector.shape_cast %461 : vector<1x2048x32xbf16> to vector<2048x32xbf16>
    %cst_281 = arith.constant dense<0.000000e+00> : vector<2x32xf32>
    %463 = tpu.matmul %460, %462, %cst_281 {dimension_numbers = #tpu.dot_dimension_numbers<[1], [0], [0], [1], [0, 0, 1, 1], [], []>} : vector<2x2048xbf16>, vector<2048x32xbf16>, vector<2x32xf32> -> vector<2x32xf32>
    %c1_282 = arith.constant 1 : index
    %c0_283 = arith.constant 0 : index
    %c0_284 = arith.constant 0 : index
    %464 = vector.load %arg14[%c1_282, %c0_283, %c0_284] : memref<2x1x32xf32, #tpu.memory_space<vmem>>, vector<1x1x32xf32>
    %465 = vector.shape_cast %464 : vector<1x1x32xf32> to vector<1x32xf32>
    %466 = vector.broadcast %465 : vector<1x32xf32> to vector<2x32xf32>
    %467 = arith.addf %463, %466 : vector<2x32xf32>
    %468 = arith.addf %449, %467 : vector<2x32xf32>
    %c1_285 = arith.constant 1 : index
    %c0_286 = arith.constant 0 : index
    %c0_287 = arith.constant 0 : index
    %469 = vector.load %arg17[%c1_285, %c0_286, %c0_287] : memref<2x1x32xf32, #tpu.memory_space<vmem>>, vector<1x1x32xf32>
    %470 = vector.shape_cast %469 : vector<1x1x32xf32> to vector<1x32xf32>
    %c1_288 = arith.constant 1 : index
    %c0_289 = arith.constant 0 : index
    %c0_290 = arith.constant 0 : index
    %471 = vector.load %arg18[%c1_288, %c0_289, %c0_290] : memref<2x1x32xf32, #tpu.memory_space<vmem>>, vector<1x1x32xf32>
    %472 = vector.shape_cast %471 : vector<1x1x32xf32> to vector<1x32xf32>
    %cst_291 = arith.constant dense<0.000000e+00> : vector<2xf32>
    %473 = vector.multi_reduction <add>, %468, %cst_291 [1] : vector<2x32xf32> to vector<2xf32>
    %474 = vector.shape_cast %473 : vector<2xf32> to vector<2x1xf32>
    %cst_292 = arith.constant 3.200000e+01 : f32
    %475 = vector.broadcast %cst_292 : f32 to vector<2x1xf32>
    %476 = arith.divf %474, %475 : vector<2x1xf32>
    %477 = vector.broadcast %476 : vector<2x1xf32> to vector<2x32xf32>
    %478 = arith.subf %468, %477 : vector<2x32xf32>
    %479 = arith.mulf %478, %478 : vector<2x32xf32>
    %cst_293 = arith.constant dense<0.000000e+00> : vector<2xf32>
    %480 = vector.multi_reduction <add>, %479, %cst_293 [1] : vector<2x32xf32> to vector<2xf32>
    %481 = vector.shape_cast %480 : vector<2xf32> to vector<2x1xf32>
    %cst_294 = arith.constant 3.200000e+01 : f32
    %482 = vector.broadcast %cst_294 : f32 to vector<2x1xf32>
    %483 = arith.divf %481, %482 : vector<2x1xf32>
    %484 = vector.broadcast %476 : vector<2x1xf32> to vector<2x32xf32>
    %485 = arith.subf %468, %484 : vector<2x32xf32>
    %cst_295 = arith.constant 9.99999974E-6 : f32
    %486 = vector.broadcast %cst_295 : f32 to vector<2x1xf32>
    %487 = arith.addf %483, %486 : vector<2x1xf32>
    %488 = math.rsqrt %487 : vector<2x1xf32>
    %489 = vector.broadcast %488 : vector<2x1xf32> to vector<2x32xf32>
    %490 = arith.mulf %485, %489 : vector<2x32xf32>
    %491 = vector.broadcast %470 : vector<1x32xf32> to vector<2x32xf32>
    %492 = arith.mulf %490, %491 : vector<2x32xf32>
    %493 = vector.broadcast %472 : vector<1x32xf32> to vector<2x32xf32>
    %494 = arith.addf %492, %493 : vector<2x32xf32>
    %c0_296 = arith.constant 0 : index
    %c0_297 = arith.constant 0 : index
    %495 = vector.load %arg19[%c0_296, %c0_297] : memref<2x32xf32, #tpu.memory_space<vmem>>, vector<2x32xf32>
    tpu.vector_store %arg19[%c0_296, %c0_297], %494 {strides = array<i32>} : memref<2x32xf32, #tpu.memory_space<vmem>>, vector<2x32xf32>,
    return
  }
  func.func @transform_0(%arg0: i32) -> (i32, i32) {
    %c0_i32 = arith.constant 0 : i32
    %c0_i32_0 = arith.constant 0 : i32
    %c0_i32_1 = arith.constant 0 : i32
    return %c0_i32, %c0_i32_0 : i32, i32
  }
  func.func @transform_1(%arg0: i32) -> (i32, i32) {
    %c0_i32 = arith.constant 0 : i32
    %c0_i32_0 = arith.constant 0 : i32
    %c0_i32_1 = arith.constant 0 : i32
    return %c0_i32, %c0_i32_0 : i32, i32
  }
  func.func @transform_2(%arg0: i32) -> (i32, i32) {
    %c0_i32 = arith.constant 0 : i32
    %c0_i32_0 = arith.constant 0 : i32
    %c0_i32_1 = arith.constant 0 : i32
    return %c0_i32, %c0_i32_0 : i32, i32
  }
  func.func @transform_3(%arg0: i32) -> (i32, i32) {
    %c0_i32 = arith.constant 0 : i32
    %c0_i32_0 = arith.constant 0 : i32
    %c0_i32_1 = arith.constant 0 : i32
    return %c0_i32, %c0_i32_0 : i32, i32
  }
  func.func @transform_4(%arg0: i32) -> (i32, i32) {
    %c0_i32 = arith.constant 0 : i32
    %c0_i32_0 = arith.constant 0 : i32
    %c0_i32_1 = arith.constant 0 : i32
    return %c0_i32, %c0_i32_0 : i32, i32
  }
  func.func @transform_5(%arg0: i32) -> (i32, i32) {
    %c0_i32 = arith.constant 0 : i32
    %c0_i32_0 = arith.constant 0 : i32
    %c0_i32_1 = arith.constant 0 : i32
    return %c0_i32, %c0_i32_0 : i32, i32
  }
  func.func @transform_6(%arg0: i32) -> (i32, i32, i32) {
    %c0_i32 = arith.constant 0 : i32
    %c0_i32_0 = arith.constant 0 : i32
    %c0_i32_1 = arith.constant 0 : i32
    %c0_i32_2 = arith.constant 0 : i32
    return %c0_i32, %c0_i32_0, %c0_i32_1 : i32, i32, i32
  }
  func.func @transform_7(%arg0: i32) -> (i32, i32, i32) {
    %c0_i32 = arith.constant 0 : i32
    %c0_i32_0 = arith.constant 0 : i32
    %c0_i32_1 = arith.constant 0 : i32
    %c0_i32_2 = arith.constant 0 : i32
    return %c0_i32, %c0_i32_0, %c0_i32_1 : i32, i32, i32
  }
  func.func @transform_8(%arg0: i32) -> (i32, i32, i32) {
    %c0_i32 = arith.constant 0 : i32
    %c0_i32_0 = arith.constant 0 : i32
    %c0_i32_1 = arith.constant 0 : i32
    %c0_i32_2 = arith.constant 0 : i32
    return %c0_i32, %c0_i32_0, %c0_i32_1 : i32, i32, i32
  }
  func.func @transform_9(%arg0: i32) -> (i32, i32, i32) {
    %c0_i32 = arith.constant 0 : i32
    %c0_i32_0 = arith.constant 0 : i32
    %c0_i32_1 = arith.constant 0 : i32
    %c0_i32_2 = arith.constant 0 : i32
    return %c0_i32, %c0_i32_0, %c0_i32_1 : i32, i32, i32
  }
  func.func @transform_10(%arg0: i32) -> (i32, i32, i32) {
    %c0_i32 = arith.constant 0 : i32
    %c0_i32_0 = arith.constant 0 : i32
    %c0_i32_1 = arith.constant 0 : i32
    %c0_i32_2 = arith.constant 0 : i32
    return %c0_i32, %c0_i32_0, %c0_i32_1 : i32, i32, i32
  }
  func.func @transform_11(%arg0: i32) -> (i32, i32, i32) {
    %c0_i32 = arith.constant 0 : i32
    %c0_i32_0 = arith.constant 0 : i32
    %c0_i32_1 = arith.constant 0 : i32
    %c0_i32_2 = arith.constant 0 : i32
    return %c0_i32, %c0_i32_0, %c0_i32_1 : i32, i32, i32
  }
  func.func @transform_12(%arg0: i32) -> (i32, i32, i32) {
    %c0_i32 = arith.constant 0 : i32
    %c0_i32_0 = arith.constant 0 : i32
    %c0_i32_1 = arith.constant 0 : i32
    %c0_i32_2 = arith.constant 0 : i32
    return %c0_i32, %c0_i32_0, %c0_i32_1 : i32, i32, i32
  }
  func.func @transform_13(%arg0: i32) -> (i32, i32, i32) {
    %c0_i32 = arith.constant 0 : i32
    %c0_i32_0 = arith.constant 0 : i32
    %c0_i32_1 = arith.constant 0 : i32
    %c0_i32_2 = arith.constant 0 : i32
    return %c0_i32, %c0_i32_0, %c0_i32_1 : i32, i32, i32
  }
  func.func @transform_14(%arg0: i32) -> (i32, i32, i32) {
    %c0_i32 = arith.constant 0 : i32
    %c0_i32_0 = arith.constant 0 : i32
    %c0_i32_1 = arith.constant 0 : i32
    %c0_i32_2 = arith.constant 0 : i32
    return %c0_i32, %c0_i32_0, %c0_i32_1 : i32, i32, i32
  }
  func.func @transform_15(%arg0: i32) -> (i32, i32, i32) {
    %c0_i32 = arith.constant 0 : i32
    %c0_i32_0 = arith.constant 0 : i32
    %c0_i32_1 = arith.constant 0 : i32
    %c0_i32_2 = arith.constant 0 : i32
    return %c0_i32, %c0_i32_0, %c0_i32_1 : i32, i32, i32
  }
  func.func @transform_16(%arg0: i32) -> (i32, i32, i32) {
    %c0_i32 = arith.constant 0 : i32
    %c0_i32_0 = arith.constant 0 : i32
    %c0_i32_1 = arith.constant 0 : i32
    %c0_i32_2 = arith.constant 0 : i32
    return %c0_i32, %c0_i32_0, %c0_i32_1 : i32, i32, i32
  }
  func.func @transform_17(%arg0: i32) -> (i32, i32, i32) {
    %c0_i32 = arith.constant 0 : i32
    %c0_i32_0 = arith.constant 0 : i32
    %c0_i32_1 = arith.constant 0 : i32
    %c0_i32_2 = arith.constant 0 : i32
    return %c0_i32, %c0_i32_0, %c0_i32_1 : i32, i32, i32
  }
  func.func @transform_18(%arg0: i32) -> (i32, i32) {
    %c0_i32 = arith.constant 0 : i32
    %c0_i32_0 = arith.constant 0 : i32
    %c0_i32_1 = arith.constant 0 : i32
    return %c0_i32, %c0_i32_0 : i32, i32
  }
}

</mosaic_0001>

<bundles_post_ra>
// kernel: transformer_encoder_forward.1
= control target key start
LH: loop header
LB: loop body
LE: loop exit
PB: predicated region body
PF: predicated region fallthrough
CT: control target
= control target key end

     0   :  { %s12424_s0 = inlined_call_operand.vmem [shape: f32[16,16], index: 0, kind: input, shape index: {}]   ;;  %s12425_s1 = inlined_call_operand.vmem [shape: f32[16,32], index: 1, kind: input, shape index: {}]   ;;  %s12426_s2 = inlined_call_operand.vmem [shape: f32[1,32], index: 2, kind: input, shape index: {}]   ;;  %s12427_s3 = inlined_call_operand.vmem [shape: f32[16,32], index: 3, kind: input, shape index: {}]   ;;  %s12428_s4 = inlined_call_operand.vmem [shape: f32[1,32], index: 4, kind: input, shape index: {}]   ;;  %s12429_s5 = inlined_call_operand.vmem [shape: f32[1,32], index: 5, kind: input, shape index: {}]   ;;  %s12430_s6 = inlined_call_operand.vmem [shape: bf16[2,32,96], index: 6, kind: input, shape index: {}]   ;;  %s12431_s7 = inlined_call_operand.vmem [shape: f32[2,1,96], index: 7, kind: input, shape index: {}]   ;;  %s12432_s8 = inlined_call_operand.vmem [shape: bf16[2,32,32], index: 8, kind: input, shape index: {}]   ;;  %s12433_s9 = inlined_call_operand.vmem [shape: f32[2,1,32], index: 9, kind: input, shape index: {}]   ;;  %s12434_s10 = inlined_call_operand.vmem [shape: bf16[2,32,2048], index: 10, kind: input, shape index: {}]   ;;  %s12435_s11 = inlined_call_operand.vmem [shape: f32[2,1,2048], index: 11, kind: input, shape index: {}]   ;;  %s12436_s12 = inlined_call_operand.vmem [shape: bf16[2,2048,32], index: 12, kind: input, shape index: {}]   ;;  %s12437_s13 = inlined_call_operand.vmem [shape: f32[2,1,32], index: 13, kind: input, shape index: {}]   ;;  %s12438_s14 = inlined_call_operand.vmem [shape: f32[2,1,32], index: 14, kind: input, shape index: {}]   ;;  %s12439_s15 = inlined_call_operand.vmem [shape: f32[2,1,32], index: 15, kind: input, shape index: {}]   ;;  %s12440_s16 = inlined_call_operand.vmem [shape: f32[2,1,32], index: 16, kind: input, shape index: {}]   ;;  %s12441_s17 = inlined_call_operand.vmem [shape: f32[2,1,32], index: 17, kind: input, shape index: {}]   ;;  %s12442_s18 = inlined_call_operand.hbm [shape: f32[2,32], index: 18, kind: output, shape index: {}]  }
   0x1   :  { %12479 = sst [smem:[#allocation7_spill]] %s12424_s0 }
   0x2   :  { %12480 = sst [smem:[#allocation8_spill]] %s12425_s1 }
   0x3   :  { %12481 = sst [smem:[#allocation9_spill]] %s12426_s2 }
   0x4   :  { %s12482_s29 = sld [smem:[#allocation8_spill]]  ;;  %s12483_s20 = sld [smem:[#allocation7_spill]]  ;;  %vm72_vm0 = vcmask 130048  }
   0xa   :  { %v63_v0 = vld [vmem:[%s12482_s29] sm:$0xff]  ;;  %v64_v1 = vld [vmem:[%s12482_s29 + $0x8] sm:$0xff] }
   0xb   :  { %v61_v2 = vld [vmem:[%s12483_s20] sm:$0xff]  ;;  %v9657_v3 = vpack.c.bf16 %v64_v1, %v63_v0  ;;  %v62_v4 = vld [vmem:[%s12483_s20 + $0x8] sm:$0xff] }
   0xc   :  { %9398 = vmatprep.mubr.msk.f32.mxu1 %vm72_vm0, %v61_v2 }
   0xd   :  { %9658 = vmatprep.subr.bf16.mxu1 %v9657_v3 }
   0xe   :  { %9660 = vmatpush3.bf16.msra.mxu1 %v9657_v3 }
  0x11   :  { %9399 = vmatmul.mubr.msk.f32.vlgmr.msra.gmra.mrb[0].mxu1 %vm72_vm0, %v62_v4 }
  0x12   :  { %23 = vsyncpa [#allocation5], 0  ;;  %s12484_s24 = sld [smem:[#allocation9_spill]]  ;;  %v154_v8 = vld [vmem:[%s12427_s3] sm:$0xff]  ;;  %vm160_vm1 = vcmask 261120   ;;  %v155_v11 = vld [vmem:[%s12427_s3 + $0x8] sm:$0xff] }
  0x13   :  { %v10016_v26 = vld [vmem:[%s12430_s6] sm:$0xff]   ;;  %v10450_v27 = vmov 0.0   ;;  %v10017_v28 = vld [vmem:[%s12430_s6 + $0x8] sm:$0xff]   ;;  %vm10451_vm2 = vmmov 0   ;;  %vm283_vm3 = vcmask 785408   ;;  %vm294_vm4 = vcmask 31744  }
  0x14   :  { %9401 = vmatprep.subr.bf16.mxu1 %v10450_v27  ;;  %9405 = vmatprep.mubr.msk.bf16.mxu1 %vm10451_vm2, %v10450_v27  ;;  %v8133_v37 = vld [vmem:[%s12428_s4] ss:$0 sm:$0xff]  ;;  %s10452_s4 = smov 92   ;;  %s10454_s23 = smov 124   ;;  %vm10661_vm5 = vmpackc.low %vm294_vm4, %vm294_vm4  ;;  %vm701_vm8 = vcmask 64544   ;;  %vm916_vm9 = vcmask 97344  }
  0x15   :  { %9402 = vmatpush3.bf16.msra.mxu1 %v10016_v26  ;;  %v8134_v41 = vld [vmem:[%s12429_s5] ss:$0 sm:$0xff]  ;;  %s10453_s5 = smov 96   ;;  %s10456_s25 = smov 120   ;;  %vm1131_vm10 = vcmask 130144   ;;  %vm1346_vm11 = vcmask 162944  }
  0x16   :  { %9403 = vmatprep.subr.bf16.mxu1 %v10450_v27  ;;  %v8135_v46 = vld [vmem:[%s12431_s7] ss:$0 sm:$0xff]  ;;  %s10458_s26 = smov 64   ;;  %s10459_s27 = smov 56   ;;  %vm1561_vm12 = vcmask 195744   ;;  %vm1776_vm13 = vcmask 228544  }
  0x17   :  { %s12476_s28 = smov 84   ;;  %s10461_s3 = smov 60   ;;  %vm1991_vm14 = vcmask 261344   ;;  %vm6085_vm15 = vcmask 1040384  }
  0x18   :  { %v8130_v5 = vld [vmem:[%s12484_s24] ss:$0 sm:$0xff]  ;;  %s10455_s24 = smov 88   ;;  %s12477_s29 = smov 116  }
  0x19   :  { %9404 = vmatpush3.bf16.msra.mxu1 %v10017_v28  ;;  %s12475_s30 = smov 52   ;;  %s12473_s0 = smov 112  }
  0x1a   :  { %s12458_s19 = smov 80   ;;  %s12456_s1 = smov 48  }
  0x1b   :  { %s12454_s20 = smov 108   ;;  %s12453_s21 = smov 76  }
  0x1c   :  { %s12448_s22 = smov 44   ;;  %s12445_s2 = smov 104  }
  0xe4   :  { %v9400_v6 = vpop.f32.mrb[0].mxu1 }
  0xe5   :  { %v145_v7 = vpop.f32.mrb[1].mxu1  ;;  %v151_v9 = vadd.f32 %v9400_v6, %v8130_v5 }
  0xe6   :  { %v146_v10 = vadd.f32 %v8130_v5, %v145_v7 }
  0xe7   :  { %v157_v14 = vadd.f32 %v155_v11, %v151_v9  ;;  %v204_v9 = vlaneseq }
  0xe8   :  { %v156_v12 = vadd.f32 %v154_v8, %v146_v10 }
  0xe9   :  { %v164_v15 = vsel %vm160_vm1, %v157_v14, 0.0  ;;  %v10683_v10 = vshrl.u32 %v204_v9, 7 }
  0xea   :  { %v161_v13 = vsel %vm160_vm1, %v156_v12, 0.0 }
  0xeb   :  { %162 = vadd.xlane.f32.xlu0 %v161_v13  ;;  %v206_v11 = vadd.s32 8, %v10683_v10 }
  0xef   :  { %165 = vadd.xlane.f32.xlu0 %v164_v15  ;;  %v10457_v15 = vmov -1e+30  }
 0x178   :  { %v163_v16 = vpop.xlane.xlu0 %162 }
 0x179   :  { %v168_v17 = vmul.f32 0.03125, %v163_v16 }
 0x17b   :  { %v170_v18 = vsub.f32 %v156_v12, %v168_v17  ;;  %v208_v12 = vand.u32 127, %v204_v9 }
 0x17c   :  { %v166_v19 = vpop.xlane.xlu0 %165 }
 0x17d   :  { %v169_v20 = vmul.f32 0.03125, %v166_v19  ;;  %v172_v21 = vmul.f32 %v170_v18, %v170_v18  ;;  %v210_v13 = vxor.u32 %v208_v12, %v206_v11 }
 0x17f   :  { %v171_v22 = vsub.f32 %v157_v14, %v169_v20  ;;  %v174_v23 = vsel %vm160_vm1, %v172_v21, 0.0  ;;  %v209_v14 = vxor.u32 %v208_v12, %v10683_v10  ;;  %vm212_vm6 = vcmp.lt.s32.totalorder %v210_v13, 8 }
 0x180   :  { %175 = vadd.xlane.f32.xlu1 %v174_v23  ;;  %v10687_v16 = vsel %vm212_vm6, 0.0, %v10457_v15 }
 0x181   :  { %v173_v24 = vmul.f32 %v171_v22, %v171_v22  ;;  %vm211_vm7 = vcmp.lt.s32.totalorder %v209_v14, 8 }
 0x182   :  { %v10689_v17 = vsel %vm211_vm7, 0.0, %v10457_v15 }
 0x183   :  { %v177_v25 = vsel %vm160_vm1, %v173_v24, 0.0 }
 0x184   :  { %178 = vadd.xlane.f32.xlu1 %v177_v25 }
 0x20d   :  { %v176_v29 = vpop.xlane.xlu1 %175 }
 0x20e   :  { %v180_v30 = vmul.f32 0.03125, %v176_v29 }
 0x210   :  { %v182_v31 = vadd.f32 1e-05, %v180_v30 }
 0x211   :  { %v179_v32 = vpop.xlane.xlu1 %178 }
 0x212   :  { %10280 = vrsqrt.f32 %v182_v31  ;;  %v181_v33 = vmul.f32 0.03125, %v179_v32 }
 0x214   :  { %v183_v34 = vadd.f32 1e-05, %v181_v33 }
 0x216   :  { %10282 = vrsqrt.f32 %v183_v34 }
 0x21c   :  { %v10281_v35 = vpop.eup %10280 }
 0x21d   :  { %v186_v36 = vmul.f32 %v10281_v35, %v170_v18 }
 0x21f   :  { %v194_v39 = vmul.f32 %v8133_v37, %v186_v36 }
 0x220   :  { %v10283_v38 = vpop.eup %10282 }
 0x221   :  { %v187_v40 = vmul.f32 %v10283_v38, %v171_v22  ;;  %v10623_v43 = vadd.f32 %v8134_v41, %v194_v39 }
 0x223   :  { %v195_v42 = vmul.f32 %v8133_v37, %v187_v40 }
 0x225   :  { %v10625_v44 = vadd.f32 %v8134_v41, %v195_v42 }
 0x227   :  { %v215_v45 = vpack.c.bf16 %v10625_v44, %v10623_v43 }
 0x229   :  { %9406 = vmatmul.mubr.msk.bf16.vlgmr.msra.gmra.mrb[4].mxu1 %vm160_vm1, %v215_v45 }
 0x2fc   :  { %v276_v47 = vpop.f32.mrb[4].mxu1 }
 0x2fd   :  { %v277_v48 = vadd.f32 %v8135_v46, %v276_v47  ;;  %v9407_v49 = vpop.f32.mrb[5].mxu1 }
 0x2fe   :  { %v279_v50 = vpop.f32.mrb[6].mxu1 }
 0x2ff   :  { %284 = vst.msk [vmem:[#allocation2] sm:$0xff] %vm283_vm3, %v277_v48  ;;  %v280_v51 = vadd.f32 %v8135_v46, %v279_v50  ;;  %v9408_v52 = vpop.f32.mrb[7].mxu1 }
 0x301   :  { %285 = vst.msk [vmem:[#allocation2 + $0x8] sm:$0xff] %vm283_vm3, %v280_v51 }
 0x306   :  { %v10635_v53 = vld [vmem:[#allocation2] sm:$0xff] }
 0x307   :  { %9413 = vmatprep.mubr.msk.f32.mxu0 %vm294_vm4, %v10635_v53 }
 0x308   :  { %v10639_v54 = vld [vmem:[#allocation2 + $0x8] sm:$0xff] }
 0x309   :  { %v10643_v55 = vpack.i.bf16 %v10639_v54, %v10635_v53 }
 0x30b   :  { %9862 = vrot.lane.b32.xlu1 %v10643_v55, %s10452_s4  ;;  %9857 = vrot.lane.b32.xlu0 %v10643_v55, %s10453_s5 }
 0x30f   :  { %493 = vrot.lane.b32.xlu1 %v10635_v53, %s10454_s23  ;;  %495 = vrot.lane.b32.xlu0 %v10639_v54, %s10454_s23 }
 0x313   :  { %9867 = vrot.lane.b32.xlu1 %v10643_v55, %s10455_s24  ;;  %710 = vrot.lane.b32.xlu0 %v10639_v54, %s10456_s25 }
 0x317   :  { %708 = vrot.lane.b32.xlu1 %v10635_v53, %s10456_s25 }
 0x37d   :  { %v9863_v56 = vpop.permute.xlu1 %9862  ;;  %v9858_v57 = vpop.permute.xlu0 %9857 }
 0x37e   :  { %v9865_v58 = vunpack.i.h.bf16 %v9863_v56  ;;  %v9864_v59 = vunpack.i.l.bf16 %v9863_v56  ;;  %v9860_v60 = vunpack.i.h.bf16 %v9858_v57  ;;  %v9859_v61 = vunpack.i.l.bf16 %v9858_v57 }
 0x380   :  { %v9671_v63 = vpack.c.bf16 %v9865_v58, %v9864_v59  ;;  %v9661_v0 = vpack.c.bf16 %v9860_v60, %v9859_v61 }
 0x381   :  { %v494_v1 = vpop.permute.xlu1 %493  ;;  %v496_v7 = vpop.permute.xlu0 %495 }
 0x382   :  { %9663 = vmatprep.subr.msk.bf16.mxu0 %vm10661_vm5, %v9661_v0  ;;  %9673 = vmatprep.subr.msk.bf16.mxu1 %vm10661_vm5, %v9671_v63 }
 0x383   :  { %9427 = vmatprep.mubr.msk.f32.mxu1 %vm294_vm4, %v494_v1  ;;  %9666 = vmatpush3.bf16.xpose.msk.msra.mxu0 %vm10661_vm5, %v9661_v0 }
 0x384   :  { %9676 = vmatpush3.bf16.xpose.msk.msra.mxu1 %vm10661_vm5, %v9671_v63 }
 0x385   :  { %v9868_v2 = vpop.permute.xlu1 %9867  ;;  %v711_v8 = vpop.permute.xlu0 %710 }
 0x386   :  { %v9870_v3 = vunpack.i.h.bf16 %v9868_v2  ;;  %v9869_v4 = vunpack.i.l.bf16 %v9868_v2 }
 0x388   :  { %v9681_v5 = vpack.c.bf16 %v9870_v3, %v9869_v4 }
 0x389   :  { %v709_v6 = vpop.permute.xlu1 %708 }
 0x38a   :  { %9414 = vmatmul.mubr.msk.f32.vlgmr.msra.gmra.mrb[0].mxu0 %vm294_vm4, %v10639_v54  ;;  %9683 = vmatprep.subr.msk.bf16.mxu1 %vm10661_vm5, %v9681_v5 }
 0x38b   :  { %9428 = vmatmul.mubr.msk.f32.vlgmr.msra.gmra.mrb[2].mxu1 %vm294_vm4, %v496_v7 }
 0x38c   :  { %9686 = vmatpush3.bf16.xpose.msk.msra.mxu1 %vm10661_vm5, %v9681_v5  ;;  %9441 = vmatprep.mubr.msk.f32.mxu1 %vm294_vm4, %v709_v6 }
 0x393   :  { %9442 = vmatmul.mubr.msk.f32.vlgmr.msra.gmra.mrb[8].mxu1 %vm294_vm4, %v711_v8 }
 0x45d   :  { %v9415_v18 = vpop.f32.mrb[0].mxu0 }
 0x45e   :  { %v375_v19 = vadd.f32 %v9415_v18, %v10687_v16  ;;  %v9429_v20 = vpop.f32.mrb[2].mxu1  ;;  %v369_v21 = vpop.f32.mrb[1].mxu0 }
 0x45f   :  { %v370_v22 = vadd.f32 %v369_v21, %v10689_v17  ;;  %v575_v23 = vpop.f32.mrb[3].mxu1  ;;  %v581_v28 = vadd.f32 %v9429_v20, %v10687_v16 }
 0x460   :  { %v576_v24 = vadd.f32 %v575_v23, %v10689_v17  ;;  %v381_v25 = vsel %vm72_vm0, %v375_v19, -inf }
 0x461   :  { %382 = vmax.xlane.f32.xlu0 %v381_v25  ;;  %v378_v26 = vsel %vm72_vm0, %v370_v22, -inf  ;;  %v587_v34 = vsel %vm72_vm0, %v581_v28, -inf }
 0x462   :  { %379 = vmax.xlane.f32.xlu1 %v378_v26  ;;  %v584_v29 = vsel %vm72_vm0, %v576_v24, -inf }
 0x465   :  { %585 = vmax.xlane.f32.xlu0 %v584_v29 }
 0x466   :  { %v9443_v30 = vpop.f32.mrb[8].mxu1 }
 0x467   :  { %v790_v31 = vpop.f32.mrb[9].mxu1  ;;  %v796_v32 = vadd.f32 %v9443_v30, %v10687_v16 }
 0x468   :  { %v791_v33 = vadd.f32 %v790_v31, %v10689_v17 }
 0x469   :  { %588 = vmax.xlane.f32.xlu0 %v587_v34  ;;  %v802_v36 = vsel %vm72_vm0, %v796_v32, -inf }
 0x46a   :  { %v799_v35 = vsel %vm72_vm0, %v791_v33, -inf }
 0x46b   :  { %800 = vmax.xlane.f32.xlu1 %v799_v35 }
 0x46d   :  { %803 = vmax.xlane.f32.xlu0 %v802_v36 }
 0x47c   :  { %9872 = vrot.lane.b32.xlu1 %v10643_v55, %s10458_s26 }
 0x4ee   :  { %v383_v37 = vpop.xlane.xlu0 %382 }
 0x4ef   :  { %v385_v38 = vsub.f32 %v375_v19, %v383_v37  ;;  %v380_v39 = vpop.xlane.xlu1 %379 }
 0x4f0   :  { %v384_v40 = vsub.f32 %v370_v22, %v380_v39 }
 0x4f1   :  { %v388_v41 = vmul.f32 1.442695, %v385_v38 }
 0x4f2   :  { %v386_v42 = vmul.f32 1.442695, %v384_v40  ;;  %v586_v45 = vpop.xlane.xlu0 %585 }
 0x4f3   :  { %10284 = vpow2.f32 %v388_v41  ;;  %v590_v46 = vsub.f32 %v576_v24, %v586_v45 }
 0x4f4   :  { %10286 = vpow2.f32 %v386_v42 }
 0x4f5   :  { %v592_v47 = vmul.f32 1.442695, %v590_v46 }
 0x4f6   :  { %v589_v48 = vpop.xlane.xlu0 %588 }
 0x4f7   :  { %10288 = vpow2.f32 %v592_v47  ;;  %v591_v49 = vsub.f32 %v581_v28, %v589_v48 }
 0x4f8   :  { %v801_v50 = vpop.xlane.xlu1 %800 }
 0x4f9   :  { %v594_v51 = vmul.f32 1.442695, %v591_v49  ;;  %v805_v9 = vsub.f32 %v791_v33, %v801_v50 }
 0x4fa   :  { %v804_v52 = vpop.xlane.xlu0 %803 }
 0x4fb   :  { %10290 = vpow2.f32 %v594_v51  ;;  %v806_v56 = vsub.f32 %v796_v32, %v804_v52  ;;  %v807_v11 = vmul.f32 1.442695, %v805_v9 }
 0x4fc   :  { %v9873_v57 = vpop.permute.xlu1 %9872 }
 0x4fd   :  { %v10285_v58 = vpop.eup %10284  ;;  %v809_v59 = vmul.f32 1.442695, %v806_v56  ;;  %v9875_v60 = vunpack.i.h.bf16 %v9873_v57  ;;  %v9874_v61 = vunpack.i.l.bf16 %v9873_v57 }
 0x4fe   :  { %v10287_v63 = vpop.eup %10286  ;;  %v393_v0 = vsel %vm72_vm0, %v10285_v58, 0.0 }
 0x4ff   :  { %10292 = vpow2.f32 %v809_v59  ;;  %394 = vadd.xlane.f32.xlu0 %v393_v0  ;;  %v390_v1 = vsel %vm72_vm0, %v10287_v63, 0.0  ;;  %v9667_v2 = vpack.c.bf16 %v9875_v60, %v9874_v61 }
 0x500   :  { %391 = vadd.xlane.f32.xlu1 %v390_v1  ;;  %10294 = vpow2.f32 %v807_v11 }
 0x501   :  { %v10289_v3 = vpop.eup %10288  ;;  %9668 = vmatprep.subr.bf16.mxu0 %v9667_v2 }
 0x502   :  { %9670 = vmatpush3.bf16.msra.mxu0 %v9667_v2  ;;  %v596_v4 = vsel %vm72_vm0, %v10289_v3, 0.0 }
 0x504   :  { %597 = vadd.xlane.f32.xlu1 %v596_v4 }
 0x505   :  { %v10291_v5 = vpop.eup %10290 }
 0x506   :  { %v599_v6 = vsel %vm72_vm0, %v10291_v5, 0.0 }
 0x507   :  { %600 = vadd.xlane.f32.xlu0 %v599_v6 }
 0x509   :  { %v10293_v7 = vpop.eup %10292 }
 0x50a   :  { %v814_v8 = vsel %vm72_vm0, %v10293_v7, 0.0  ;;  %v10295_v12 = vpop.eup %10294 }
 0x50b   :  { %815 = vadd.xlane.f32.xlu0 %v814_v8  ;;  %v811_v13 = vsel %vm72_vm0, %v10295_v12, 0.0 }
 0x515   :  { %9882 = vrot.lane.b32.xlu1 %v10643_v55, %s10459_s27 }
 0x519   :  { %9887 = vrot.lane.b32.xlu1 %v10643_v55, %s12476_s28  ;;  %s12506_s28 = smov 20  }
 0x521   :  { %9877 = vrot.lane.b32.xlu0 %v10643_v55, %s10461_s3 }
 0x525   :  { %925 = vrot.lane.b32.xlu0 %v10639_v54, %s12477_s29 }
 0x53d   :  { %812 = vadd.xlane.f32.xlu1 %v811_v13 }
 0x54e   :  { %923 = vrot.lane.b32.xlu1 %v10635_v53, %s12477_s29  ;;  %s12496_s29 = smov 104  }
 0x58c   :  { %v395_v14 = vpop.xlane.xlu0 %394 }
 0x58d   :  { %10296 = vrcp.f32 %v395_v14  ;;  %v392_v15 = vpop.xlane.xlu1 %391 }
 0x58e   :  { %10298 = vrcp.f32 %v392_v15 }
 0x591   :  { %v598_v18 = vpop.xlane.xlu1 %597 }
 0x592   :  { %10300 = vrcp.f32 %v598_v18 }
 0x594   :  { %v601_v19 = vpop.xlane.xlu0 %600 }
 0x595   :  { %10302 = vrcp.f32 %v601_v19  ;;  %v9883_v22 = vpop.permute.xlu1 %9882 }
 0x596   :  { %v9885_v28 = vunpack.i.h.bf16 %v9883_v22  ;;  %v9884_v30 = vunpack.i.l.bf16 %v9883_v22 }
 0x597   :  { %v10297_v20 = vpop.eup %10296 }
 0x598   :  { %v10299_v21 = vpop.eup %10298  ;;  %v816_v23 = vpop.xlane.xlu0 %815  ;;  %v399_v25 = vmul.f32 %v10297_v20, %v10285_v58  ;;  %v9687_v39 = vpack.c.bf16 %v9885_v28, %v9884_v30 }
 0x599   :  { %v398_v24 = vmul.f32 %v10299_v21, %v10287_v63  ;;  %v9888_v34 = vpop.permute.xlu1 %9887  ;;  %10304 = vrcp.f32 %v816_v23 }
 0x59a   :  { %v9890_v37 = vunpack.i.h.bf16 %v9888_v34  ;;  %v9889_v38 = vunpack.i.l.bf16 %v9888_v34 }
 0x59b   :  { %9420 = vmatprep.mubr.msk.f32.mxu0 %vm72_vm0, %v398_v24 }
 0x59c   :  { %v10301_v26 = vpop.eup %10300  ;;  %9421 = vmatmul.mubr.msk.f32.vlgmr.msra.gmra.mrb[2].mxu0 %vm72_vm0, %v399_v25  ;;  %v9878_v29 = vpop.permute.xlu0 %9877  ;;  %v9691_v41 = vpack.c.bf16 %v9890_v37, %v9889_v38 }
 0x59d   :  { %v9880_v31 = vunpack.i.h.bf16 %v9878_v29  ;;  %v9879_v32 = vunpack.i.l.bf16 %v9878_v29  ;;  %v604_v33 = vmul.f32 %v10301_v26, %v10289_v3 }
 0x59f   :  { %9434 = vmatprep.mubr.msk.f32.mxu0 %vm72_vm0, %v604_v33  ;;  %v9677_v35 = vpack.c.bf16 %v9880_v31, %v9879_v32  ;;  %v10303_v36 = vpop.eup %10302 }
 0x5a0   :  { %v605_v40 = vmul.f32 %v10303_v36, %v10291_v5  ;;  %v926_v50 = vpop.permute.xlu0 %925 }
 0x5a1   :  { %9678 = vmatprep.subr.bf16.mxu0 %v9677_v35 }
 0x5a2   :  { %9680 = vmatpush3.bf16.msra.mxu0 %v9677_v35 }
 0x5a3   :  { %9688 = vmatprep.subr.bf16.mxu0 %v9687_v39  ;;  %v10305_v45 = vpop.eup %10304 }
 0x5a4   :  { %v820_v48 = vmul.f32 %v10305_v45, %v10293_v7 }
 0x5a5   :  { %9435 = vmatmul.mubr.msk.f32.vlgmr.msra.gmra.mrb[4].mxu0 %vm72_vm0, %v605_v40 }
 0x5a6   :  { %9690 = vmatpush3.bf16.msra.mxu0 %v9687_v39 }
 0x5a7   :  { %9693 = vmatprep.subr.msk.bf16.mxu0 %vm10661_vm5, %v9691_v41 }
 0x5ca   :  { %v813_v42 = vpop.xlane.xlu1 %812 }
 0x5cb   :  { %10306 = vrcp.f32 %v813_v42 }
 0x5ce   :  { %v924_v49 = vpop.permute.xlu1 %923 }
 0x5d5   :  { %v10307_v46 = vpop.eup %10306 }
 0x5d6   :  { %v819_v47 = vmul.f32 %v10307_v46, %v10295_v12 }
 0x5d8   :  { %9448 = vmatprep.mubr.msk.f32.mxu0 %vm72_vm0, %v819_v47 }
 0x5d9   :  { %9449 = vmatmul.mubr.msk.f32.vlgmr.msra.gmra.mrb[6].mxu0 %vm72_vm0, %v820_v48 }
 0x5da   :  { %9696 = vmatpush3.bf16.xpose.msk.msra.mxu0 %vm10661_vm5, %v9691_v41  ;;  %9455 = vmatprep.mubr.msk.f32.mxu0 %vm294_vm4, %v924_v49 }
 0x5e1   :  { %9456 = vmatmul.mubr.msk.f32.vlgmr.msra.gmra.mrb[8].mxu0 %vm294_vm4, %v926_v50 }
 0x66f   :  { %v9422_v51 = vpop.f32.mrb[2].mxu0 }
 0x670   :  { %488 = vst.msk [vmem:[#allocation3 + $0x8] sm:$0xff] %vm294_vm4, %v9422_v51  ;;  %v478_v52 = vpop.f32.mrb[3].mxu0 }
 0x671   :  { %487 = vst.msk [vmem:[#allocation3] sm:$0xff] %vm294_vm4, %v478_v52 }
 0x678   :  { %v10735_v56 = vpop.f32.mrb[4].mxu0 }
 0x679   :  { %v10737_v57 = vpop.f32.mrb[5].mxu0 }
 0x6ac   :  { %v10739_v58 = vpop.f32.mrb[6].mxu0 }
 0x6ad   :  { %v10741_v59 = vpop.f32.mrb[7].mxu0 }
 0x6b4   :  { %v9457_v60 = vpop.f32.mrb[8].mxu0 }
 0x6b5   :  { %v1011_v61 = vadd.f32 %v9457_v60, %v10687_v16  ;;  %v1005_v63 = vpop.f32.mrb[9].mxu0 }
 0x6b6   :  { %v1006_v0 = vadd.f32 %v1005_v63, %v10689_v17 }
 0x6b7   :  { %v1017_v1 = vsel %vm72_vm0, %v1011_v61, -inf }
 0x6b8   :  { %1018 = vmax.xlane.f32.xlu0 %v1017_v1  ;;  %v1014_v2 = vsel %vm72_vm0, %v1006_v0, -inf }
 0x6b9   :  { %1015 = vmax.xlane.f32.xlu1 %v1014_v2 }
 0x6ca   :  { %9892 = vrot.lane.b32.xlu1 %v10643_v55, %s12475_s30  ;;  %s12499_s30 = smov 100  }
 0x6ce   :  { %1138 = vrot.lane.b32.xlu1 %v10635_v53, %s12473_s0 }
 0x6d2   :  { %1140 = vrot.lane.b32.xlu1 %v10639_v54, %s12473_s0  ;;  %s12500_s0 = smov 68  }
 0x745   :  { %v1019_v3 = vpop.xlane.xlu0 %1018 }
 0x746   :  { %v1021_v4 = vsub.f32 %v1011_v61, %v1019_v3  ;;  %v1016_v5 = vpop.xlane.xlu1 %1015 }
 0x747   :  { %v1020_v6 = vsub.f32 %v1006_v0, %v1016_v5 }
 0x748   :  { %v1024_v7 = vmul.f32 1.442695, %v1021_v4 }
 0x749   :  { %v1022_v8 = vmul.f32 1.442695, %v1020_v6 }
 0x74a   :  { %10308 = vpow2.f32 %v1024_v7  ;;  %v9893_v9 = vpop.permute.xlu1 %9892 }
 0x74b   :  { %v9895_v11 = vunpack.i.h.bf16 %v9893_v9  ;;  %v9894_v12 = vunpack.i.l.bf16 %v9893_v9  ;;  %10310 = vpow2.f32 %v1022_v8 }
 0x74d   :  { %v9697_v13 = vpack.c.bf16 %v9895_v11, %v9894_v12 }
 0x74e   :  { %v1139_v31 = vpop.permute.xlu1 %1138 }
 0x74f   :  { %9698 = vmatprep.subr.bf16.mxu1 %v9697_v13 }
 0x750   :  { %9700 = vmatpush3.bf16.msra.mxu1 %v9697_v13 }
 0x752   :  { %v1141_v32 = vpop.permute.xlu1 %1140 }
 0x754   :  { %v10309_v14 = vpop.eup %10308 }
 0x755   :  { %v1029_v15 = vsel %vm72_vm0, %v10309_v14, 0.0  ;;  %v10311_v18 = vpop.eup %10310 }
 0x756   :  { %1030 = vadd.xlane.f32.xlu0 %v1029_v15  ;;  %v1026_v19 = vsel %vm72_vm0, %v10311_v18, 0.0 }
 0x75a   :  { %1027 = vadd.xlane.f32.xlu0 %v1026_v19 }
 0x770   :  { %9897 = vrot.lane.b32.xlu0 %v10643_v55, %s12458_s19  ;;  %s12459_s19 = smov 24  }
 0x7e3   :  { %v1031_v20 = vpop.xlane.xlu0 %1030 }
 0x7e4   :  { %10312 = vrcp.f32 %v1031_v20 }
 0x7e7   :  { %v1028_v21 = vpop.xlane.xlu0 %1027 }
 0x7e8   :  { %10314 = vrcp.f32 %v1028_v21 }
 0x7eb   :  { %v9898_v22 = vpop.permute.xlu0 %9897 }
 0x7ec   :  { %v9900_v23 = vunpack.i.h.bf16 %v9898_v22  ;;  %v9899_v24 = vunpack.i.l.bf16 %v9898_v22 }
 0x7ee   :  { %v9701_v25 = vpack.c.bf16 %v9900_v23, %v9899_v24  ;;  %v10313_v26 = vpop.eup %10312 }
 0x7ef   :  { %v1035_v30 = vmul.f32 %v10313_v26, %v10309_v14 }
 0x7f0   :  { %9703 = vmatprep.subr.msk.bf16.mxu1 %vm10661_vm5, %v9701_v25 }
 0x7f2   :  { %v10315_v28 = vpop.eup %10314 }
 0x7f3   :  { %v1034_v29 = vmul.f32 %v10315_v28, %v10311_v18 }
 0x7f5   :  { %9462 = vmatprep.mubr.msk.f32.mxu1 %vm72_vm0, %v1034_v29 }
 0x7f6   :  { %9463 = vmatmul.mubr.msk.f32.vlgmr.msra.gmra.mrb[10].mxu1 %vm72_vm0, %v1035_v30 }
 0x7f7   :  { %9706 = vmatpush3.bf16.xpose.msk.msra.mxu1 %vm10661_vm5, %v9701_v25  ;;  %9469 = vmatprep.mubr.msk.f32.mxu1 %vm294_vm4, %v1139_v31 }
 0x7fe   :  { %9470 = vmatmul.mubr.msk.f32.vlgmr.msra.gmra.mrb[12].mxu1 %vm294_vm4, %v1141_v32 }
 0x8c9   :  { %v10765_v33 = vpop.f32.mrb[10].mxu1 }
 0x8ca   :  { %v10767_v34 = vpop.f32.mrb[11].mxu1 }
 0x8d1   :  { %v9471_v35 = vpop.f32.mrb[12].mxu1 }
 0x8d2   :  { %v1226_v36 = vadd.f32 %v9471_v35, %v10687_v16  ;;  %v1220_v37 = vpop.f32.mrb[13].mxu1 }
 0x8d3   :  { %v1221_v38 = vadd.f32 %v1220_v37, %v10689_v17 }
 0x8d4   :  { %v1232_v39 = vsel %vm72_vm0, %v1226_v36, -inf }
 0x8d5   :  { %1233 = vmax.xlane.f32.xlu0 %v1232_v39  ;;  %v1229_v40 = vsel %vm72_vm0, %v1221_v38, -inf }
 0x8d6   :  { %1230 = vmax.xlane.f32.xlu1 %v1229_v40 }
 0x8e7   :  { %9902 = vrot.lane.b32.xlu1 %v10643_v55, %s12456_s1  ;;  %s12463_s1 = smov 16  }
 0x8eb   :  { %1353 = vrot.lane.b32.xlu1 %v10635_v53, %s12454_s20 }
 0x8ef   :  { %1355 = vrot.lane.b32.xlu1 %v10639_v54, %s12454_s20  ;;  %s12465_s20 = smov 12  }
 0x962   :  { %v1234_v41 = vpop.xlane.xlu0 %1233 }
 0x963   :  { %v1236_v42 = vsub.f32 %v1226_v36, %v1234_v41  ;;  %v1231_v45 = vpop.xlane.xlu1 %1230 }
 0x964   :  { %v1235_v46 = vsub.f32 %v1221_v38, %v1231_v45 }
 0x965   :  { %v1239_v47 = vmul.f32 1.442695, %v1236_v42 }
 0x966   :  { %v1237_v48 = vmul.f32 1.442695, %v1235_v46 }
 0x967   :  { %10316 = vpow2.f32 %v1239_v47  ;;  %v9903_v49 = vpop.permute.xlu1 %9902 }
 0x968   :  { %v9905_v50 = vunpack.i.h.bf16 %v9903_v49  ;;  %v9904_v51 = vunpack.i.l.bf16 %v9903_v49  ;;  %10318 = vpow2.f32 %v1237_v48 }
 0x96a   :  { %v9707_v52 = vpack.c.bf16 %v9905_v50, %v9904_v51 }
 0x96b   :  { %v1354_v12 = vpop.permute.xlu1 %1353 }
 0x96c   :  { %9708 = vmatprep.subr.bf16.mxu0 %v9707_v52 }
 0x96d   :  { %9710 = vmatpush3.bf16.msra.mxu0 %v9707_v52 }
 0x96f   :  { %v1356_v13 = vpop.permute.xlu1 %1355 }
 0x971   :  { %v10317_v60 = vpop.eup %10316 }
 0x972   :  { %v1244_v61 = vsel %vm72_vm0, %v10317_v60, 0.0  ;;  %v10319_v63 = vpop.eup %10318 }
 0x973   :  { %1245 = vadd.xlane.f32.xlu0 %v1244_v61  ;;  %v1241_v0 = vsel %vm72_vm0, %v10319_v63, 0.0 }
 0x977   :  { %1242 = vadd.xlane.f32.xlu0 %v1241_v0 }
 0x98d   :  { %9907 = vrot.lane.b32.xlu0 %v10643_v55, %s12453_s21  ;;  %s12467_s21 = smov 8  }
 0xa00   :  { %v1246_v1 = vpop.xlane.xlu0 %1245 }
 0xa01   :  { %10320 = vrcp.f32 %v1246_v1 }
 0xa04   :  { %v1243_v2 = vpop.xlane.xlu0 %1242 }
 0xa05   :  { %10322 = vrcp.f32 %v1243_v2 }
 0xa08   :  { %v9908_v3 = vpop.permute.xlu0 %9907 }
 0xa09   :  { %v9910_v4 = vunpack.i.h.bf16 %v9908_v3  ;;  %v9909_v5 = vunpack.i.l.bf16 %v9908_v3 }
 0xa0b   :  { %v9711_v6 = vpack.c.bf16 %v9910_v4, %v9909_v5  ;;  %v10321_v7 = vpop.eup %10320 }
 0xa0c   :  { %v1250_v11 = vmul.f32 %v10321_v7, %v10317_v60 }
 0xa0d   :  { %9713 = vmatprep.subr.msk.bf16.mxu0 %vm10661_vm5, %v9711_v6 }
 0xa0f   :  { %v10323_v8 = vpop.eup %10322 }
 0xa10   :  { %v1249_v9 = vmul.f32 %v10323_v8, %v10319_v63 }
 0xa12   :  { %9476 = vmatprep.mubr.msk.f32.mxu0 %vm72_vm0, %v1249_v9 }
 0xa13   :  { %9477 = vmatmul.mubr.msk.f32.vlgmr.msra.gmra.mrb[10].mxu0 %vm72_vm0, %v1250_v11 }
 0xa14   :  { %9716 = vmatpush3.bf16.xpose.msk.msra.mxu0 %vm10661_vm5, %v9711_v6  ;;  %9483 = vmatprep.mubr.msk.f32.mxu0 %vm294_vm4, %v1354_v12 }
 0xa1b   :  { %9484 = vmatmul.mubr.msk.f32.vlgmr.msra.gmra.mrb[12].mxu0 %vm294_vm4, %v1356_v13 }
 0xae6   :  { %v10791_v14 = vpop.f32.mrb[10].mxu0 }
 0xae7   :  { %v10793_v15 = vpop.f32.mrb[11].mxu0 }
 0xaee   :  { %v9485_v18 = vpop.f32.mrb[12].mxu0 }
 0xaef   :  { %v1441_v19 = vadd.f32 %v9485_v18, %v10687_v16  ;;  %v1435_v20 = vpop.f32.mrb[13].mxu0 }
 0xaf0   :  { %v1436_v21 = vadd.f32 %v1435_v20, %v10689_v17 }
 0xaf1   :  { %v1447_v22 = vsel %vm72_vm0, %v1441_v19, -inf }
 0xaf2   :  { %1448 = vmax.xlane.f32.xlu0 %v1447_v22  ;;  %v1444_v23 = vsel %vm72_vm0, %v1436_v21, -inf }
 0xaf3   :  { %1445 = vmax.xlane.f32.xlu1 %v1444_v23 }
 0xb04   :  { %9912 = vrot.lane.b32.xlu1 %v10643_v55, %s12448_s22  ;;  %s12449_s22 = smov 100  }
 0xb08   :  { %1568 = vrot.lane.b32.xlu1 %v10635_v53, %s12445_s2 }
 0xb0c   :  { %1570 = vrot.lane.b32.xlu1 %v10639_v54, %s12445_s2  ;;  %s12447_s2 = smov 72  }
 0xb7f   :  { %v1449_v24 = vpop.xlane.xlu0 %1448 }
 0xb80   :  { %v1451_v25 = vsub.f32 %v1441_v19, %v1449_v24  ;;  %v1446_v26 = vpop.xlane.xlu1 %1445 }
 0xb81   :  { %v1450_v28 = vsub.f32 %v1436_v21, %v1446_v26 }
 0xb82   :  { %v1454_v29 = vmul.f32 1.442695, %v1451_v25 }
 0xb83   :  { %v1452_v30 = vmul.f32 1.442695, %v1450_v28 }
 0xb84   :  { %10324 = vpow2.f32 %v1454_v29  ;;  %v9913_v31 = vpop.permute.xlu1 %9912 }
 0xb85   :  { %v9915_v32 = vunpack.i.h.bf16 %v9913_v31  ;;  %v9914_v35 = vunpack.i.l.bf16 %v9913_v31  ;;  %10326 = vpow2.f32 %v1452_v30 }
 0xb87   :  { %v9717_v36 = vpack.c.bf16 %v9915_v32, %v9914_v35 }
 0xb88   :  { %v1569_v60 = vpop.permute.xlu1 %1568 }
 0xb89   :  { %9718 = vmatprep.subr.bf16.mxu1 %v9717_v36 }
 0xb8a   :  { %9720 = vmatpush3.bf16.msra.mxu1 %v9717_v36 }
 0xb8c   :  { %v1571_v61 = vpop.permute.xlu1 %1570 }
 0xb8e   :  { %v10325_v37 = vpop.eup %10324 }
 0xb8f   :  { %v1459_v38 = vsel %vm72_vm0, %v10325_v37, 0.0  ;;  %v10327_v39 = vpop.eup %10326 }
 0xb90   :  { %1460 = vadd.xlane.f32.xlu0 %v1459_v38  ;;  %v1456_v40 = vsel %vm72_vm0, %v10327_v39, 0.0 }
 0xb94   :  { %1457 = vadd.xlane.f32.xlu0 %v1456_v40 }
 0xbaa   :  { %9917 = vrot.lane.b32.xlu0 %v10643_v55, %s12447_s2  ;;  %s12452_s2 = smov 40  }
 0xc1d   :  { %v1461_v41 = vpop.xlane.xlu0 %1460 }
 0xc1e   :  { %10328 = vrcp.f32 %v1461_v41 }
 0xc21   :  { %v1458_v42 = vpop.xlane.xlu0 %1457 }
 0xc22   :  { %10330 = vrcp.f32 %v1458_v42 }
 0xc25   :  { %v9918_v45 = vpop.permute.xlu0 %9917 }
 0xc26   :  { %v9920_v46 = vunpack.i.h.bf16 %v9918_v45  ;;  %v9919_v47 = vunpack.i.l.bf16 %v9918_v45 }
 0xc28   :  { %v9721_v48 = vpack.c.bf16 %v9920_v46, %v9919_v47  ;;  %v10329_v49 = vpop.eup %10328 }
 0xc29   :  { %v1465_v52 = vmul.f32 %v10329_v49, %v10325_v37 }
 0xc2a   :  { %9723 = vmatprep.subr.msk.bf16.mxu1 %vm10661_vm5, %v9721_v48 }
 0xc2c   :  { %v10331_v50 = vpop.eup %10330 }
 0xc2d   :  { %v1464_v51 = vmul.f32 %v10331_v50, %v10327_v39 }
 0xc2f   :  { %9490 = vmatprep.mubr.msk.f32.mxu1 %vm72_vm0, %v1464_v51 }
 0xc30   :  { %9491 = vmatmul.mubr.msk.f32.vlgmr.msra.gmra.mrb[14].mxu1 %vm72_vm0, %v1465_v52 }
 0xc31   :  { %9726 = vmatpush3.bf16.xpose.msk.msra.mxu1 %vm10661_vm5, %v9721_v48  ;;  %9497 = vmatprep.mubr.msk.f32.mxu1 %vm294_vm4, %v1569_v60 }
 0xc38   :  { %9498 = vmatmul.mubr.msk.f32.vlgmr.msra.gmra.mrb[16].mxu1 %vm294_vm4, %v1571_v61 }
 0xd03   :  { %v10817_v63 = vpop.f32.mrb[14].mxu1 }
 0xd04   :  { %v10819_v0 = vpop.f32.mrb[15].mxu1 }
 0xd0b   :  { %v9499_v1 = vpop.f32.mrb[16].mxu1 }
 0xd0c   :  { %v1656_v2 = vadd.f32 %v9499_v1, %v10687_v16  ;;  %v1650_v3 = vpop.f32.mrb[17].mxu1 }
 0xd0d   :  { %v1651_v4 = vadd.f32 %v1650_v3, %v10689_v17 }
 0xd0e   :  { %v1662_v5 = vsel %vm72_vm0, %v1656_v2, -inf }
 0xd0f   :  { %1663 = vmax.xlane.f32.xlu0 %v1662_v5  ;;  %v1659_v6 = vsel %vm72_vm0, %v1651_v4, -inf }
 0xd10   :  { %1660 = vmax.xlane.f32.xlu1 %v1659_v6 }
 0xd21   :  { %9922 = vrot.lane.b32.xlu1 %v10643_v55, %s12452_s2  ;;  %s12471_s2 = smov 4  }
 0xd25   :  { %1783 = vrot.lane.b32.xlu1 %v10635_v53, %s12449_s22 }
 0xd29   :  { %1785 = vrot.lane.b32.xlu1 %v10639_v54, %s12449_s22  ;;  %s12451_s22 = smov 68  }
 0xd9c   :  { %v1664_v7 = vpop.xlane.xlu0 %1663 }
 0xd9d   :  { %v1666_v8 = vsub.f32 %v1656_v2, %v1664_v7  ;;  %v1661_v9 = vpop.xlane.xlu1 %1660 }
 0xd9e   :  { %v1665_v11 = vsub.f32 %v1651_v4, %v1661_v9 }
 0xd9f   :  { %v1669_v12 = vmul.f32 1.442695, %v1666_v8 }
 0xda0   :  { %v1667_v13 = vmul.f32 1.442695, %v1665_v11 }
 0xda1   :  { %10332 = vpow2.f32 %v1669_v12  ;;  %v9923_v18 = vpop.permute.xlu1 %9922 }
 0xda2   :  { %v9925_v19 = vunpack.i.h.bf16 %v9923_v18  ;;  %v9924_v20 = vunpack.i.l.bf16 %v9923_v18  ;;  %10334 = vpow2.f32 %v1667_v13 }
 0xda4   :  { %v9727_v21 = vpack.c.bf16 %v9925_v19, %v9924_v20 }
 0xda5   :  { %v1784_v37 = vpop.permute.xlu1 %1783 }
 0xda6   :  { %9728 = vmatprep.subr.bf16.mxu0 %v9727_v21 }
 0xda7   :  { %9730 = vmatpush3.bf16.msra.mxu0 %v9727_v21  ;;  %v10018_v21 = vld [vmem:[%s12432_s8] sm:$0xff]  }
 0xda9   :  { %v1786_v38 = vpop.permute.xlu1 %1785 }
 0xdab   :  { %v10333_v22 = vpop.eup %10332 }
 0xdac   :  { %v1674_v53 = vsel %vm72_vm0, %v10333_v22, 0.0  ;;  %v10335_v23 = vpop.eup %10334 }
 0xdad   :  { %1675 = vadd.xlane.f32.xlu0 %v1674_v53  ;;  %v1671_v54 = vsel %vm72_vm0, %v10335_v23, 0.0 }
 0xdb1   :  { %1672 = vadd.xlane.f32.xlu0 %v1671_v54 }
 0xdc7   :  { %9927 = vrot.lane.b32.xlu0 %v10643_v55, %s12451_s22  ;;  %s12457_s22 = smov 36  }
 0xe3a   :  { %v1676_v24 = vpop.xlane.xlu0 %1675 }
 0xe3b   :  { %10336 = vrcp.f32 %v1676_v24 }
 0xe3e   :  { %v1673_v25 = vpop.xlane.xlu0 %1672 }
 0xe3f   :  { %10338 = vrcp.f32 %v1673_v25 }
 0xe42   :  { %v9928_v26 = vpop.permute.xlu0 %9927 }
 0xe43   :  { %v9930_v28 = vunpack.i.h.bf16 %v9928_v26  ;;  %v9929_v29 = vunpack.i.l.bf16 %v9928_v26 }
 0xe45   :  { %v9731_v30 = vpack.c.bf16 %v9930_v28, %v9929_v29  ;;  %v10337_v31 = vpop.eup %10336  ;;  %v8187_v29 = vld [vmem:[%s12433_s9] ss:$0 sm:$0xff] }
 0xe46   :  { %v1680_v36 = vmul.f32 %v10337_v31, %v10333_v22  ;;  %v10019_v22 = vld [vmem:[%s12432_s8 + $0x8] sm:$0xff]  }
 0xe47   :  { %9733 = vmatprep.subr.msk.bf16.mxu0 %vm10661_vm5, %v9731_v30 }
 0xe49   :  { %v10339_v32 = vpop.eup %10338 }
 0xe4a   :  { %v1679_v35 = vmul.f32 %v10339_v32, %v10335_v23 }
 0xe4c   :  { %9504 = vmatprep.mubr.msk.f32.mxu0 %vm72_vm0, %v1679_v35 }
 0xe4d   :  { %9505 = vmatmul.mubr.msk.f32.vlgmr.msra.gmra.mrb[14].mxu0 %vm72_vm0, %v1680_v36 }
 0xe4e   :  { %9736 = vmatpush3.bf16.xpose.msk.msra.mxu0 %vm10661_vm5, %v9731_v30  ;;  %9511 = vmatprep.mubr.msk.f32.mxu0 %vm294_vm4, %v1784_v37 }
 0xe55   :  { %9512 = vmatmul.mubr.msk.f32.vlgmr.msra.gmra.mrb[16].mxu0 %vm294_vm4, %v1786_v38 }
 0xf20   :  { %v9506_v39 = vpop.f32.mrb[14].mxu0 }
 0xf21   :  { %v10843_v40 = vpop.f32.mrb[15].mxu0 }
 0xf28   :  { %v9513_v41 = vpop.f32.mrb[16].mxu0 }
 0xf29   :  { %v1871_v42 = vadd.f32 %v9513_v41, %v10687_v16  ;;  %v1865_v45 = vpop.f32.mrb[17].mxu0 }
 0xf2a   :  { %v1866_v46 = vadd.f32 %v1865_v45, %v10689_v17 }
 0xf2b   :  { %v1877_v47 = vsel %vm72_vm0, %v1871_v42, -inf }
 0xf2c   :  { %1878 = vmax.xlane.f32.xlu0 %v1877_v47  ;;  %v1874_v48 = vsel %vm72_vm0, %v1866_v46, -inf }
 0xf2d   :  { %1875 = vmax.xlane.f32.xlu1 %v1874_v48 }
 0xf3e   :  { %9932 = vrot.lane.b32.xlu1 %v10643_v55, %s12457_s22  ;;  %s12461_s22 = smov 20  }
 0xf42   :  { %697 = vrot.lane.b32.xlu1 %v10735_v56, %s12471_s2 }
 0xf46   :  { %910 = vrot.lane.b32.xlu1 %v10741_v59, %s12467_s21 }
 0xf4a   :  { %912 = vrot.lane.b32.xlu1 %v10739_v58, %s12467_s21  ;;  %s12469_s21 = smov 28  }
 0xf4e   :  { %1127 = vrot.lane.b32.xlu1 %v10765_v33, %s12465_s20 }
 0xf52   :  { %1342 = vrot.lane.b32.xlu1 %v10791_v14, %s12463_s1 }
 0xf56   :  { %1557 = vrot.lane.b32.xlu1 %v10817_v63, %s12461_s22 }
 0xf5a   :  { %1772 = vrot.lane.b32.xlu1 %v9506_v39, %s12459_s19 }
 0xfb9   :  { %v1879_v55 = vpop.xlane.xlu0 %1878 }
 0xfba   :  { %v1881_v56 = vsub.f32 %v1871_v42, %v1879_v55  ;;  %v1876_v59 = vpop.xlane.xlu1 %1875 }
 0xfbb   :  { %v1880_v49 = vsub.f32 %v1866_v46, %v1876_v59 }
 0xfbc   :  { %v1884_v58 = vmul.f32 1.442695, %v1881_v56 }
 0xfbd   :  { %v1882_v50 = vmul.f32 1.442695, %v1880_v49 }
 0xfbe   :  { %v9933_v51 = vpop.permute.xlu1 %9932 }
 0xfbf   :  { %10340 = vpow2.f32 %v1882_v50  ;;  %v9935_v33 = vunpack.i.h.bf16 %v9933_v51  ;;  %v9934_v52 = vunpack.i.l.bf16 %v9933_v51  ;;  %v2112_v50 = vld [vmem:[%s12434_s10 + $0x8] sm:$0xff] }
 0xfc0   :  { %10342 = vpow2.f32 %v1884_v58  ;;  %v2119_v58 = vld [vmem:[%s12434_s10 + $0x40] sm:$0xff] }
 0xfc1   :  { %v9737_v14 = vpack.c.bf16 %v9935_v33, %v9934_v52  ;;  %v2120_v33 = vld [vmem:[%s12434_s10 + $0x48] sm:$0xff] }
 0xfc2   :  { %v698_v60 = vpop.permute.xlu1 %697 }
 0xfc3   :  { %703 = vst.msk [vmem:[#allocation3 + $0x8] sm:$0xff] %vm701_vm8, %v698_v60  ;;  %9738 = vmatprep.subr.bf16.mxu1 %v9737_v14  ;;  %v8196_v60 = vcombine.high %v2112_v50, %v2120_v33 }
 0xfc4   :  { %9740 = vmatpush3.bf16.msra.mxu1 %v9737_v14  ;;  %v8195_v14 = vcombine.low %v2112_v50, %v2120_v33 }
 0xfc5   :  { %9521 = vmatprep.subr.bf16.mxu1 %v10450_v27 }
 0xfc6   :  { %v911_v61 = vpop.permute.xlu1 %910 }
 0xfc9   :  { %v10341_v63 = vpop.eup %10340 }
 0xfca   :  { %v913_v1 = vpop.permute.xlu1 %912  ;;  %v1886_v2 = vsel %vm72_vm0, %v10341_v63, 0.0  ;;  %v10343_v3 = vpop.eup %10342 }
 0xfcb   :  { %918 = vst.msk [vmem:[#allocation3 + $0x8] sm:$0xff] %vm916_vm9, %v913_v1  ;;  %1887 = vadd.xlane.f32.xlu0 %v1886_v2  ;;  %v1889_v5 = vsel %vm72_vm0, %v10343_v3, 0.0  ;;  %v2128_v1 = vld [vmem:[%s12434_s10 + $0x88] sm:$0xff] }
 0xfce   :  { %v1128_v4 = vpop.permute.xlu1 %1127 }
 0xfcf   :  { %1133 = vst.msk [vmem:[#allocation3 + $0x8] sm:$0xff] %vm1131_vm10, %v1128_v4  ;;  %1890 = vadd.xlane.f32.xlu0 %v1889_v5 }
 0xfd2   :  { %v1343_v6 = vpop.permute.xlu1 %1342 }
 0xfd3   :  { %1348 = vst.msk [vmem:[#allocation3 + $0x8] sm:$0xff] %vm1346_vm11, %v1343_v6 }
 0xfd6   :  { %v1558_v7 = vpop.permute.xlu1 %1557 }
 0xfd7   :  { %1563 = vst.msk [vmem:[#allocation3 + $0x8] sm:$0xff] %vm1561_vm12, %v1558_v7  ;;  %v2113_v7 = vld [vmem:[%s12434_s10 + $0x10] sm:$0xff] }
 0xfda   :  { %v1773_v8 = vpop.permute.xlu1 %1772 }
 0xfdb   :  { %1778 = vst.msk [vmem:[#allocation3 + $0x8] sm:$0xff] %vm1776_vm13, %v1773_v8  ;;  %v2121_v8 = vld [vmem:[%s12434_s10 + $0x50] sm:$0xff] }
 0xfe5   :  { %695 = vrot.lane.b32.xlu0 %v10737_v57, %s12471_s2  ;;  %s12498_s2 = smov 40  }
 0xfe9   :  { %1125 = vrot.lane.b32.xlu0 %v10767_v34, %s12465_s20  ;;  %s12501_s20 = smov 36  }
 0xfed   :  { %1340 = vrot.lane.b32.xlu0 %v10793_v15, %s12463_s1  ;;  %s12505_s1 = smov 16  }
 0xff1   :  { %1555 = vrot.lane.b32.xlu0 %v10819_v0, %s12461_s22  ;;  %s12502_s22 = smov 4  }
 0xff5   :  { %1770 = vrot.lane.b32.xlu0 %v10843_v40, %s12459_s19  ;;  %s12504_s19 = smov 12  }
0x1058   :  { %v1888_v9 = vpop.xlane.xlu0 %1887 }
0x1059   :  { %10344 = vrcp.f32 %v1888_v9  ;;  %v2114_v9 = vld [vmem:[%s12434_s10 + $0x18] sm:$0xff] }
0x105c   :  { %v1891_v11 = vpop.xlane.xlu0 %1890 }
0x105d   :  { %10346 = vrcp.f32 %v1891_v11  ;;  %v8198_v11 = vcombine.high %v2113_v7, %v2121_v8 }
0x1060   :  { %v696_v12 = vpop.permute.xlu0 %695 }
0x1061   :  { %702 = vst.msk [vmem:[#allocation3] sm:$0xff] %vm701_vm8, %v696_v12  ;;  %v2122_v12 = vld [vmem:[%s12434_s10 + $0x58] sm:$0xff] }
0x1062   :  { %917 = vst.msk [vmem:[#allocation3] sm:$0xff] %vm916_vm9, %v911_v61  ;;  %v2127_v61 = vld [vmem:[%s12434_s10 + $0x80] sm:$0xff] }
0x1063   :  { %v10345_v57 = vpop.eup %10344 }
0x1064   :  { %v1126_v34 = vpop.permute.xlu0 %1125  ;;  %v1894_v13 = vmul.f32 %v10345_v57, %v10341_v63  ;;  %v2135_v63 = vld [vmem:[%s12434_s10 + $0xc0] sm:$0xff]  ;;  %v10483_v57 = vmov 0  }
0x1065   :  { %1132 = vst.msk [vmem:[#allocation3] sm:$0xff] %vm1131_vm10, %v1126_v34  ;;  %v8210_v2 = vcombine.high %v2127_v61, %v2135_v63  ;;  %v8209_v4 = vcombine.low %v2127_v61, %v2135_v63  ;;  %2422 = vmatprep.mubr.bf16.mxu0 %v10483_v57  ;;  %v8197_v34 = vcombine.low %v2113_v7, %v2121_v8  ;;  %v2126_v61 = vld [vmem:[%s12434_s10 + $0x78] sm:$0xff] }
0x1066   :  { %9518 = vmatprep.mubr.msk.f32.mxu1 %vm72_vm0, %v1894_v13  ;;  %v8199_v13 = vcombine.low %v2114_v9, %v2122_v12  ;;  %v2142_v7 = vld [vmem:[%s12434_s10 + $0xf8] sm:$0xff] }
0x1067   :  { %v10347_v15 = vpop.eup %10346 }
0x1068   :  { %v1341_v0 = vpop.permute.xlu0 %1340  ;;  %v1895_v18 = vmul.f32 %v10347_v15, %v10343_v3  ;;  %v2136_v3 = vld [vmem:[%s12434_s10 + $0xc8] sm:$0xff]  ;;  %v8200_v15 = vcombine.high %v2114_v9, %v2122_v12 }
0x1069   :  { %1347 = vst.msk [vmem:[#allocation3] sm:$0xff] %vm1346_vm11, %v1341_v0  ;;  %v8211_v5 = vcombine.low %v2128_v1, %v2136_v3  ;;  %v8212_v6 = vcombine.high %v2128_v1, %v2136_v3 }
0x106a   :  { %9519 = vmatmul.mubr.msk.f32.vlgmr.msra.gmra.mrb[18].mxu1 %vm72_vm0, %v1895_v18 }
0x106b   :  { %9525 = vmatprep.mubr.msk.bf16.mxu1 %vm10451_vm2, %v10450_v27  ;;  %9522 = vmatpush3.bf16.msra.mxu1 %v10018_v21 }
0x106c   :  { %v1556_v19 = vpop.permute.xlu0 %1555  ;;  %9523 = vmatprep.subr.bf16.mxu1 %v10450_v27 }
0x106d   :  { %1562 = vst.msk [vmem:[#allocation3] sm:$0xff] %vm1561_vm12, %v1556_v19 }
0x106f   :  { %9524 = vmatpush3.bf16.msra.mxu1 %v10019_v22 }
0x1070   :  { %v1771_v20 = vpop.permute.xlu0 %1770  ;;  %2433 = vmatprep.subr.bf16.mxu1 %v8196_v60  ;;  %v2118_v60 = vld [vmem:[%s12434_s10 + $0x38] sm:$0xff] }
0x1071   :  { %1777 = vst.msk [vmem:[#allocation3] sm:$0xff] %vm1776_vm13, %v1771_v20  ;;  %v8208_v3 = vcombine.high %v2118_v60, %v2126_v61  ;;  %v8207_v9 = vcombine.low %v2118_v60, %v2126_v61 }
0x113d   :  { %v9520_v53 = vpop.f32.mrb[18].mxu1 }
0x113e   :  { %1987 = vrot.lane.b32.xlu1 %v9520_v53, %s12469_s21  ;;  %v1974_v23 = vpop.f32.mrb[19].mxu1 }
0x113f   :  { %1985 = vrot.lane.b32.xlu0 %v1974_v23, %s12469_s21  ;;  %s12497_s21 = smov 72  }
0x11b0   :  { %v1988_v54 = vpop.permute.xlu1 %1987 }
0x11b1   :  { %1993 = vst.msk [vmem:[#allocation3 + $0x8] sm:$0xff] %vm1991_vm14, %v1988_v54  ;;  %v1986_v24 = vpop.permute.xlu0 %1985  ;;  %v8191_v54 = vld [vmem:[%s12438_s14] ss:$0 sm:$0xff] }
0x11b2   :  { %1992 = vst.msk [vmem:[#allocation3] sm:$0xff] %vm1991_vm14, %v1986_v24 }
0x11b8   :  { %v1995_v25 = vld [vmem:[#allocation3 + $0x8] sm:$0xff] }
0x11b9   :  { %v1994_v26 = vld [vmem:[#allocation3] sm:$0xff] }
0x11ba   :  { %v1996_v28 = vpack.c.bf16 %v1995_v25, %v1994_v26 }
0x11bc   :  { %9526 = vmatmul.mubr.msk.bf16.vlgmr.msra.gmra.mrb[20].mxu1 %vm160_vm1, %v1996_v28  ;;  %v8192_v28 = vld [vmem:[%s12439_s15] ss:$0 sm:$0xff] }
0x11bd   :  { %2434 = vmatpush1.bf16.msra.mxu1 %v8195_v14  ;;  %2465 = vmatprep.mubr.bf16.mxu1 %v10483_v57  ;;  %v2125_v14 = vld [vmem:[%s12434_s10 + $0x70] sm:$0xff] }
0x11be   :  { %2435 = vmatprep.subr.bf16.mxu1 %v8212_v6  ;;  %v2134_v6 = vld [vmem:[%s12434_s10 + $0xb8] sm:$0xff] }
0x11bf   :  { %v8224_v12 = vcombine.high %v2134_v6, %v2142_v7 }
0x11c1   :  { %2436 = vmatpush1.bf16.msra.mxu1 %v8211_v5  ;;  %v2141_v5 = vld [vmem:[%s12434_s10 + $0xf0] sm:$0xff] }
0x11c2   :  { %2519 = vmatprep.subr.bf16.mxu1 %v8200_v15  ;;  %v10020_v15 = vld [vmem:[%s12436_s12 + $0x40] sm:$0xff]  }
0x128f   :  { %v2057_v30 = vpop.f32.mrb[20].mxu1 }
0x1290   :  { %v2058_v31 = vadd.f32 %v8187_v29, %v2057_v30  ;;  %v9527_v32 = vpop.f32.mrb[21].mxu1  ;;  %v2129_v30 = vld [vmem:[%s12434_s10 + $0x90] sm:$0xff] }
0x1291   :  { %v2060_v35 = vpop.f32.mrb[22].mxu1  ;;  %v2130_v32 = vld [vmem:[%s12434_s10 + $0x98] sm:$0xff] }
0x1292   :  { %v2061_v36 = vadd.f32 %v8187_v29, %v2060_v35  ;;  %v9528_v37 = vpop.f32.mrb[23].mxu1  ;;  %v2064_v38 = vadd.f32 %v2058_v31, %v10623_v43  ;;  %v2137_v31 = vld [vmem:[%s12434_s10 + $0xd0] sm:$0xff]  ;;  %v2138_v35 = vld [vmem:[%s12434_s10 + $0xd8] sm:$0xff] }
0x1294   :  { %v2068_v39 = vsel %vm160_vm1, %v2064_v38, 0.0  ;;  %v2065_v40 = vadd.f32 %v2061_v36, %v10625_v44  ;;  %v2111_v44 = vld [vmem:[%s12434_s10] sm:$0xff] }
0x1295   :  { %2069 = vadd.xlane.f32.xlu0 %v2068_v39  ;;  %v8194_v51 = vcombine.high %v2111_v44, %v2119_v58  ;;  %v8193_v52 = vcombine.low %v2111_v44, %v2119_v58  ;;  %v8214_v39 = vcombine.high %v2129_v30, %v2137_v31  ;;  %v2140_v44 = vld [vmem:[%s12434_s10 + $0xe8] sm:$0xff] }
0x1296   :  { %v2071_v41 = vsel %vm160_vm1, %v2065_v40, 0.0 }
0x1297   :  { %2072 = vadd.xlane.f32.xlu1 %v2071_v41  ;;  %2390 = vmatprep.subr.bf16.mxu0 %v8194_v51  ;;  %v2115_v41 = vld [vmem:[%s12434_s10 + $0x20] sm:$0xff] }
0x1298   :  { %2391 = vmatpush1.bf16.msra.mxu0 %v8193_v52  ;;  %v2117_v52 = vld [vmem:[%s12434_s10 + $0x30] sm:$0xff] }
0x1299   :  { %2392 = vmatprep.subr.bf16.mxu0 %v8210_v2  ;;  %v8206_v2 = vcombine.high %v2117_v52, %v2125_v14  ;;  %v8205_v8 = vcombine.low %v2117_v52, %v2125_v14  ;;  %v11163_v52 = vsub.s32 3, %v10683_v10 }
0x129c   :  { %2393 = vmatpush1.bf16.msra.mxu0 %v8209_v4  ;;  %v2133_v4 = vld [vmem:[%s12434_s10 + $0xb0] sm:$0xff] }
0x129d   :  { %2476 = vmatprep.subr.bf16.mxu0 %v8198_v11  ;;  %v8222_v11 = vcombine.high %v2133_v4, %v2141_v5 }
0x1322   :  { %v2070_v42 = vpop.xlane.xlu0 %2069 }
0x1323   :  { %v2074_v45 = vmul.f32 0.03125, %v2070_v42  ;;  %v2123_v42 = vld [vmem:[%s12434_s10 + $0x60] sm:$0xff] }
0x1324   :  { %v2073_v46 = vpop.xlane.xlu1 %2072  ;;  %v8201_v58 = vcombine.low %v2115_v41, %v2123_v42 }
0x1325   :  { %v2076_v47 = vsub.f32 %v2064_v38, %v2074_v45  ;;  %v2075_v48 = vmul.f32 0.03125, %v2073_v46  ;;  %v2116_v45 = vld [vmem:[%s12434_s10 + $0x28] sm:$0xff] }
0x1326   :  { %v2124_v46 = vld [vmem:[%s12434_s10 + $0x68] sm:$0xff] }
0x1327   :  { %v2077_v55 = vsub.f32 %v2065_v40, %v2075_v48  ;;  %v2078_v56 = vmul.f32 %v2076_v47, %v2076_v47  ;;  %v8216_v40 = vcombine.high %v2130_v32, %v2138_v35  ;;  %v8215_v48 = vcombine.low %v2130_v32, %v2138_v35  ;;  %v10037_v32 = vld [vmem:[%s12436_s12 + $0xe0] sm:$0xff]  }
0x1328   :  { %v8203_v50 = vcombine.low %v2116_v45, %v2124_v46  ;;  %v10038_v35 = vld [vmem:[%s12436_s12 + $0x20] sm:$0xff]  }
0x1329   :  { %v2080_v59 = vsel %vm160_vm1, %v2078_v56, 0.0  ;;  %v2079_v49 = vmul.f32 %v2077_v55, %v2077_v55  ;;  %v8204_v56 = vcombine.high %v2116_v45, %v2124_v46  ;;  %v10044_v45 = vld [vmem:[%s12436_s12 + $0x70] sm:$0xff]  }
0x132a   :  { %2081 = vadd.xlane.f32.xlu0 %v2080_v59  ;;  %v2131_v59 = vld [vmem:[%s12434_s10 + $0xa0] sm:$0xff]  ;;  %v10045_v46 = vld [vmem:[%s12436_s12 + $0xf0] sm:$0xff]  }
0x132b   :  { %v2083_v43 = vsel %vm160_vm1, %v2079_v49, 0.0  ;;  %v2139_v49 = vld [vmem:[%s12434_s10 + $0xe0] sm:$0xff] }
0x132c   :  { %v8218_v51 = vcombine.high %v2131_v59, %v2139_v49  ;;  %v8217_v63 = vcombine.low %v2131_v59, %v2139_v49  ;;  %v10050_v59 = vld [vmem:[%s12436_s12 + $0x38] sm:$0xff]  }
0x132d   :  { %v10051_v49 = vld [vmem:[%s12436_s12 + $0xb8] sm:$0xff]  }
0x132e   :  { %2084 = vadd.xlane.f32.xlu0 %v2083_v43  ;;  %v2132_v43 = vld [vmem:[%s12434_s10 + $0xa8] sm:$0xff] }
0x132f   :  { %v8220_v33 = vcombine.high %v2132_v43, %v2140_v44  ;;  %v8219_v1 = vcombine.low %v2132_v43, %v2140_v44  ;;  %v10052_v43 = vld [vmem:[%s12436_s12 + $0x140] sm:$0xff]  }
0x1330   :  { %v10053_v44 = vld [vmem:[%s12436_s12 + $0x1c0] sm:$0xff]  }
0x13b7   :  { %v2082_v0 = vpop.xlane.xlu0 %2081 }
0x13b8   :  { %v2086_v18 = vmul.f32 0.03125, %v2082_v0  ;;  %v10021_v0 = vld [vmem:[%s12436_s12 + $0xc0] sm:$0xff]  }
0x13ba   :  { %v2088_v19 = vadd.f32 1e-05, %v2086_v18  ;;  %v10022_v18 = vld [vmem:[%s12436_s12] sm:$0xff]  }
0x13bb   :  { %v2085_v20 = vpop.xlane.xlu0 %2084 }
0x13bc   :  { %10348 = vrsqrt.f32 %v2088_v19  ;;  %v2087_v21 = vmul.f32 0.03125, %v2085_v20  ;;  %v10023_v19 = vld [vmem:[%s12436_s12 + $0x80] sm:$0xff]   ;;  %v10024_v20 = vld [vmem:[%s12436_s12 + $0x48] sm:$0xff]  }
0x13be   :  { %v2089_v22 = vadd.f32 1e-05, %v2087_v21  ;;  %v10025_v21 = vld [vmem:[%s12436_s12 + $0xc8] sm:$0xff]  }
0x13c0   :  { %10350 = vrsqrt.f32 %v2089_v22  ;;  %v10026_v22 = vld [vmem:[%s12436_s12 + $0x8] sm:$0xff]  }
0x13c6   :  { %v10349_v53 = vpop.eup %10348 }
0x13c7   :  { %v2092_v23 = vmul.f32 %v10349_v53, %v2076_v47  ;;  %v8213_v47 = vcombine.low %v2129_v30, %v2137_v31  ;;  %v10027_v53 = vld [vmem:[%s12436_s12 + $0x88] sm:$0xff]   ;;  %v10035_v30 = vld [vmem:[%s12436_s12 + $0x98] sm:$0xff]   ;;  %v10036_v31 = vld [vmem:[%s12436_s12 + $0x60] sm:$0xff]  }
0x13c9   :  { %v2100_v25 = vmul.f32 %v8191_v54, %v2092_v23  ;;  %v10028_v23 = vld [vmem:[%s12436_s12 + $0x50] sm:$0xff]  }
0x13ca   :  { %v10351_v24 = vpop.eup %10350 }
0x13cb   :  { %v2093_v26 = vmul.f32 %v10351_v24, %v2077_v55  ;;  %v10970_v36 = vadd.f32 %v8192_v28, %v2100_v25  ;;  %v8202_v55 = vcombine.high %v2115_v41, %v2123_v42  ;;  %v10030_v24 = vld [vmem:[%s12436_s12 + $0x10] sm:$0xff]   ;;  %v10042_v41 = vld [vmem:[%s12436_s12 + $0x28] sm:$0xff]  }
0x13cc   :  { %v10031_v25 = vld [vmem:[%s12436_s12 + $0x90] sm:$0xff]   ;;  %v10043_v42 = vld [vmem:[%s12436_s12 + $0xa8] sm:$0xff]  }
0x13cd   :  { %v2101_v29 = vmul.f32 %v8191_v54, %v2093_v26  ;;  %v10029_v54 = vld [vmem:[%s12436_s12 + $0xd0] sm:$0xff]   ;;  %v10032_v26 = vld [vmem:[%s12436_s12 + $0x58] sm:$0xff]  }
0x13cf   :  { %v10972_v37 = vadd.f32 %v8192_v28, %v2101_v29  ;;  %v10033_v28 = vld [vmem:[%s12436_s12 + $0xd8] sm:$0xff]  }
0x13d0   :  { %v10034_v29 = vld [vmem:[%s12436_s12 + $0x18] sm:$0xff]  }
0x13d1   :  { %v10976_v38 = vpack.c.bf16 %v10972_v37, %v10970_v36 }
0x13d3   :  { %8225 = vmatmul.mubr.msk.bf16.vlgmr.msra.gmra.mrb[20].mxu0 %vm160_vm1, %v10976_v38  ;;  %8226 = vmatmul.mubr.msk.bf16.vlgmr.msra.gmra.mrb[24].mxu1 %vm160_vm1, %v10976_v38 }
0x13d4   :  { %2477 = vmatpush1.bf16.msra.mxu0 %v8197_v34  ;;  %2520 = vmatpush1.bf16.msra.mxu1 %v8199_v13  ;;  %v8221_v34 = vcombine.low %v2133_v4, %v2141_v5  ;;  %v8223_v13 = vcombine.low %v2134_v6, %v2142_v7  ;;  %v11176_v5 = vsub.s32 5, %v10683_v10  ;;  %v11179_v6 = vsub.s32 7, %v10683_v10 }
0x13d5   :  { %2478 = vmatprep.subr.bf16.mxu0 %v8214_v39  ;;  %2521 = vmatprep.subr.bf16.mxu1 %v8216_v40  ;;  %v10040_v39 = vld [vmem:[%s12436_s12 + $0x68] sm:$0xff]  }
0x13d6   :  { %2508 = vmatprep.mubr.bf16.mxu0 %v10483_v57  ;;  %2551 = vmatprep.mubr.bf16.mxu1 %v10483_v57  ;;  %v10041_v40 = vld [vmem:[%s12436_s12 + $0xe8] sm:$0xff]  }
0x13d8   :  { %2479 = vmatpush1.bf16.msra.mxu0 %v8213_v47  ;;  %2522 = vmatpush1.bf16.msra.mxu1 %v8215_v48  ;;  %v10046_v47 = vld [vmem:[%s12436_s12 + $0x30] sm:$0xff]  }
0x13d9   :  { %2562 = vmatprep.subr.bf16.mxu0 %v8202_v55  ;;  %2605 = vmatprep.subr.bf16.mxu1 %v8204_v56  ;;  %v10047_v48 = vld [vmem:[%s12436_s12 + $0xb0] sm:$0xff]   ;;  %v10048_v55 = vld [vmem:[%s12436_s12 + $0x78] sm:$0xff]  }
0x13da   :  { %v10049_v56 = vld [vmem:[%s12436_s12 + $0xf8] sm:$0xff]  }
0x13db   :  { %8227 = vmatmul.mubr.msk.bf16.vlgmr.msra.gmra.mrb[24].mxu0 %vm160_vm1, %v10976_v38  ;;  %8228 = vmatmul.mubr.msk.bf16.vlgmr.msra.gmra.mrb[28].mxu1 %vm160_vm1, %v10976_v38 }
0x13dc   :  { %2563 = vmatpush1.bf16.msra.mxu0 %v8201_v58  ;;  %2606 = vmatpush1.bf16.msra.mxu1 %v8203_v50  ;;  %v11151_v58 = vsub.s32 0, %v10683_v10  ;;  %v11154_v50 = vsub.s32 2, %v10683_v10 }
0x13dd   :  { %2564 = vmatprep.subr.bf16.mxu0 %v8218_v51  ;;  %2607 = vmatprep.subr.bf16.mxu1 %v8220_v33  ;;  %v2143_v51 = vld [vmem:[%s12435_s11] sm:$0xff]  ;;  %v11160_v33 = vsub.s32 1, %v10683_v10 }
0x13de   :  { %2594 = vmatprep.mubr.bf16.mxu0 %v10483_v57  ;;  %2637 = vmatprep.mubr.bf16.mxu1 %v10483_v57  ;;  %v2150_v14 = vrot.slane %v2143_v51, %v11151_v58  ;;  %v2158_v60 = vrot.slane %v2143_v51, %v11154_v50 }
0x13df   :  { %v2154_v61 = vrot.slane %v2143_v51, %v11160_v33 }
0x13e0   :  { %2565 = vmatpush1.bf16.msra.mxu0 %v8217_v63  ;;  %2608 = vmatpush1.bf16.msra.mxu1 %v8219_v1  ;;  %v2162_v63 = vrot.slane %v2143_v51, %v11163_v52  ;;  %v11170_v1 = vsub.s32 4, %v10683_v10 }
0x13e1   :  { %2648 = vmatprep.subr.bf16.mxu0 %v8206_v2  ;;  %2691 = vmatprep.subr.bf16.mxu1 %v8208_v3  ;;  %v11173_v2 = vsub.s32 6, %v10683_v10  ;;  %v2170_v10 = vrot.slane %v2143_v51, %v11176_v5 }
0x13e3   :  { %8229 = vmatmul.mubr.msk.bf16.vlgmr.msra.gmra.mrb[28].mxu0 %vm160_vm1, %v10976_v38  ;;  %8230 = vmatmul.mubr.msk.bf16.vlgmr.msra.gmra.mrb[32].mxu1 %vm160_vm1, %v10976_v38 }
0x13e4   :  { %2649 = vmatpush1.bf16.msra.mxu0 %v8205_v8  ;;  %2692 = vmatpush1.bf16.msra.mxu1 %v8207_v9 }
0x13e5   :  { %2650 = vmatprep.subr.bf16.mxu0 %v8222_v11  ;;  %2693 = vmatprep.subr.bf16.mxu1 %v8224_v12 }
0x13e6   :  { %2680 = vmatprep.mubr.bf16.mxu0 %v10483_v57  ;;  %2723 = vmatprep.mubr.bf16.mxu1 %v10483_v57 }
0x13e8   :  { %2651 = vmatpush1.bf16.msra.mxu0 %v8221_v34  ;;  %2694 = vmatpush1.bf16.msra.mxu1 %v8223_v13 }
0x13e9   :  { %8972 = vmatprep.subr.bf16.mxu0 %v10020_v15  ;;  %8994 = vmatprep.subr.bf16.mxu1 %v10021_v0 }
0x13eb   :  { %8231 = vmatmul.mubr.msk.bf16.vlgmr.msra.gmra.mrb[32].mxu0 %vm160_vm1, %v10976_v38  ;;  %8232 = vmatmul.mubr.msk.bf16.vlgmr.msra.gmra.mrb[36].mxu1 %vm160_vm1, %v10976_v38  ;;  %v10039_v38 = vld [vmem:[%s12436_s12 + $0xa0] sm:$0xff]  }
0x13ec   :  { %8973 = vmatpush3.bf16.msra.mxu0 %v10022_v18  ;;  %8995 = vmatpush3.bf16.msra.mxu1 %v10023_v19 }
0x13ed   :  { %8974 = vmatprep.subr.bf16.mxu0 %v10024_v20  ;;  %8996 = vmatprep.subr.bf16.mxu1 %v10025_v21  ;;  %v2166_v21 = vrot.slane %v2143_v51, %v11170_v1 }
0x13f0   :  { %8975 = vmatpush3.bf16.msra.mxu0 %v10026_v22  ;;  %8997 = vmatpush3.bf16.msra.mxu1 %v10027_v53  ;;  %v2174_v22 = vrot.slane %v2143_v51, %v11173_v2 }
0x13f1   :  { %8976 = vmatprep.subr.bf16.mxu0 %v10028_v23  ;;  %8998 = vmatprep.subr.bf16.mxu1 %v10029_v54  ;;  %v2178_v54 = vrot.slane %v2143_v51, %v11179_v6 }
0x13f4   :  { %8977 = vmatpush3.bf16.msra.mxu0 %v10030_v24  ;;  %8999 = vmatpush3.bf16.msra.mxu1 %v10031_v25 }
0x13f5   :  { %8978 = vmatprep.subr.bf16.mxu0 %v10032_v26  ;;  %9000 = vmatprep.subr.bf16.mxu1 %v10033_v28 }
0x13f8   :  { %8979 = vmatpush3.bf16.msra.mxu0 %v10034_v29  ;;  %9001 = vmatpush3.bf16.msra.mxu1 %v10035_v30 }
0x13f9   :  { %8980 = vmatprep.subr.bf16.mxu0 %v10036_v31  ;;  %9002 = vmatprep.subr.bf16.mxu1 %v10037_v32 }
0x13fc   :  { %8981 = vmatpush3.bf16.msra.mxu0 %v10038_v35  ;;  %9003 = vmatpush3.bf16.msra.mxu1 %v10039_v38  ;;  %v11188_v35 = vld [vmem:[%s12435_s11 + $0x8] sm:$0xff] }
0x13fd   :  { %8982 = vmatprep.subr.bf16.mxu0 %v10040_v39  ;;  %9004 = vmatprep.subr.bf16.mxu1 %v10041_v40 }
0x1400   :  { %8983 = vmatpush3.bf16.msra.mxu0 %v10042_v41  ;;  %9005 = vmatpush3.bf16.msra.mxu1 %v10043_v42 }
0x1401   :  { %8984 = vmatprep.subr.bf16.mxu0 %v10044_v45  ;;  %9006 = vmatprep.subr.bf16.mxu1 %v10045_v46  ;;  %v10054_v46 = vld [vmem:[%s12436_s12 + $0x100] sm:$0xff]  }
0x1404   :  { %8985 = vmatpush3.bf16.msra.mxu0 %v10046_v47  ;;  %9007 = vmatpush3.bf16.msra.mxu1 %v10047_v48  ;;  %v10055_v47 = vld [vmem:[%s12436_s12 + $0x180] sm:$0xff]  }
0x1405   :  { %8986 = vmatprep.subr.bf16.mxu0 %v10048_v55  ;;  %9008 = vmatprep.subr.bf16.mxu1 %v10049_v56 }
0x1408   :  { %8987 = vmatpush3.bf16.msra.mxu0 %v10050_v59  ;;  %9009 = vmatpush3.bf16.msra.mxu1 %v10051_v49  ;;  %v10056_v49 = vld [vmem:[%s12436_s12 + $0x148] sm:$0xff]  }
0x1409   :  { %9016 = vmatprep.subr.bf16.mxu0 %v10052_v43  ;;  %9038 = vmatprep.subr.bf16.mxu1 %v10053_v44  ;;  %v10057_v43 = vld [vmem:[%s12436_s12 + $0x1c8] sm:$0xff]   ;;  %v2182_v44 = vrot.slane %v11188_v35, %v11151_v58 }
0x14a6   :  { %v2424_v3 = vpop.f32.mrb[20].mxu0  ;;  %v2467_v4 = vpop.f32.mrb[24].mxu1 }
0x14a7   :  { %v2425_v7 = vadd.f32 %v2424_v3, %v2150_v14  ;;  %v2468_v8 = vadd.f32 %v2467_v4, %v2158_v60  ;;  %v2426_v9 = vpop.f32.mrb[21].mxu0  ;;  %v2469_v11 = vpop.f32.mrb[25].mxu1 }
0x14a8   :  { %v2427_v12 = vadd.f32 %v2426_v9, %v2154_v61  ;;  %v2470_v34 = vadd.f32 %v2469_v11, %v2162_v63  ;;  %v2428_v13 = vpop.f32.mrb[22].mxu0  ;;  %v2471_v15 = vpop.f32.mrb[26].mxu1  ;;  %v2186_v9 = vrot.slane %v11188_v35, %v11160_v33 }
0x14a9   :  { %v2429_v0 = vadd.f32 %v2428_v13, %v2150_v14  ;;  %v2472_v18 = vadd.f32 %v2471_v15, %v2158_v60  ;;  %v2430_v19 = vpop.f32.mrb[23].mxu0  ;;  %v2473_v20 = vpop.f32.mrb[27].mxu1  ;;  %v2734_v24 = vmax.f32 %v2425_v7, 0.0  ;;  %v2736_v25 = vmax.f32 %v2468_v8, 0.0  ;;  %v10059_v13 = vld [vmem:[%s12436_s12 + $0x188] sm:$0xff]  }
0x14aa   :  { %v2431_v53 = vadd.f32 %v2430_v19, %v2154_v61  ;;  %v2474_v23 = vadd.f32 %v2473_v20, %v2162_v63  ;;  %v2735_v29 = vmax.f32 %v2427_v12, 0.0  ;;  %v2737_v30 = vmax.f32 %v2470_v34, 0.0  ;;  %v10058_v34 = vld [vmem:[%s12436_s12 + $0x108] sm:$0xff]  }
0x14ab   :  { %v2750_v26 = vmax.f32 %v2429_v0, 0.0  ;;  %v2752_v28 = vmax.f32 %v2472_v18, 0.0  ;;  %v2190_v63 = vrot.slane %v11188_v35, %v11154_v50  ;;  %v2194_v15 = vrot.slane %v11188_v35, %v11163_v52 }
0x14ac   :  { %v2751_v31 = vmax.f32 %v2431_v53, 0.0  ;;  %v2753_v32 = vmax.f32 %v2474_v23, 0.0 }
0x14ad   :  { %v2766_v38 = vpack.c.bf16 %v2750_v26, %v2734_v24  ;;  %v2768_v39 = vpack.c.bf16 %v2752_v28, %v2736_v25 }
0x14ae   :  { %v2767_v40 = vpack.c.bf16 %v2751_v31, %v2735_v29  ;;  %v2769_v41 = vpack.c.bf16 %v2753_v32, %v2737_v30  ;;  %v2510_v42 = vpop.f32.mrb[24].mxu0  ;;  %v2553_v45 = vpop.f32.mrb[28].mxu1  ;;  %v10062_v31 = vld [vmem:[%s12436_s12 + $0x110] sm:$0xff]  }
0x14af   :  { %v2511_v48 = vadd.f32 %v2510_v42, %v2166_v21  ;;  %v2554_v55 = vadd.f32 %v2553_v45, %v2174_v22  ;;  %v2512_v56 = vpop.f32.mrb[25].mxu0  ;;  %v2555_v59 = vpop.f32.mrb[29].mxu1  ;;  %v10063_v32 = vld [vmem:[%s12436_s12 + $0x190] sm:$0xff]   ;;  %v10064_v42 = vld [vmem:[%s12436_s12 + $0x158] sm:$0xff]  }
0x14b0   :  { %v2513_v51 = vadd.f32 %v2512_v56, %v2170_v10  ;;  %v2556_v14 = vadd.f32 %v2555_v59, %v2178_v54  ;;  %v2514_v60 = vpop.f32.mrb[26].mxu0  ;;  %v2557_v61 = vpop.f32.mrb[30].mxu1  ;;  %3845 = vmatprep.mubr.bf16.mxu0 %v2767_v40  ;;  %3886 = vmatprep.mubr.bf16.mxu1 %v2769_v41  ;;  %v10065_v45 = vld [vmem:[%s12436_s12 + $0x1d8] sm:$0xff]   ;;  %v2198_v56 = vrot.slane %v11188_v35, %v11170_v1 }
0x14b1   :  { %v2515_v3 = vadd.f32 %v2514_v60, %v2166_v21  ;;  %v2558_v4 = vadd.f32 %v2557_v61, %v2174_v22  ;;  %v2516_v7 = vpop.f32.mrb[27].mxu0  ;;  %v2559_v8 = vpop.f32.mrb[31].mxu1  ;;  %3846 = vmatmul.mubr.bf16.vlgmr.msra.gmra.mrb[36].mxu0 %v2766_v38  ;;  %3887 = vmatmul.mubr.bf16.vlgmr.msra.gmra.mrb[40].mxu1 %v2768_v39  ;;  %v2738_v0 = vmax.f32 %v2511_v48, 0.0  ;;  %v2740_v18 = vmax.f32 %v2554_v55, 0.0  ;;  %v10060_v21 = vld [vmem:[%s12436_s12 + $0x150] sm:$0xff]  }
0x14b2   :  { %v2517_v11 = vadd.f32 %v2516_v7, %v2170_v10  ;;  %v2560_v12 = vadd.f32 %v2559_v8, %v2178_v54  ;;  %9017 = vmatpush3.bf16.msra.mxu0 %v10054_v46  ;;  %9039 = vmatpush3.bf16.msra.mxu1 %v10055_v47  ;;  %v10061_v22 = vld [vmem:[%s12436_s12 + $0x1d0] sm:$0xff]   ;;  %v2739_v53 = vmax.f32 %v2513_v51, 0.0  ;;  %v2741_v23 = vmax.f32 %v2556_v14, 0.0 }
0x14b3   :  { %v2754_v19 = vmax.f32 %v2515_v3, 0.0  ;;  %v2756_v20 = vmax.f32 %v2558_v4, 0.0  ;;  %9018 = vmatprep.subr.bf16.mxu0 %v10056_v49  ;;  %9040 = vmatprep.subr.bf16.mxu1 %v10057_v43  ;;  %v2206_v14 = vrot.slane %v11188_v35, %v11173_v2  ;;  %v2202_v60 = vrot.slane %v11188_v35, %v11176_v5  ;;  %v10066_v4 = vld [vmem:[%s12436_s12 + $0x118] sm:$0xff]  }
0x14b4   :  { %v2755_v10 = vmax.f32 %v2517_v11, 0.0  ;;  %v2757_v54 = vmax.f32 %v2560_v12, 0.0 }
0x14b5   :  { %v11222_v24 = vpack.c.bf16 %v2754_v19, %v2738_v0  ;;  %v11224_v25 = vpack.c.bf16 %v2756_v20, %v2740_v18 }
0x14b6   :  { %v2771_v26 = vpack.c.bf16 %v2755_v10, %v2739_v53  ;;  %v2773_v28 = vpack.c.bf16 %v2757_v54, %v2741_v23  ;;  %9019 = vmatpush3.bf16.msra.mxu0 %v10058_v34  ;;  %9041 = vmatpush3.bf16.msra.mxu1 %v10059_v13  ;;  %v2596_v29 = vpop.f32.mrb[28].mxu0  ;;  %v2639_v30 = vpop.f32.mrb[32].mxu1  ;;  %v10069_v34 = vld [vmem:[%s12436_s12 + $0x1e0] sm:$0xff]  }
0x14b7   :  { %v2597_v38 = vadd.f32 %v2596_v29, %v2182_v44  ;;  %v2640_v39 = vadd.f32 %v2639_v30, %v2190_v63  ;;  %v2598_v40 = vpop.f32.mrb[29].mxu0  ;;  %v2641_v41 = vpop.f32.mrb[33].mxu1  ;;  %9020 = vmatprep.subr.bf16.mxu0 %v10060_v21  ;;  %9042 = vmatprep.subr.bf16.mxu1 %v10061_v22  ;;  %v10070_v23 = vld [vmem:[%s12436_s12 + $0x120] sm:$0xff]   ;;  %v10072_v30 = vld [vmem:[%s12436_s12 + $0x168] sm:$0xff]  }
0x14b8   :  { %v2599_v46 = vadd.f32 %v2598_v40, %v2186_v9  ;;  %v2642_v47 = vadd.f32 %v2641_v41, %v2194_v15  ;;  %v2600_v48 = vpop.f32.mrb[30].mxu0  ;;  %v2643_v55 = vpop.f32.mrb[34].mxu1  ;;  %3927 = vmatprep.mubr.bf16.mxu0 %v2771_v26  ;;  %3968 = vmatprep.mubr.bf16.mxu1 %v2773_v28  ;;  %v10071_v10 = vld [vmem:[%s12436_s12 + $0x1a0] sm:$0xff]  }
0x14b9   :  { %v2601_v59 = vadd.f32 %v2600_v48, %v2182_v44  ;;  %v2644_v49 = vadd.f32 %v2643_v55, %v2190_v63  ;;  %v2602_v43 = vpop.f32.mrb[31].mxu0  ;;  %v2645_v51 = vpop.f32.mrb[35].mxu1  ;;  %v10067_v44 = vld [vmem:[%s12436_s12 + $0x198] sm:$0xff]   ;;  %v2210_v63 = vrot.slane %v11188_v35, %v11179_v6  ;;  %v2742_v7 = vmax.f32 %v2597_v38, 0.0  ;;  %v10074_v55 = vld [vmem:[%s12436_s12 + $0x128] sm:$0xff]  }
0x14ba   :  { %v2603_v61 = vadd.f32 %v2602_v43, %v2186_v9  ;;  %v2646_v3 = vadd.f32 %v2645_v51, %v2194_v15  ;;  %9021 = vmatpush3.bf16.msra.mxu0 %v10062_v31  ;;  %9043 = vmatpush3.bf16.msra.mxu1 %v10063_v32  ;;  %v2744_v8 = vmax.f32 %v2640_v39, 0.0  ;;  %v10068_v9 = vld [vmem:[%s12436_s12 + $0x160] sm:$0xff]   ;;  %v2743_v13 = vmax.f32 %v2599_v46, 0.0  ;;  %v10073_v31 = vld [vmem:[%s12436_s12 + $0x1e8] sm:$0xff]  }
0x14bb   :  { %v2758_v11 = vmax.f32 %v2601_v59, 0.0  ;;  %v2760_v12 = vmax.f32 %v2644_v49, 0.0  ;;  %9022 = vmatprep.subr.bf16.mxu0 %v10064_v42  ;;  %9044 = vmatprep.subr.bf16.mxu1 %v10065_v45  ;;  %v2745_v15 = vmax.f32 %v2642_v47, 0.0  ;;  %v10075_v59 = vld [vmem:[%s12436_s12 + $0x1a8] sm:$0xff]  }
0x14bc   :  { %v2759_v0 = vmax.f32 %v2603_v61, 0.0  ;;  %v2761_v18 = vmax.f32 %v2646_v3, 0.0 }
0x14bd   :  { %v11258_v19 = vpack.c.bf16 %v2758_v11, %v2742_v7  ;;  %v11260_v35 = vpack.c.bf16 %v2760_v12, %v2744_v8  ;;  %v10078_v12 = vld [vmem:[%s12436_s12 + $0x130] sm:$0xff]  }
0x14be   :  { %v11262_v20 = vpack.c.bf16 %v2759_v0, %v2743_v13  ;;  %v11264_v21 = vpack.c.bf16 %v2761_v18, %v2745_v15  ;;  %9023 = vmatpush3.bf16.msra.mxu0 %v10066_v4  ;;  %9045 = vmatpush3.bf16.msra.mxu1 %v10067_v44  ;;  %v2682_v22 = vpop.f32.mrb[32].mxu0  ;;  %v2725_v53 = vpop.f32.mrb[36].mxu1  ;;  %v10081_v13 = vld [vmem:[%s12436_s12 + $0x1f8] sm:$0xff]   ;;  %v10084_v18 = vld [vmem:[%s12436_s12 + $0x240] sm:$0xff]  }
0x14bf   :  { %v2683_v54 = vadd.f32 %v2682_v22, %v2198_v56  ;;  %v2726_v26 = vadd.f32 %v2725_v53, %v2206_v14  ;;  %v2684_v28 = vpop.f32.mrb[33].mxu0  ;;  %v2727_v29 = vpop.f32.mrb[37].mxu1  ;;  %9024 = vmatprep.subr.bf16.mxu0 %v10068_v9  ;;  %9046 = vmatprep.subr.bf16.mxu1 %v10069_v34  ;;  %v10079_v9 = vld [vmem:[%s12436_s12 + $0x1b0] sm:$0xff]   ;;  %v10080_v34 = vld [vmem:[%s12436_s12 + $0x178] sm:$0xff]   ;;  %v10085_v22 = vld [vmem:[%s12436_s12 + $0x2c0] sm:$0xff]  }
0x14c0   :  { %v2685_v32 = vadd.f32 %v2684_v28, %v2202_v60  ;;  %v2728_v38 = vadd.f32 %v2727_v29, %v2210_v63  ;;  %v2686_v39 = vpop.f32.mrb[34].mxu0  ;;  %v2729_v40 = vpop.f32.mrb[38].mxu1  ;;  %v10082_v15 = vld [vmem:[%s12436_s12 + $0x138] sm:$0xff]   ;;  %v10086_v53 = vld [vmem:[%s12436_s12 + $0x200] sm:$0xff]   ;;  %v10091_v28 = vld [vmem:[%s12436_s12 + $0x288] sm:$0xff]  }
0x14c1   :  { %v2687_v41 = vadd.f32 %v2686_v39, %v2198_v56  ;;  %v2730_v42 = vadd.f32 %v2729_v40, %v2206_v14  ;;  %v2688_v45 = vpop.f32.mrb[35].mxu0  ;;  %v2731_v46 = vpop.f32.mrb[39].mxu1  ;;  %v2746_v49 = vmax.f32 %v2683_v54, 0.0  ;;  %v2748_v43 = vmax.f32 %v2726_v26, 0.0  ;;  %v10076_v56 = vld [vmem:[%s12436_s12 + $0x170] sm:$0xff]   ;;  %v10083_v0 = vld [vmem:[%s12436_s12 + $0x1b8] sm:$0xff]  }
0x14c2   :  { %v2689_v47 = vadd.f32 %v2688_v45, %v2202_v60  ;;  %v2732_v48 = vadd.f32 %v2731_v46, %v2210_v63  ;;  %9025 = vmatpush3.bf16.msra.mxu0 %v10070_v23  ;;  %9047 = vmatpush3.bf16.msra.mxu1 %v10071_v10  ;;  %v10077_v14 = vld [vmem:[%s12436_s12 + $0x1f0] sm:$0xff]   ;;  %v2747_v60 = vmax.f32 %v2685_v32, 0.0  ;;  %v2749_v3 = vmax.f32 %v2728_v38, 0.0  ;;  %v10087_v23 = vld [vmem:[%s12436_s12 + $0x280] sm:$0xff]   ;;  %v10088_v10 = vld [vmem:[%s12436_s12 + $0x248] sm:$0xff]  }
0x14c3   :  { %v2762_v51 = vmax.f32 %v2687_v41, 0.0  ;;  %v2764_v61 = vmax.f32 %v2730_v42, 0.0  ;;  %9026 = vmatprep.subr.bf16.mxu0 %v10072_v30  ;;  %9048 = vmatprep.subr.bf16.mxu1 %v10073_v31  ;;  %v10089_v54 = vld [vmem:[%s12436_s12 + $0x2c8] sm:$0xff]   ;;  %v10096_v29 = vld [vmem:[%s12436_s12 + $0x258] sm:$0xff]   ;;  %v10100_v38 = vld [vmem:[%s12436_s12 + $0x260] sm:$0xff]  }
0x14c4   :  { %v2763_v4 = vmax.f32 %v2689_v47, 0.0  ;;  %v2765_v44 = vmax.f32 %v2732_v48, 0.0  ;;  %v10090_v26 = vld [vmem:[%s12436_s12 + $0x208] sm:$0xff]   ;;  %v10097_v30 = vld [vmem:[%s12436_s12 + $0x2d8] sm:$0xff]   ;;  %v10101_v39 = vld [vmem:[%s12436_s12 + $0x2e0] sm:$0xff]  }
0x14c5   :  { %v11290_v63 = vpack.c.bf16 %v2762_v51, %v2746_v49  ;;  %v11292_v7 = vpack.c.bf16 %v2764_v61, %v2748_v43  ;;  %v10098_v31 = vld [vmem:[%s12436_s12 + $0x218] sm:$0xff]   ;;  %v10102_v40 = vld [vmem:[%s12436_s12 + $0x220] sm:$0xff]   ;;  %v10104_v42 = vld [vmem:[%s12436_s12 + $0x268] sm:$0xff]  }
0x14c6   :  { %v11294_v8 = vpack.c.bf16 %v2763_v4, %v2747_v60  ;;  %v11296_v11 = vpack.c.bf16 %v2765_v44, %v2749_v3  ;;  %9027 = vmatpush3.bf16.msra.mxu0 %v10074_v55  ;;  %9049 = vmatpush3.bf16.msra.mxu1 %v10075_v59  ;;  %v10099_v32 = vld [vmem:[%s12436_s12 + $0x298] sm:$0xff]   ;;  %v10103_v41 = vld [vmem:[%s12436_s12 + $0x2a0] sm:$0xff]   ;;  %v10105_v45 = vld [vmem:[%s12436_s12 + $0x2e8] sm:$0xff]  }
0x14c7   :  { %9028 = vmatprep.subr.bf16.mxu0 %v10076_v56  ;;  %9050 = vmatprep.subr.bf16.mxu1 %v10077_v14  ;;  %v10106_v46 = vld [vmem:[%s12436_s12 + $0x228] sm:$0xff]   ;;  %v10108_v48 = vld [vmem:[%s12436_s12 + $0x270] sm:$0xff]   ;;  %v10112_v43 = vld [vmem:[%s12436_s12 + $0x278] sm:$0xff]  }
0x14c8   :  { %v10107_v47 = vld [vmem:[%s12436_s12 + $0x2a8] sm:$0xff]   ;;  %v10109_v55 = vld [vmem:[%s12436_s12 + $0x2f0] sm:$0xff]   ;;  %v10113_v51 = vld [vmem:[%s12436_s12 + $0x2f8] sm:$0xff]  }
0x14c9   :  { %v10110_v59 = vld [vmem:[%s12436_s12 + $0x230] sm:$0xff]   ;;  %v10114_v61 = vld [vmem:[%s12436_s12 + $0x238] sm:$0xff]   ;;  %v10116_v14 = vld [vmem:[%s12436_s12 + $0x340] sm:$0xff]  }
0x14ca   :  { %9029 = vmatpush3.bf16.msra.mxu0 %v10078_v12  ;;  %9051 = vmatpush3.bf16.msra.mxu1 %v10079_v9  ;;  %v10111_v49 = vld [vmem:[%s12436_s12 + $0x2b0] sm:$0xff]   ;;  %v10115_v56 = vld [vmem:[%s12436_s12 + $0x2b8] sm:$0xff]   ;;  %v10117_v60 = vld [vmem:[%s12436_s12 + $0x3c0] sm:$0xff]  }
0x14cb   :  { %9030 = vmatprep.subr.bf16.mxu0 %v10080_v34  ;;  %9052 = vmatprep.subr.bf16.mxu1 %v10081_v13  ;;  %v10118_v3 = vld [vmem:[%s12436_s12 + $0x300] sm:$0xff]   ;;  %v10120_v44 = vld [vmem:[%s12436_s12 + $0x348] sm:$0xff]   ;;  %v10127_v13 = vld [vmem:[%s12436_s12 + $0x390] sm:$0xff]  }
0x14cc   :  { %v10119_v4 = vld [vmem:[%s12436_s12 + $0x380] sm:$0xff]   ;;  %v10121_v12 = vld [vmem:[%s12436_s12 + $0x3c8] sm:$0xff]  }
0x14cd   :  { %v10122_v9 = vld [vmem:[%s12436_s12 + $0x308] sm:$0xff]  }
0x14ce   :  { %9031 = vmatpush3.bf16.msra.mxu0 %v10082_v15  ;;  %9053 = vmatpush3.bf16.msra.mxu1 %v10083_v0  ;;  %v10123_v34 = vld [vmem:[%s12436_s12 + $0x388] sm:$0xff]   ;;  %v10129_v15 = vld [vmem:[%s12436_s12 + $0x3d8] sm:$0xff]  }
0x14cf   :  { %9060 = vmatprep.subr.bf16.mxu0 %v10084_v18  ;;  %9082 = vmatprep.subr.bf16.mxu1 %v10085_v22  ;;  %v10130_v0 = vld [vmem:[%s12436_s12 + $0x318] sm:$0xff]   ;;  %v10132_v22 = vld [vmem:[%s12436_s12 + $0x360] sm:$0xff]  }
0x14d0   :  { %v10131_v18 = vld [vmem:[%s12436_s12 + $0x398] sm:$0xff]  }
0x14d1   :  { %3928 = vmatmul.mubr.bf16.vlgmr.msra.gmra.mrb[40].mxu0 %v11222_v24  ;;  %3969 = vmatmul.mubr.bf16.vlgmr.msra.gmra.mrb[44].mxu1 %v11224_v25  ;;  %v10092_v24 = vld [vmem:[%s12436_s12 + $0x250] sm:$0xff]  }
0x14d2   :  { %9061 = vmatpush3.bf16.msra.mxu0 %v10086_v53  ;;  %4009 = vmatprep.mubr.bf16.mxu0 %v11262_v20  ;;  %v10093_v25 = vld [vmem:[%s12436_s12 + $0x2d0] sm:$0xff]   ;;  %v10133_v53 = vld [vmem:[%s12436_s12 + $0x3e0] sm:$0xff]  }
0x14d3   :  { %9083 = vmatpush3.bf16.msra.mxu1 %v10087_v23  ;;  %4050 = vmatprep.mubr.bf16.mxu1 %v11264_v21  ;;  %v10094_v20 = vld [vmem:[%s12436_s12 + $0x210] sm:$0xff]   ;;  %v10134_v23 = vld [vmem:[%s12436_s12 + $0x320] sm:$0xff]  }
0x14d4   :  { %9062 = vmatprep.subr.bf16.mxu0 %v10088_v10  ;;  %9084 = vmatprep.subr.bf16.mxu1 %v10089_v54  ;;  %v10095_v21 = vld [vmem:[%s12436_s12 + $0x290] sm:$0xff]   ;;  %v10135_v10 = vld [vmem:[%s12436_s12 + $0x3a0] sm:$0xff]   ;;  %v10136_v54 = vld [vmem:[%s12436_s12 + $0x368] sm:$0xff]  }
0x14d6   :  { %9063 = vmatpush3.bf16.msra.mxu0 %v10090_v26  ;;  %v10137_v26 = vld [vmem:[%s12436_s12 + $0x3e8] sm:$0xff]  }
0x14d7   :  { %9085 = vmatpush3.bf16.msra.mxu1 %v10091_v28  ;;  %9064 = vmatprep.subr.bf16.mxu0 %v10092_v24  ;;  %v10138_v28 = vld [vmem:[%s12436_s12 + $0x328] sm:$0xff]  }
0x14d8   :  { %9086 = vmatprep.subr.bf16.mxu1 %v10093_v25  ;;  %v10139_v24 = vld [vmem:[%s12436_s12 + $0x3a8] sm:$0xff]   ;;  %v10140_v25 = vld [vmem:[%s12436_s12 + $0x370] sm:$0xff]  }
0x14da   :  { %9065 = vmatpush3.bf16.msra.mxu0 %v10094_v20  ;;  %v10141_v20 = vld [vmem:[%s12436_s12 + $0x3f0] sm:$0xff]  }
0x14db   :  { %9087 = vmatpush3.bf16.msra.mxu1 %v10095_v21  ;;  %9066 = vmatprep.subr.bf16.mxu0 %v10096_v29  ;;  %v10142_v21 = vld [vmem:[%s12436_s12 + $0x330] sm:$0xff]  }
0x14dc   :  { %9088 = vmatprep.subr.bf16.mxu1 %v10097_v30  ;;  %v10143_v29 = vld [vmem:[%s12436_s12 + $0x3b0] sm:$0xff]   ;;  %v10144_v30 = vld [vmem:[%s12436_s12 + $0x378] sm:$0xff]  }
0x14de   :  { %9067 = vmatpush3.bf16.msra.mxu0 %v10098_v31  ;;  %v10145_v31 = vld [vmem:[%s12436_s12 + $0x3f8] sm:$0xff]  }
0x14df   :  { %9089 = vmatpush3.bf16.msra.mxu1 %v10099_v32  ;;  %9068 = vmatprep.subr.bf16.mxu0 %v10100_v38  ;;  %v10146_v32 = vld [vmem:[%s12436_s12 + $0x338] sm:$0xff]  }
0x14e0   :  { %9090 = vmatprep.subr.bf16.mxu1 %v10101_v39  ;;  %v10147_v38 = vld [vmem:[%s12436_s12 + $0x3b8] sm:$0xff]  }
0x14e2   :  { %9069 = vmatpush3.bf16.msra.mxu0 %v10102_v40 }
0x14e3   :  { %9091 = vmatpush3.bf16.msra.mxu1 %v10103_v41  ;;  %9070 = vmatprep.subr.bf16.mxu0 %v10104_v42  ;;  %v8233_v41 = vld [vmem:[%s12437_s13] ss:$0 sm:$0xff] }
0x14e4   :  { %9092 = vmatprep.subr.bf16.mxu1 %v10105_v45 }
0x14e6   :  { %9071 = vmatpush3.bf16.msra.mxu0 %v10106_v46 }
0x14e7   :  { %9093 = vmatpush3.bf16.msra.mxu1 %v10107_v47  ;;  %9072 = vmatprep.subr.bf16.mxu0 %v10108_v48 }
0x14e8   :  { %9094 = vmatprep.subr.bf16.mxu1 %v10109_v55 }
0x14ea   :  { %9073 = vmatpush3.bf16.msra.mxu0 %v10110_v59 }
0x14eb   :  { %9095 = vmatpush3.bf16.msra.mxu1 %v10111_v49  ;;  %9074 = vmatprep.subr.bf16.mxu0 %v10112_v43 }
0x14ec   :  { %9096 = vmatprep.subr.bf16.mxu1 %v10113_v51 }
0x14ee   :  { %9075 = vmatpush3.bf16.msra.mxu0 %v10114_v61 }
0x14ef   :  { %9097 = vmatpush3.bf16.msra.mxu1 %v10115_v56  ;;  %9104 = vmatprep.subr.bf16.mxu0 %v10116_v14 }
0x14f0   :  { %9126 = vmatprep.subr.bf16.mxu1 %v10117_v60 }
0x14f1   :  { %4010 = vmatmul.mubr.bf16.vlgmr.msra.gmra.mrb[44].mxu0 %v11258_v19  ;;  %v10124_v19 = vld [vmem:[%s12436_s12 + $0x350] sm:$0xff]  }
0x14f2   :  { %4051 = vmatmul.mubr.bf16.vlgmr.msra.gmra.mrb[48].mxu1 %v11260_v35  ;;  %9105 = vmatpush3.bf16.msra.mxu0 %v10118_v3  ;;  %v10125_v35 = vld [vmem:[%s12436_s12 + $0x3d0] sm:$0xff]  }
0x14f3   :  { %4091 = vmatprep.mubr.bf16.mxu0 %v11294_v8  ;;  %9127 = vmatpush3.bf16.msra.mxu1 %v10119_v4  ;;  %v10126_v8 = vld [vmem:[%s12436_s12 + $0x310] sm:$0xff]  }
0x14f4   :  { %4132 = vmatprep.mubr.bf16.mxu1 %v11296_v11  ;;  %9106 = vmatprep.subr.bf16.mxu0 %v10120_v44  ;;  %v10128_v11 = vld [vmem:[%s12436_s12 + $0x358] sm:$0xff]  }
0x14f5   :  { %9128 = vmatprep.subr.bf16.mxu1 %v10121_v12 }
0x14f6   :  { %9107 = vmatpush3.bf16.msra.mxu0 %v10122_v9 }
0x14f7   :  { %9129 = vmatpush3.bf16.msra.mxu1 %v10123_v34  ;;  %9108 = vmatprep.subr.bf16.mxu0 %v10124_v19 }
0x14f8   :  { %9130 = vmatprep.subr.bf16.mxu1 %v10125_v35 }
0x14fa   :  { %9109 = vmatpush3.bf16.msra.mxu0 %v10126_v8 }
0x14fb   :  { %9131 = vmatpush3.bf16.msra.mxu1 %v10127_v13  ;;  %9110 = vmatprep.subr.bf16.mxu0 %v10128_v11 }
0x14fc   :  { %9132 = vmatprep.subr.bf16.mxu1 %v10129_v15 }
0x14fe   :  { %9111 = vmatpush3.bf16.msra.mxu0 %v10130_v0 }
0x14ff   :  { %9133 = vmatpush3.bf16.msra.mxu1 %v10131_v18  ;;  %9112 = vmatprep.subr.bf16.mxu0 %v10132_v22 }
0x1500   :  { %9134 = vmatprep.subr.bf16.mxu1 %v10133_v53 }
0x1502   :  { %9113 = vmatpush3.bf16.msra.mxu0 %v10134_v23 }
0x1503   :  { %9135 = vmatpush3.bf16.msra.mxu1 %v10135_v10  ;;  %9114 = vmatprep.subr.bf16.mxu0 %v10136_v54 }
0x1504   :  { %9136 = vmatprep.subr.bf16.mxu1 %v10137_v26 }
0x1506   :  { %9115 = vmatpush3.bf16.msra.mxu0 %v10138_v28 }
0x1507   :  { %9137 = vmatpush3.bf16.msra.mxu1 %v10139_v24  ;;  %9116 = vmatprep.subr.bf16.mxu0 %v10140_v25 }
0x1508   :  { %9138 = vmatprep.subr.bf16.mxu1 %v10141_v20 }
0x150a   :  { %9117 = vmatpush3.bf16.msra.mxu0 %v10142_v21 }
0x150b   :  { %9139 = vmatpush3.bf16.msra.mxu1 %v10143_v29  ;;  %9118 = vmatprep.subr.bf16.mxu0 %v10144_v30 }
0x150c   :  { %9140 = vmatprep.subr.bf16.mxu1 %v10145_v31 }
0x150e   :  { %9119 = vmatpush3.bf16.msra.mxu0 %v10146_v32 }
0x150f   :  { %9141 = vmatpush3.bf16.msra.mxu1 %v10147_v38  ;;  %9529 = vmatprep.subr.bf16.mxu0 %v10450_v27 }
0x1511   :  { %4092 = vmatmul.mubr.bf16.vlgmr.msra.gmra.mrb[48].mxu0 %v11290_v63 }
0x1512   :  { %4133 = vmatmul.mubr.bf16.vlgmr.msra.gmra.mrb[52].mxu1 %v11292_v7  ;;  %9533 = vmatprep.mubr.msk.bf16.mxu0 %vm10451_vm2, %v10450_v27 }
0x1584   :  { %v8988_v39 = vpop.f32.mrb[36].mxu0  ;;  %v9010_v40 = vpop.f32.mrb[40].mxu1 }
0x1585   :  { %v8989_v42 = vpop.f32.mrb[37].mxu0  ;;  %v9011_v45 = vpop.f32.mrb[41].mxu1 }
0x1586   :  { %v8990_v46 = vadd.f32 %v8989_v42, %v8988_v39  ;;  %v9012_v47 = vadd.f32 %v9011_v45, %v9010_v40  ;;  %v8991_v48 = vpop.f32.mrb[38].mxu0  ;;  %v9013_v55 = vpop.f32.mrb[42].mxu1 }
0x1587   :  { %v8992_v59 = vpop.f32.mrb[39].mxu0  ;;  %v9014_v49 = vpop.f32.mrb[43].mxu1 }
0x1588   :  { %v3848_v63 = vadd.f32 %v8990_v46, %v8233_v41  ;;  %v8993_v43 = vadd.f32 %v8992_v59, %v8991_v48  ;;  %v9015_v7 = vadd.f32 %v9014_v49, %v9013_v55 }
0x158a   :  { %v3889_v51 = vadd.f32 %v9012_v47, %v3848_v63  ;;  %v3851_v61 = vadd.f32 %v8993_v43, %v8233_v41 }
0x158c   :  { %v3892_v56 = vadd.f32 %v9015_v7, %v3851_v61 }
0x15a4   :  { %v9032_v14 = vpop.f32.mrb[40].mxu0  ;;  %v9054_v60 = vpop.f32.mrb[44].mxu1 }
0x15a5   :  { %v9033_v3 = vpop.f32.mrb[41].mxu0  ;;  %v9055_v4 = vpop.f32.mrb[45].mxu1 }
0x15a6   :  { %v9034_v44 = vadd.f32 %v9033_v3, %v9032_v14  ;;  %v9056_v12 = vadd.f32 %v9055_v4, %v9054_v60  ;;  %v9035_v9 = vpop.f32.mrb[42].mxu0  ;;  %v9057_v34 = vpop.f32.mrb[46].mxu1 }
0x15a7   :  { %v9036_v19 = vpop.f32.mrb[43].mxu0  ;;  %v9058_v35 = vpop.f32.mrb[47].mxu1 }
0x15a8   :  { %v3930_v8 = vadd.f32 %v9034_v44, %v3889_v51  ;;  %v9037_v13 = vadd.f32 %v9036_v19, %v9035_v9  ;;  %v9059_v11 = vadd.f32 %v9058_v35, %v9057_v34 }
0x15aa   :  { %v3971_v15 = vadd.f32 %v9056_v12, %v3930_v8  ;;  %v3933_v0 = vadd.f32 %v9037_v13, %v3892_v56 }
0x15ac   :  { %v3974_v18 = vadd.f32 %v9059_v11, %v3933_v0  ;;  %v10149_v11 = vld [vmem:[%s12430_s6 + $0x18] sm:$0xff]  }
0x15c4   :  { %v9076_v22 = vpop.f32.mrb[44].mxu0 }
0x15c5   :  { %v9098_v53 = vpop.f32.mrb[48].mxu1  ;;  %v9077_v23 = vpop.f32.mrb[45].mxu0 }
0x15c6   :  { %v9078_v10 = vadd.f32 %v9077_v23, %v9076_v22  ;;  %v9099_v54 = vpop.f32.mrb[49].mxu1  ;;  %v9079_v26 = vpop.f32.mrb[46].mxu0 }
0x15c7   :  { %v9100_v28 = vadd.f32 %v9099_v54, %v9098_v53  ;;  %v9101_v24 = vpop.f32.mrb[50].mxu1  ;;  %v9080_v25 = vpop.f32.mrb[47].mxu0  ;;  %v8362_v54 = vld [vmem:[%s12440_s16] ss:$0 sm:$0xff] }
0x15c8   :  { %v4012_v20 = vadd.f32 %v9078_v10, %v3971_v15  ;;  %v9081_v21 = vadd.f32 %v9080_v25, %v9079_v26  ;;  %v9102_v29 = vpop.f32.mrb[51].mxu1 }
0x15c9   :  { %v9103_v30 = vadd.f32 %v9102_v29, %v9101_v24 }
0x15ca   :  { %v4053_v31 = vadd.f32 %v9100_v28, %v4012_v20  ;;  %v4015_v32 = vadd.f32 %v9081_v21, %v3974_v18  ;;  %v8363_v20 = vld [vmem:[%s12441_s17] ss:$0 sm:$0xff] }
0x15cc   :  { %v4056_v38 = vadd.f32 %v9103_v30, %v4015_v32  ;;  %v8369_v32 = vld [vmem:[%s12431_s7 + $0x1] ss:$0 sm:$0xff]  ;;  %s12487_s7 = smov 116  }
0x15e4   :  { %v9120_v39 = vpop.f32.mrb[48].mxu0 }
0x15e5   :  { %v9142_v40 = vpop.f32.mrb[52].mxu1  ;;  %v9121_v41 = vpop.f32.mrb[49].mxu0 }
0x15e6   :  { %v9122_v42 = vadd.f32 %v9121_v41, %v9120_v39  ;;  %v9143_v45 = vpop.f32.mrb[53].mxu1  ;;  %v9123_v46 = vpop.f32.mrb[50].mxu0 }
0x15e7   :  { %v9144_v47 = vadd.f32 %v9143_v45, %v9142_v40  ;;  %v9145_v48 = vpop.f32.mrb[54].mxu1  ;;  %v9124_v55 = vpop.f32.mrb[51].mxu0 }
0x15e8   :  { %v4094_v59 = vadd.f32 %v9122_v42, %v4053_v31  ;;  %v9125_v49 = vadd.f32 %v9124_v55, %v9123_v46  ;;  %v9146_v63 = vpop.f32.mrb[55].mxu1 }
0x15e9   :  { %v9147_v43 = vadd.f32 %v9146_v63, %v9145_v48 }
0x15ea   :  { %v4135_v7 = vadd.f32 %v9144_v47, %v4094_v59  ;;  %v4097_v51 = vadd.f32 %v9125_v49, %v4056_v38 }
0x15ec   :  { %v4138_v61 = vadd.f32 %v9147_v43, %v4097_v51  ;;  %v4141_v56 = vadd.f32 %v4135_v7, %v10970_v36 }
0x15ee   :  { %v4145_v14 = vsel %vm160_vm1, %v4141_v56, 0.0  ;;  %v4142_v60 = vadd.f32 %v4138_v61, %v10972_v37  ;;  %v10148_v37 = vld [vmem:[%s12430_s6 + $0x10] sm:$0xff]   ;;  %s12503_s6 = smov 8  }
0x15ef   :  { %4146 = vadd.xlane.f32.xlu0 %v4145_v14  ;;  %9530 = vmatpush3.bf16.msra.mxu0 %v10148_v37 }
0x15f0   :  { %v4148_v3 = vsel %vm160_vm1, %v4142_v60, 0.0  ;;  %9531 = vmatprep.subr.bf16.mxu0 %v10450_v27 }
0x15f1   :  { %4149 = vadd.xlane.f32.xlu1 %v4148_v3 }
0x15f3   :  { %9532 = vmatpush3.bf16.msra.mxu0 %v10149_v11 }
0x167c   :  { %v4147_v4 = vpop.xlane.xlu0 %4146 }
0x167d   :  { %v4151_v44 = vmul.f32 0.03125, %v4147_v4 }
0x167e   :  { %v4150_v12 = vpop.xlane.xlu1 %4149 }
0x167f   :  { %v4153_v9 = vsub.f32 %v4141_v56, %v4151_v44  ;;  %v4152_v34 = vmul.f32 0.03125, %v4150_v12 }
0x1681   :  { %v4154_v19 = vsub.f32 %v4142_v60, %v4152_v34  ;;  %v4155_v35 = vmul.f32 %v4153_v9, %v4153_v9 }
0x1683   :  { %v4157_v8 = vsel %vm160_vm1, %v4155_v35, 0.0  ;;  %v4156_v13 = vmul.f32 %v4154_v19, %v4154_v19 }
0x1684   :  { %4158 = vadd.xlane.f32.xlu0 %v4157_v8 }
0x1685   :  { %v4160_v36 = vsel %vm160_vm1, %v4156_v13, 0.0 }
0x1686   :  { %4161 = vadd.xlane.f32.xlu1 %v4160_v36 }
0x1711   :  { %v4159_v15 = vpop.xlane.xlu0 %4158 }
0x1712   :  { %v4163_v0 = vmul.f32 0.03125, %v4159_v15 }
0x1713   :  { %v4162_v18 = vpop.xlane.xlu1 %4161 }
0x1714   :  { %v4165_v22 = vadd.f32 1e-05, %v4163_v0  ;;  %v4164_v53 = vmul.f32 0.03125, %v4162_v18 }
0x1716   :  { %10352 = vrsqrt.f32 %v4165_v22  ;;  %v4166_v23 = vadd.f32 1e-05, %v4164_v53 }
0x1718   :  { %10354 = vrsqrt.f32 %v4166_v23 }
0x1720   :  { %v10353_v10 = vpop.eup %10352 }
0x1721   :  { %v4169_v26 = vmul.f32 %v10353_v10, %v4153_v9 }
0x1722   :  { %v10355_v28 = vpop.eup %10354 }
0x1723   :  { %v4177_v24 = vmul.f32 %v8362_v54, %v4169_v26  ;;  %v4170_v25 = vmul.f32 %v10355_v28, %v4154_v19 }
0x1725   :  { %v4178_v21 = vmul.f32 %v8362_v54, %v4170_v25  ;;  %v11543_v29 = vadd.f32 %v8363_v20, %v4177_v24 }
0x1727   :  { %v11545_v30 = vadd.f32 %v8363_v20, %v4178_v21 }
0x1729   :  { %v4187_v31 = vpack.c.bf16 %v11545_v30, %v11543_v29 }
0x172b   :  { %9534 = vmatmul.mubr.msk.bf16.vlgmr.msra.gmra.mrb[52].mxu0 %vm160_vm1, %v4187_v31 }
0x17fe   :  { %v4250_v38 = vpop.f32.mrb[52].mxu0 }
0x17ff   :  { %v4251_v39 = vadd.f32 %v8369_v32, %v4250_v38  ;;  %v9535_v40 = vpop.f32.mrb[53].mxu0 }
0x1800   :  { %v4253_v41 = vpop.f32.mrb[54].mxu0 }
0x1801   :  { %4257 = vst.msk [vmem:[#allocation2] sm:$0xff] %vm283_vm3, %v4251_v39  ;;  %v4254_v42 = vadd.f32 %v8369_v32, %v4253_v41  ;;  %v9536_v45 = vpop.f32.mrb[55].mxu0 }
0x1803   :  { %4258 = vst.msk [vmem:[#allocation2 + $0x8] sm:$0xff] %vm283_vm3, %v4254_v42 }
0x1808   :  { %v11555_v46 = vld [vmem:[#allocation2] sm:$0xff] }
0x1809   :  { %9541 = vmatprep.mubr.msk.f32.mxu1 %vm294_vm4, %v11555_v46 }
0x180a   :  { %v11559_v47 = vld [vmem:[#allocation2 + $0x8] sm:$0xff] }
0x180b   :  { %v11563_v48 = vpack.i.bf16 %v11559_v47, %v11555_v46 }
0x180d   :  { %9942 = vrot.lane.b32.xlu1 %v11563_v48, %s10452_s4  ;;  %9937 = vrot.lane.b32.xlu0 %v11563_v48, %s10453_s5  ;;  %s12488_s4 = smov 84   ;;  %s12489_s5 = smov 52  }
0x1811   :  { %4465 = vrot.lane.b32.xlu1 %v11555_v46, %s10454_s23 }
0x1815   :  { %4467 = vrot.lane.b32.xlu1 %v11559_v47, %s10454_s23  ;;  %s12490_s23 = smov 112  }
0x187f   :  { %v9943_v55 = vpop.permute.xlu1 %9942  ;;  %v9938_v59 = vpop.permute.xlu0 %9937 }
0x1880   :  { %v9945_v49 = vunpack.i.h.bf16 %v9943_v55  ;;  %v9944_v63 = vunpack.i.l.bf16 %v9943_v55  ;;  %v9940_v43 = vunpack.i.h.bf16 %v9938_v59  ;;  %v9939_v7 = vunpack.i.l.bf16 %v9938_v59 }
0x1882   :  { %v9741_v51 = vpack.c.bf16 %v9940_v43, %v9939_v7  ;;  %v9751_v61 = vpack.c.bf16 %v9945_v49, %v9944_v63 }
0x1883   :  { %v4466_v56 = vpop.permute.xlu1 %4465 }
0x1884   :  { %9743 = vmatprep.subr.msk.bf16.mxu1 %vm10661_vm5, %v9741_v51 }
0x1885   :  { %9746 = vmatpush3.bf16.xpose.msk.msra.mxu1 %vm10661_vm5, %v9741_v51 }
0x1886   :  { %9753 = vmatprep.subr.msk.bf16.mxu1 %vm10661_vm5, %v9751_v61 }
0x1887   :  { %v4468_v14 = vpop.permute.xlu1 %4467 }
0x188c   :  { %9542 = vmatmul.mubr.msk.f32.vlgmr.msra.gmra.mrb[56].mxu1 %vm294_vm4, %v11559_v47 }
0x188d   :  { %9756 = vmatpush3.bf16.xpose.msk.msra.mxu1 %vm10661_vm5, %v9751_v61  ;;  %9555 = vmatprep.mubr.msk.f32.mxu1 %vm294_vm4, %v4466_v56 }
0x1894   :  { %9556 = vmatmul.mubr.msk.f32.vlgmr.msra.gmra.mrb[58].mxu1 %vm294_vm4, %v4468_v14 }
0x195f   :  { %v9543_v60 = vpop.f32.mrb[56].mxu1 }
0x1960   :  { %v4347_v3 = vadd.f32 %v9543_v60, %v10687_v16  ;;  %v4341_v4 = vpop.f32.mrb[57].mxu1 }
0x1961   :  { %v4342_v44 = vadd.f32 %v4341_v4, %v10689_v17 }
0x1962   :  { %v4353_v12 = vsel %vm72_vm0, %v4347_v3, -inf }
0x1963   :  { %4354 = vmax.xlane.f32.xlu1 %v4353_v12  ;;  %v4350_v9 = vsel %vm72_vm0, %v4342_v44, -inf }
0x1964   :  { %4351 = vmax.xlane.f32.xlu0 %v4350_v9 }
0x1967   :  { %v9557_v34 = vpop.f32.mrb[58].mxu1 }
0x1968   :  { %v4547_v19 = vpop.f32.mrb[59].mxu1  ;;  %v4553_v8 = vadd.f32 %v9557_v34, %v10687_v16 }
0x1969   :  { %v4548_v35 = vadd.f32 %v4547_v19, %v10689_v17 }
0x196a   :  { %v4559_v36 = vsel %vm72_vm0, %v4553_v8, -inf }
0x196b   :  { %v4556_v13 = vsel %vm72_vm0, %v4548_v35, -inf }
0x196c   :  { %4557 = vmax.xlane.f32.xlu0 %v4556_v13 }
0x1970   :  { %4560 = vmax.xlane.f32.xlu0 %v4559_v36 }
0x19f0   :  { %v4355_v37 = vpop.xlane.xlu1 %4354 }
0x19f1   :  { %v4357_v11 = vsub.f32 %v4347_v3, %v4355_v37  ;;  %v4352_v15 = vpop.xlane.xlu0 %4351 }
0x19f2   :  { %v4356_v0 = vsub.f32 %v4342_v44, %v4352_v15 }
0x19f3   :  { %v4360_v18 = vmul.f32 1.442695, %v4357_v11 }
0x19f4   :  { %v4358_v22 = vmul.f32 1.442695, %v4356_v0 }
0x19f5   :  { %10356 = vpow2.f32 %v4360_v18 }
0x19f6   :  { %10358 = vpow2.f32 %v4358_v22 }
0x19f9   :  { %v4558_v53 = vpop.xlane.xlu0 %4557 }
0x19fa   :  { %v4562_v23 = vsub.f32 %v4548_v35, %v4558_v53 }
0x19fc   :  { %v4564_v10 = vmul.f32 1.442695, %v4562_v23 }
0x19fd   :  { %v4561_v54 = vpop.xlane.xlu0 %4560 }
0x19fe   :  { %10360 = vpow2.f32 %v4564_v10  ;;  %v4563_v26 = vsub.f32 %v4553_v8, %v4561_v54 }
0x19ff   :  { %v10357_v28 = vpop.eup %10356 }
0x1a00   :  { %v10359_v24 = vpop.eup %10358  ;;  %v4566_v25 = vmul.f32 1.442695, %v4563_v26  ;;  %v4365_v20 = vsel %vm72_vm0, %v10357_v28, 0.0 }
0x1a01   :  { %4366 = vadd.xlane.f32.xlu1 %v4365_v20  ;;  %v4362_v21 = vsel %vm72_vm0, %v10359_v24, 0.0 }
0x1a02   :  { %10362 = vpow2.f32 %v4566_v25  ;;  %4363 = vadd.xlane.f32.xlu0 %v4362_v21 }
0x1a08   :  { %v10361_v31 = vpop.eup %10360 }
0x1a09   :  { %v4568_v32 = vsel %vm72_vm0, %v10361_v31, 0.0 }
0x1a0a   :  { %4569 = vadd.xlane.f32.xlu0 %v4568_v32 }
0x1a0c   :  { %v10363_v38 = vpop.eup %10362 }
0x1a0d   :  { %v4571_v39 = vsel %vm72_vm0, %v10363_v38, 0.0 }
0x1a0e   :  { %4572 = vadd.xlane.f32.xlu1 %v4571_v39 }
0x1a1f   :  { %9952 = vrot.lane.b32.xlu1 %v11563_v48, %s10461_s3  ;;  %s12495_s3 = smov 44  }
0x1a20   :  { %9947 = vrot.lane.b32.xlu0 %v11563_v48, %s10458_s26  ;;  %s12493_s26 = smov 108  }
0x1a23   :  { %9957 = vrot.lane.b32.xlu1 %v11563_v48, %s10455_s24  ;;  %s12491_s24 = smov 80  }
0x1a24   :  { %4681 = vrot.lane.b32.xlu0 %v11559_v47, %s10456_s25 }
0x1a27   :  { %4679 = vrot.lane.b32.xlu1 %v11555_v46, %s10456_s25  ;;  %s12492_s25 = smov 48  }
0x1a8e   :  { %v4367_v41 = vpop.xlane.xlu1 %4366 }
0x1a8f   :  { %v4364_v40 = vpop.xlane.xlu0 %4363 }
0x1a90   :  { %10364 = vrcp.f32 %v4364_v40 }
0x1a91   :  { %10366 = vrcp.f32 %v4367_v41 }
0x1a97   :  { %v4570_v42 = vpop.xlane.xlu0 %4569 }
0x1a98   :  { %10368 = vrcp.f32 %v4570_v42 }
0x1a9a   :  { %v10365_v45 = vpop.eup %10364 }
0x1a9b   :  { %v4573_v55 = vpop.xlane.xlu1 %4572  ;;  %v9948_v59 = vpop.permute.xlu0 %9947  ;;  %v4370_v49 = vmul.f32 %v10365_v45, %v10359_v24 }
0x1a9c   :  { %10370 = vrcp.f32 %v4573_v55  ;;  %v9950_v63 = vunpack.i.h.bf16 %v9948_v59  ;;  %v9949_v43 = vunpack.i.l.bf16 %v9948_v59  ;;  %v10367_v51 = vpop.eup %10366 }
0x1a9d   :  { %9548 = vmatprep.mubr.msk.f32.mxu0 %vm72_vm0, %v4370_v49  ;;  %v4371_v3 = vmul.f32 %v10367_v51, %v10357_v28 }
0x1a9e   :  { %v9747_v7 = vpack.c.bf16 %v9950_v63, %v9949_v43 }
0x1a9f   :  { %v9953_v61 = vpop.permute.xlu1 %9952  ;;  %v4682_v36 = vpop.permute.xlu0 %4681 }
0x1aa0   :  { %v9955_v56 = vunpack.i.h.bf16 %v9953_v61  ;;  %v9954_v14 = vunpack.i.l.bf16 %v9953_v61  ;;  %9748 = vmatprep.subr.bf16.mxu0 %v9747_v7 }
0x1aa1   :  { %9750 = vmatpush3.bf16.msra.mxu0 %v9747_v7 }
0x1aa2   :  { %v10369_v60 = vpop.eup %10368  ;;  %v9757_v4 = vpack.c.bf16 %v9955_v56, %v9954_v14 }
0x1aa3   :  { %v9958_v44 = vpop.permute.xlu1 %9957  ;;  %v4576_v12 = vmul.f32 %v10369_v60, %v10361_v31 }
0x1aa4   :  { %v9960_v9 = vunpack.i.h.bf16 %v9958_v44  ;;  %v9959_v34 = vunpack.i.l.bf16 %v9958_v44  ;;  %9549 = vmatmul.mubr.msk.f32.vlgmr.msra.gmra.mrb[18].mxu0 %vm72_vm0, %v4371_v3  ;;  %9758 = vmatprep.subr.bf16.mxu0 %v9757_v4 }
0x1aa5   :  { %9760 = vmatpush3.bf16.msra.mxu0 %v9757_v4  ;;  %9562 = vmatprep.mubr.msk.f32.mxu0 %vm72_vm0, %v4576_v12 }
0x1aa6   :  { %v10371_v19 = vpop.eup %10370  ;;  %v9761_v35 = vpack.c.bf16 %v9960_v9, %v9959_v34 }
0x1aa7   :  { %v4577_v8 = vmul.f32 %v10371_v19, %v10363_v38  ;;  %v4680_v13 = vpop.permute.xlu1 %4679 }
0x1aa8   :  { %9763 = vmatprep.subr.msk.bf16.mxu0 %vm10661_vm5, %v9761_v35 }
0x1aa9   :  { %9563 = vmatmul.mubr.msk.f32.vlgmr.msra.gmra.mrb[56].mxu0 %vm72_vm0, %v4577_v8 }
0x1aaa   :  { %9569 = vmatprep.mubr.msk.f32.mxu0 %vm294_vm4, %v4680_v13 }
0x1aae   :  { %9766 = vmatpush3.bf16.xpose.msk.msra.mxu0 %vm10661_vm5, %v9761_v35 }
0x1ab5   :  { %9570 = vmatmul.mubr.msk.f32.vlgmr.msra.gmra.mrb[58].mxu0 %vm294_vm4, %v4682_v36 }
0x1b77   :  { %v9550_v37 = vpop.f32.mrb[18].mxu0 }
0x1b78   :  { %4460 = vst.msk [vmem:[#allocation3 + $0x8] sm:$0xff] %vm294_vm4, %v9550_v37  ;;  %v4450_v11 = vpop.f32.mrb[19].mxu0 }
0x1b79   :  { %4459 = vst.msk [vmem:[#allocation3] sm:$0xff] %vm294_vm4, %v4450_v11 }
0x1b7c   :  { %v11619_v15 = vpop.f32.mrb[56].mxu0 }
0x1b7d   :  { %v11621_v0 = vpop.f32.mrb[57].mxu0 }
0x1b88   :  { %v9571_v18 = vpop.f32.mrb[58].mxu0 }
0x1b89   :  { %v4767_v22 = vadd.f32 %v9571_v18, %v10687_v16  ;;  %v4761_v53 = vpop.f32.mrb[59].mxu0 }
0x1b8a   :  { %v4762_v23 = vadd.f32 %v4761_v53, %v10689_v17 }
0x1b8b   :  { %v4773_v10 = vsel %vm72_vm0, %v4767_v22, -inf }
0x1b8c   :  { %4774 = vmax.xlane.f32.xlu0 %v4773_v10  ;;  %v4770_v54 = vsel %vm72_vm0, %v4762_v23, -inf }
0x1b8d   :  { %4771 = vmax.xlane.f32.xlu1 %v4770_v54 }
0x1b9e   :  { %9962 = vrot.lane.b32.xlu1 %v11563_v48, %s10459_s27  ;;  %s12494_s27 = smov 76  }
0x1ba2   :  { %4893 = vrot.lane.b32.xlu1 %v11555_v46, %s12487_s7 }
0x1ba6   :  { %4895 = vrot.lane.b32.xlu1 %v11559_v47, %s12487_s7  ;;  %s12507_s7 = smov 24  }
0x1c19   :  { %v4775_v26 = vpop.xlane.xlu0 %4774 }
0x1c1a   :  { %v4777_v28 = vsub.f32 %v4767_v22, %v4775_v26  ;;  %v4772_v24 = vpop.xlane.xlu1 %4771 }
0x1c1b   :  { %v4776_v25 = vsub.f32 %v4762_v23, %v4772_v24 }
0x1c1c   :  { %v4780_v20 = vmul.f32 1.442695, %v4777_v28 }
0x1c1d   :  { %v4778_v21 = vmul.f32 1.442695, %v4776_v25 }
0x1c1e   :  { %10372 = vpow2.f32 %v4780_v20  ;;  %v9963_v31 = vpop.permute.xlu1 %9962 }
0x1c1f   :  { %v9965_v32 = vunpack.i.h.bf16 %v9963_v31  ;;  %v9964_v38 = vunpack.i.l.bf16 %v9963_v31  ;;  %10374 = vpow2.f32 %v4778_v21 }
0x1c21   :  { %v9767_v39 = vpack.c.bf16 %v9965_v32, %v9964_v38 }
0x1c22   :  { %v4894_v60 = vpop.permute.xlu1 %4893 }
0x1c23   :  { %9768 = vmatprep.subr.bf16.mxu1 %v9767_v39 }
0x1c24   :  { %9770 = vmatpush3.bf16.msra.mxu1 %v9767_v39 }
0x1c26   :  { %v4896_v3 = vpop.permute.xlu1 %4895 }
0x1c28   :  { %v10373_v40 = vpop.eup %10372 }
0x1c29   :  { %v4785_v41 = vsel %vm72_vm0, %v10373_v40, 0.0  ;;  %v10375_v42 = vpop.eup %10374 }
0x1c2a   :  { %4786 = vadd.xlane.f32.xlu0 %v4785_v41  ;;  %v4782_v45 = vsel %vm72_vm0, %v10375_v42, 0.0 }
0x1c2e   :  { %4783 = vadd.xlane.f32.xlu0 %v4782_v45 }
0x1c44   :  { %9967 = vrot.lane.b32.xlu0 %v11563_v48, %s12488_s4 }
0x1cb7   :  { %v4787_v55 = vpop.xlane.xlu0 %4786 }
0x1cb8   :  { %10376 = vrcp.f32 %v4787_v55 }
0x1cbb   :  { %v4784_v59 = vpop.xlane.xlu0 %4783 }
0x1cbc   :  { %10378 = vrcp.f32 %v4784_v59 }
0x1cbf   :  { %v9968_v49 = vpop.permute.xlu0 %9967 }
0x1cc0   :  { %v9970_v63 = vunpack.i.h.bf16 %v9968_v49  ;;  %v9969_v43 = vunpack.i.l.bf16 %v9968_v49 }
0x1cc2   :  { %v9771_v7 = vpack.c.bf16 %v9970_v63, %v9969_v43  ;;  %v10377_v51 = vpop.eup %10376 }
0x1cc3   :  { %v4791_v14 = vmul.f32 %v10377_v51, %v10373_v40 }
0x1cc4   :  { %9773 = vmatprep.subr.msk.bf16.mxu1 %vm10661_vm5, %v9771_v7 }
0x1cc6   :  { %v10379_v61 = vpop.eup %10378 }
0x1cc7   :  { %v4790_v56 = vmul.f32 %v10379_v61, %v10375_v42 }
0x1cc9   :  { %9576 = vmatprep.mubr.msk.f32.mxu1 %vm72_vm0, %v4790_v56 }
0x1cca   :  { %9577 = vmatmul.mubr.msk.f32.vlgmr.msra.gmra.mrb[60].mxu1 %vm72_vm0, %v4791_v14 }
0x1ccb   :  { %9776 = vmatpush3.bf16.xpose.msk.msra.mxu1 %vm10661_vm5, %v9771_v7  ;;  %9583 = vmatprep.mubr.msk.f32.mxu1 %vm294_vm4, %v4894_v60 }
0x1cd2   :  { %9584 = vmatmul.mubr.msk.f32.vlgmr.msra.gmra.mrb[62].mxu1 %vm294_vm4, %v4896_v3 }
0x1d9d   :  { %v11645_v4 = vpop.f32.mrb[60].mxu1 }
0x1d9e   :  { %v11647_v44 = vpop.f32.mrb[61].mxu1 }
0x1da5   :  { %v9585_v12 = vpop.f32.mrb[62].mxu1 }
0x1da6   :  { %v4981_v9 = vadd.f32 %v9585_v12, %v10687_v16  ;;  %v4975_v34 = vpop.f32.mrb[63].mxu1 }
0x1da7   :  { %v4976_v19 = vadd.f32 %v4975_v34, %v10689_v17 }
0x1da8   :  { %v4987_v35 = vsel %vm72_vm0, %v4981_v9, -inf }
0x1da9   :  { %4988 = vmax.xlane.f32.xlu0 %v4987_v35  ;;  %v4984_v8 = vsel %vm72_vm0, %v4976_v19, -inf }
0x1daa   :  { %4985 = vmax.xlane.f32.xlu1 %v4984_v8 }
0x1dbb   :  { %9972 = vrot.lane.b32.xlu1 %v11563_v48, %s12489_s5 }
0x1dbf   :  { %5107 = vrot.lane.b32.xlu1 %v11555_v46, %s12490_s23 }
0x1dc3   :  { %5109 = vrot.lane.b32.xlu1 %v11559_v47, %s12490_s23 }
0x1e36   :  { %v4989_v13 = vpop.xlane.xlu0 %4988 }
0x1e37   :  { %v4991_v36 = vsub.f32 %v4981_v9, %v4989_v13  ;;  %v4986_v37 = vpop.xlane.xlu1 %4985 }
0x1e38   :  { %v4990_v11 = vsub.f32 %v4976_v19, %v4986_v37 }
0x1e39   :  { %v4994_v18 = vmul.f32 1.442695, %v4991_v36 }
0x1e3a   :  { %v4992_v22 = vmul.f32 1.442695, %v4990_v11 }
0x1e3b   :  { %10380 = vpow2.f32 %v4994_v18  ;;  %v9973_v53 = vpop.permute.xlu1 %9972 }
0x1e3c   :  { %v9975_v23 = vunpack.i.h.bf16 %v9973_v53  ;;  %v9974_v10 = vunpack.i.l.bf16 %v9973_v53  ;;  %10382 = vpow2.f32 %v4992_v22 }
0x1e3e   :  { %v9777_v54 = vpack.c.bf16 %v9975_v23, %v9974_v10 }
0x1e3f   :  { %v5108_v55 = vpop.permute.xlu1 %5107 }
0x1e40   :  { %9778 = vmatprep.subr.bf16.mxu0 %v9777_v54 }
0x1e41   :  { %9780 = vmatpush3.bf16.msra.mxu0 %v9777_v54 }
0x1e43   :  { %v5110_v59 = vpop.permute.xlu1 %5109 }
0x1e45   :  { %v10381_v26 = vpop.eup %10380 }
0x1e46   :  { %v4999_v28 = vsel %vm72_vm0, %v10381_v26, 0.0  ;;  %v10383_v24 = vpop.eup %10382 }
0x1e47   :  { %5000 = vadd.xlane.f32.xlu0 %v4999_v28  ;;  %v4996_v25 = vsel %vm72_vm0, %v10383_v24, 0.0 }
0x1e4b   :  { %4997 = vadd.xlane.f32.xlu0 %v4996_v25 }
0x1e61   :  { %9977 = vrot.lane.b32.xlu0 %v11563_v48, %s12491_s24 }
0x1ed4   :  { %v5001_v20 = vpop.xlane.xlu0 %5000 }
0x1ed5   :  { %10384 = vrcp.f32 %v5001_v20 }
0x1ed8   :  { %v4998_v21 = vpop.xlane.xlu0 %4997 }
0x1ed9   :  { %10386 = vrcp.f32 %v4998_v21 }
0x1edc   :  { %v9978_v31 = vpop.permute.xlu0 %9977 }
0x1edd   :  { %v9980_v32 = vunpack.i.h.bf16 %v9978_v31  ;;  %v9979_v38 = vunpack.i.l.bf16 %v9978_v31 }
0x1edf   :  { %v9781_v39 = vpack.c.bf16 %v9980_v32, %v9979_v38  ;;  %v10385_v40 = vpop.eup %10384 }
0x1ee0   :  { %v5005_v45 = vmul.f32 %v10385_v40, %v10381_v26 }
0x1ee1   :  { %9783 = vmatprep.subr.msk.bf16.mxu0 %vm10661_vm5, %v9781_v39 }
0x1ee3   :  { %v10387_v41 = vpop.eup %10386 }
0x1ee4   :  { %v5004_v42 = vmul.f32 %v10387_v41, %v10383_v24 }
0x1ee6   :  { %9590 = vmatprep.mubr.msk.f32.mxu0 %vm72_vm0, %v5004_v42 }
0x1ee7   :  { %9591 = vmatmul.mubr.msk.f32.vlgmr.msra.gmra.mrb[60].mxu0 %vm72_vm0, %v5005_v45 }
0x1ee8   :  { %9786 = vmatpush3.bf16.xpose.msk.msra.mxu0 %vm10661_vm5, %v9781_v39  ;;  %9597 = vmatprep.mubr.msk.f32.mxu0 %vm294_vm4, %v5108_v55 }
0x1eef   :  { %9598 = vmatmul.mubr.msk.f32.vlgmr.msra.gmra.mrb[62].mxu0 %vm294_vm4, %v5110_v59 }
0x1fba   :  { %v11671_v49 = vpop.f32.mrb[60].mxu0 }
0x1fbb   :  { %v11673_v63 = vpop.f32.mrb[61].mxu0 }
0x1fc2   :  { %v9599_v43 = vpop.f32.mrb[62].mxu0 }
0x1fc3   :  { %v5195_v7 = vadd.f32 %v9599_v43, %v10687_v16  ;;  %v5189_v51 = vpop.f32.mrb[63].mxu0 }
0x1fc4   :  { %v5190_v61 = vadd.f32 %v5189_v51, %v10689_v17 }
0x1fc5   :  { %v5201_v56 = vsel %vm72_vm0, %v5195_v7, -inf }
0x1fc6   :  { %5202 = vmax.xlane.f32.xlu0 %v5201_v56  ;;  %v5198_v14 = vsel %vm72_vm0, %v5190_v61, -inf }
0x1fc7   :  { %5199 = vmax.xlane.f32.xlu1 %v5198_v14 }
0x1fd8   :  { %9982 = vrot.lane.b32.xlu1 %v11563_v48, %s12492_s25  ;;  %s12508_s25 = smov 28  }
0x1fdc   :  { %5321 = vrot.lane.b32.xlu1 %v11555_v46, %s12493_s26 }
0x1fe0   :  { %5323 = vrot.lane.b32.xlu1 %v11559_v47, %s12493_s26 }
0x2053   :  { %v5203_v60 = vpop.xlane.xlu0 %5202 }
0x2054   :  { %v5205_v3 = vsub.f32 %v5195_v7, %v5203_v60  ;;  %v5200_v12 = vpop.xlane.xlu1 %5199 }
0x2055   :  { %v5204_v9 = vsub.f32 %v5190_v61, %v5200_v12 }
0x2056   :  { %v5208_v34 = vmul.f32 1.442695, %v5205_v3 }
0x2057   :  { %v5206_v19 = vmul.f32 1.442695, %v5204_v9 }
0x2058   :  { %10388 = vpow2.f32 %v5208_v34  ;;  %v9983_v35 = vpop.permute.xlu1 %9982 }
0x2059   :  { %v9985_v8 = vunpack.i.h.bf16 %v9983_v35  ;;  %v9984_v13 = vunpack.i.l.bf16 %v9983_v35  ;;  %10390 = vpow2.f32 %v5206_v19 }
0x205b   :  { %v9787_v36 = vpack.c.bf16 %v9985_v8, %v9984_v13 }
0x205c   :  { %v5322_v31 = vpop.permute.xlu1 %5321 }
0x205d   :  { %9788 = vmatprep.subr.bf16.mxu1 %v9787_v36 }
0x205e   :  { %9790 = vmatpush3.bf16.msra.mxu1 %v9787_v36 }
0x2060   :  { %v5324_v32 = vpop.permute.xlu1 %5323 }
0x2062   :  { %v10389_v37 = vpop.eup %10388 }
0x2063   :  { %v5213_v11 = vsel %vm72_vm0, %v10389_v37, 0.0  ;;  %v10391_v18 = vpop.eup %10390 }
0x2064   :  { %5214 = vadd.xlane.f32.xlu0 %v5213_v11  ;;  %v5210_v22 = vsel %vm72_vm0, %v10391_v18, 0.0 }
0x2068   :  { %5211 = vadd.xlane.f32.xlu0 %v5210_v22 }
0x207e   :  { %9987 = vrot.lane.b32.xlu0 %v11563_v48, %s12494_s27 }
0x20f1   :  { %v5215_v53 = vpop.xlane.xlu0 %5214 }
0x20f2   :  { %10392 = vrcp.f32 %v5215_v53 }
0x20f5   :  { %v5212_v23 = vpop.xlane.xlu0 %5211 }
0x20f6   :  { %10394 = vrcp.f32 %v5212_v23 }
0x20f9   :  { %v9988_v10 = vpop.permute.xlu0 %9987 }
0x20fa   :  { %v9990_v54 = vunpack.i.h.bf16 %v9988_v10  ;;  %v9989_v26 = vunpack.i.l.bf16 %v9988_v10 }
0x20fc   :  { %v9791_v28 = vpack.c.bf16 %v9990_v54, %v9989_v26  ;;  %v10393_v24 = vpop.eup %10392 }
0x20fd   :  { %v5219_v21 = vmul.f32 %v10393_v24, %v10389_v37 }
0x20fe   :  { %9793 = vmatprep.subr.msk.bf16.mxu1 %vm10661_vm5, %v9791_v28 }
0x2100   :  { %v10395_v25 = vpop.eup %10394 }
0x2101   :  { %v5218_v20 = vmul.f32 %v10395_v25, %v10391_v18 }
0x2103   :  { %9604 = vmatprep.mubr.msk.f32.mxu1 %vm72_vm0, %v5218_v20 }
0x2104   :  { %9605 = vmatmul.mubr.msk.f32.vlgmr.msra.gmra.mrb[64].mxu1 %vm72_vm0, %v5219_v21 }
0x2105   :  { %9796 = vmatpush3.bf16.xpose.msk.msra.mxu1 %vm10661_vm5, %v9791_v28  ;;  %9611 = vmatprep.mubr.msk.f32.mxu1 %vm294_vm4, %v5322_v31 }
0x210c   :  { %9612 = vmatmul.mubr.msk.f32.vlgmr.msra.gmra.mrb[66].mxu1 %vm294_vm4, %v5324_v32 }
0x21d7   :  { %v11697_v38 = vpop.f32.mrb[64].mxu1 }
0x21d8   :  { %v11699_v39 = vpop.f32.mrb[65].mxu1 }
0x21df   :  { %v9613_v40 = vpop.f32.mrb[66].mxu1 }
0x21e0   :  { %v5409_v41 = vadd.f32 %v9613_v40, %v10687_v16  ;;  %v5403_v42 = vpop.f32.mrb[67].mxu1 }
0x21e1   :  { %v5404_v45 = vadd.f32 %v5403_v42, %v10689_v17 }
0x21e2   :  { %v5415_v55 = vsel %vm72_vm0, %v5409_v41, -inf }
0x21e3   :  { %5416 = vmax.xlane.f32.xlu0 %v5415_v55  ;;  %v5412_v59 = vsel %vm72_vm0, %v5404_v45, -inf }
0x21e4   :  { %5413 = vmax.xlane.f32.xlu1 %v5412_v59 }
0x21f5   :  { %9992 = vrot.lane.b32.xlu1 %v11563_v48, %s12495_s3 }
0x21f9   :  { %5535 = vrot.lane.b32.xlu1 %v11555_v46, %s12496_s29 }
0x21fd   :  { %5537 = vrot.lane.b32.xlu1 %v11559_v47, %s12496_s29 }
0x2270   :  { %v5417_v43 = vpop.xlane.xlu0 %5416 }
0x2271   :  { %v5419_v7 = vsub.f32 %v5409_v41, %v5417_v43  ;;  %v5414_v51 = vpop.xlane.xlu1 %5413 }
0x2272   :  { %v5418_v61 = vsub.f32 %v5404_v45, %v5414_v51 }
0x2273   :  { %v5422_v56 = vmul.f32 1.442695, %v5419_v7 }
0x2274   :  { %v5420_v14 = vmul.f32 1.442695, %v5418_v61 }
0x2275   :  { %10396 = vpow2.f32 %v5422_v56  ;;  %v9993_v60 = vpop.permute.xlu1 %9992 }
0x2276   :  { %v9995_v3 = vunpack.i.h.bf16 %v9993_v60  ;;  %v9994_v12 = vunpack.i.l.bf16 %v9993_v60  ;;  %10398 = vpow2.f32 %v5420_v14 }
0x2278   :  { %v9797_v9 = vpack.c.bf16 %v9995_v3, %v9994_v12 }
0x2279   :  { %v5536_v26 = vpop.permute.xlu1 %5535 }
0x227a   :  { %9798 = vmatprep.subr.bf16.mxu0 %v9797_v9 }
0x227b   :  { %9800 = vmatpush3.bf16.msra.mxu0 %v9797_v9 }
0x227d   :  { %v5538_v28 = vpop.permute.xlu1 %5537 }
0x227f   :  { %v10397_v34 = vpop.eup %10396 }
0x2280   :  { %v5427_v19 = vsel %vm72_vm0, %v10397_v34, 0.0  ;;  %v10399_v35 = vpop.eup %10398 }
0x2281   :  { %5428 = vadd.xlane.f32.xlu0 %v5427_v19  ;;  %v5424_v8 = vsel %vm72_vm0, %v10399_v35, 0.0 }
0x2285   :  { %5425 = vadd.xlane.f32.xlu0 %v5424_v8 }
0x229b   :  { %9997 = vrot.lane.b32.xlu0 %v11563_v48, %s12497_s21 }
0x230e   :  { %v5429_v13 = vpop.xlane.xlu0 %5428 }
0x230f   :  { %10400 = vrcp.f32 %v5429_v13 }
0x2312   :  { %v5426_v36 = vpop.xlane.xlu0 %5425 }
0x2313   :  { %10402 = vrcp.f32 %v5426_v36 }
0x2316   :  { %v9998_v37 = vpop.permute.xlu0 %9997 }
0x2317   :  { %v10000_v11 = vunpack.i.h.bf16 %v9998_v37  ;;  %v9999_v18 = vunpack.i.l.bf16 %v9998_v37 }
0x2319   :  { %v9801_v22 = vpack.c.bf16 %v10000_v11, %v9999_v18  ;;  %v10401_v53 = vpop.eup %10400 }
0x231a   :  { %v5433_v54 = vmul.f32 %v10401_v53, %v10397_v34 }
0x231b   :  { %9803 = vmatprep.subr.msk.bf16.mxu0 %vm10661_vm5, %v9801_v22 }
0x231d   :  { %v10403_v23 = vpop.eup %10402 }
0x231e   :  { %v5432_v10 = vmul.f32 %v10403_v23, %v10399_v35 }
0x2320   :  { %9618 = vmatprep.mubr.msk.f32.mxu0 %vm72_vm0, %v5432_v10 }
0x2321   :  { %9619 = vmatmul.mubr.msk.f32.vlgmr.msra.gmra.mrb[64].mxu0 %vm72_vm0, %v5433_v54 }
0x2322   :  { %9806 = vmatpush3.bf16.xpose.msk.msra.mxu0 %vm10661_vm5, %v9801_v22  ;;  %9625 = vmatprep.mubr.msk.f32.mxu0 %vm294_vm4, %v5536_v26 }
0x2329   :  { %9626 = vmatmul.mubr.msk.f32.vlgmr.msra.gmra.mrb[66].mxu0 %vm294_vm4, %v5538_v28 }
0x23f4   :  { %v11723_v24 = vpop.f32.mrb[64].mxu0 }
0x23f5   :  { %v11725_v25 = vpop.f32.mrb[65].mxu0 }
0x23fc   :  { %v9627_v20 = vpop.f32.mrb[66].mxu0 }
0x23fd   :  { %v5623_v21 = vadd.f32 %v9627_v20, %v10687_v16  ;;  %v5617_v31 = vpop.f32.mrb[67].mxu0 }
0x23fe   :  { %v5618_v32 = vadd.f32 %v5617_v31, %v10689_v17 }
0x23ff   :  { %v5629_v40 = vsel %vm72_vm0, %v5623_v21, -inf }
0x2400   :  { %5630 = vmax.xlane.f32.xlu0 %v5629_v40  ;;  %v5626_v41 = vsel %vm72_vm0, %v5618_v32, -inf }
0x2401   :  { %5627 = vmax.xlane.f32.xlu1 %v5626_v41 }
0x2412   :  { %10002 = vrot.lane.b32.xlu1 %v11563_v48, %s12498_s2  ;;  %s10484_s2 = smov [#allocation4]  }
0x2416   :  { %5749 = vrot.lane.b32.xlu1 %v11555_v46, %s12499_s30 }
0x241a   :  { %5751 = vrot.lane.b32.xlu1 %v11559_v47, %s12499_s30  ;;  %s8122_s30 = sshll.u32 %s10484_s2, 4  ;;  %s8123_s30 = int_to_ptr.vmem [resolvable:$true] %s8122_s30 }
0x241b   :  { %p10431_p1 = scmp.lt.s32.totalorder %s8123_s30, %s8123_s30 }
0x248d   :  { %v5631_v42 = vpop.xlane.xlu0 %5630 }
0x248e   :  { %v5633_v45 = vsub.f32 %v5623_v21, %v5631_v42  ;;  %v5628_v55 = vpop.xlane.xlu1 %5627 }
0x248f   :  { %v5632_v59 = vsub.f32 %v5618_v32, %v5628_v55 }
0x2490   :  { %v5636_v43 = vmul.f32 1.442695, %v5633_v45 }
0x2491   :  { %v5634_v7 = vmul.f32 1.442695, %v5632_v59 }
0x2492   :  { %10404 = vpow2.f32 %v5636_v43  ;;  %v10003_v51 = vpop.permute.xlu1 %10002 }
0x2493   :  { %v10005_v61 = vunpack.i.h.bf16 %v10003_v51  ;;  %v10004_v56 = vunpack.i.l.bf16 %v10003_v51  ;;  %10406 = vpow2.f32 %v5634_v7 }
0x2495   :  { %v9807_v14 = vpack.c.bf16 %v10005_v61, %v10004_v56 }
0x2496   :  { %v5750_v18 = vpop.permute.xlu1 %5749 }
0x2497   :  { %9808 = vmatprep.subr.bf16.mxu1 %v9807_v14 }
0x2498   :  { %9810 = vmatpush3.bf16.msra.mxu1 %v9807_v14 }
0x249a   :  { %v5752_v22 = vpop.permute.xlu1 %5751 }
0x249c   :  { %v10405_v60 = vpop.eup %10404 }
0x249d   :  { %v5641_v46 = vsel %vm72_vm0, %v10405_v60, 0.0  ;;  %v10407_v3 = vpop.eup %10406 }
0x249e   :  { %5642 = vadd.xlane.f32.xlu0 %v5641_v46  ;;  %v5638_v47 = vsel %vm72_vm0, %v10407_v3, 0.0 }
0x24a2   :  { %5639 = vadd.xlane.f32.xlu0 %v5638_v47 }
0x24b8   :  { %10007 = vrot.lane.b32.xlu0 %v11563_v48, %s12500_s0 }
0x252b   :  { %v5643_v12 = vpop.xlane.xlu0 %5642 }
0x252c   :  { %10408 = vrcp.f32 %v5643_v12  ;;  %v10150_v12 = vld [vmem:[%s12432_s8 + $0x10] sm:$0xff]  }
0x252f   :  { %v5640_v9 = vpop.xlane.xlu0 %5639 }
0x2530   :  { %10410 = vrcp.f32 %v5640_v9  ;;  %v10151_v9 = vld [vmem:[%s12432_s8 + $0x18] sm:$0xff]  }
0x2533   :  { %v10008_v34 = vpop.permute.xlu0 %10007 }
0x2534   :  { %v10010_v19 = vunpack.i.h.bf16 %v10008_v34  ;;  %v10009_v35 = vunpack.i.l.bf16 %v10008_v34 }
0x2536   :  { %v9811_v8 = vpack.c.bf16 %v10010_v19, %v10009_v35  ;;  %v10409_v13 = vpop.eup %10408 }
0x2537   :  { %v5647_v11 = vmul.f32 %v10409_v13, %v10405_v60 }
0x2538   :  { %9813 = vmatprep.subr.msk.bf16.mxu1 %vm10661_vm5, %v9811_v8 }
0x253a   :  { %v10411_v36 = vpop.eup %10410 }
0x253b   :  { %v5646_v37 = vmul.f32 %v10411_v36, %v10407_v3 }
0x253d   :  { %9632 = vmatprep.mubr.msk.f32.mxu1 %vm72_vm0, %v5646_v37 }
0x253e   :  { %9633 = vmatmul.mubr.msk.f32.vlgmr.msra.gmra.mrb[68].mxu1 %vm72_vm0, %v5647_v11 }
0x253f   :  { %9816 = vmatpush3.bf16.xpose.msk.msra.mxu1 %vm10661_vm5, %v9811_v8  ;;  %9639 = vmatprep.mubr.msk.f32.mxu1 %vm294_vm4, %v5750_v18 }
0x2546   :  { %9640 = vmatmul.mubr.msk.f32.vlgmr.msra.gmra.mrb[70].mxu1 %vm294_vm4, %v5752_v22 }
0x2547   :  { %6401 = vmatprep.mubr.bf16.mxu1 %v10483_v57 }
0x2611   :  { %v9634_v53 = vpop.f32.mrb[68].mxu1 }
0x2612   :  { %v5726_v23 = vpop.f32.mrb[69].mxu1 }
0x2619   :  { %v9641_v10 = vpop.f32.mrb[70].mxu1 }
0x261a   :  { %v5837_v54 = vadd.f32 %v9641_v10, %v10687_v16  ;;  %v5831_v26 = vpop.f32.mrb[71].mxu1 }
0x261b   :  { %v5832_v28 = vadd.f32 %v5831_v26, %v10689_v17 }
0x261c   :  { %v5843_v20 = vsel %vm72_vm0, %v5837_v54, -inf }
0x261d   :  { %5844 = vmax.xlane.f32.xlu0 %v5843_v20  ;;  %v5840_v62 = vsel %vm72_vm0, %v5832_v28, -inf }
0x261e   :  { %5841 = vmax.xlane.f32.xlu1 %v5840_v62 }
0x262f   :  { %10012 = vrot.lane.b32.xlu1 %v11563_v48, %s12501_s20 }
0x2633   :  { %4669 = vrot.lane.b32.xlu1 %v11619_v15, %s12502_s22 }
0x2637   :  { %4881 = vrot.lane.b32.xlu1 %v11647_v44, %s12503_s6 }
0x263b   :  { %4883 = vrot.lane.b32.xlu1 %v11645_v4, %s12503_s6 }
0x263f   :  { %5097 = vrot.lane.b32.xlu1 %v11671_v49, %s12504_s19 }
0x2643   :  { %5311 = vrot.lane.b32.xlu1 %v11697_v38, %s12505_s1 }
0x2647   :  { %5525 = vrot.lane.b32.xlu1 %v11723_v24, %s12506_s28 }
0x264b   :  { %5739 = vrot.lane.b32.xlu1 %v9634_v53, %s12507_s7 }
0x26aa   :  { %v5845_v16 = vpop.xlane.xlu0 %5844 }
0x26ab   :  { %v5847_v17 = vsub.f32 %v5837_v54, %v5845_v16  ;;  %v5842_v48 = vpop.xlane.xlu1 %5841 }
0x26ac   :  { %v5846_v15 = vsub.f32 %v5832_v28, %v5842_v48 }
0x26ad   :  { %v5850_v21 = vmul.f32 1.442695, %v5847_v17 }
0x26ae   :  { %v5848_v44 = vmul.f32 1.442695, %v5846_v15 }
0x26af   :  { %v10013_v31 = vpop.permute.xlu1 %10012 }
0x26b0   :  { %10412 = vpow2.f32 %v5848_v44  ;;  %v10015_v4 = vunpack.i.h.bf16 %v10013_v31  ;;  %v10014_v32 = vunpack.i.l.bf16 %v10013_v31 }
0x26b1   :  { %10414 = vpow2.f32 %v5850_v21 }
0x26b2   :  { %v9817_v49 = vpack.c.bf16 %v10015_v4, %v10014_v32  ;;  %v8442_v32 = vld [vmem:[%s12434_s10 + $0x140] sm:$0xff] }
0x26b3   :  { %v4670_v40 = vpop.permute.xlu1 %4669 }
0x26b4   :  { %4674 = vst.msk [vmem:[#allocation3 + $0x8] sm:$0xff] %vm701_vm8, %v4670_v40  ;;  %9818 = vmatprep.subr.bf16.mxu0 %v9817_v49 }
0x26b5   :  { %9820 = vmatpush3.bf16.msra.mxu0 %v9817_v49  ;;  %v8435_v49 = vld [vmem:[%s12434_s10 + $0x108] sm:$0xff] }
0x26b6   :  { %9649 = vmatprep.subr.bf16.mxu0 %v10450_v27 }
0x26b7   :  { %v4882_v38 = vpop.permute.xlu1 %4881 }
0x26ba   :  { %v10413_v24 = vpop.eup %10412 }
0x26bb   :  { %v4884_v41 = vpop.permute.xlu1 %4883  ;;  %v5852_v42 = vsel %vm72_vm0, %v10413_v24, 0.0  ;;  %v10415_v45 = vpop.eup %10414 }
0x26bc   :  { %4888 = vst.msk [vmem:[#allocation3 + $0x8] sm:$0xff] %vm916_vm9, %v4884_v41  ;;  %5853 = vadd.xlane.f32.xlu0 %v5852_v42  ;;  %v5855_v59 = vsel %vm72_vm0, %v10415_v45, 0.0 }
0x26bf   :  { %v5098_v55 = vpop.permute.xlu1 %5097 }
0x26c0   :  { %5102 = vst.msk [vmem:[#allocation3 + $0x8] sm:$0xff] %vm1131_vm10, %v5098_v55  ;;  %5856 = vadd.xlane.f32.xlu0 %v5855_v59  ;;  %v8458_v55 = vld [vmem:[%s12434_s10 + $0x1c0] sm:$0xff]  ;;  %v8451_v59 = vld [vmem:[%s12434_s10 + $0x188] sm:$0xff] }
0x26c3   :  { %v5312_v43 = vpop.permute.xlu1 %5311 }
0x26c4   :  { %5316 = vst.msk [vmem:[#allocation3 + $0x8] sm:$0xff] %vm1346_vm11, %v5312_v43 }
0x26c7   :  { %v5526_v7 = vpop.permute.xlu1 %5525 }
0x26c8   :  { %5530 = vst.msk [vmem:[#allocation3 + $0x8] sm:$0xff] %vm1561_vm12, %v5526_v7  ;;  %v8459_v7 = vld [vmem:[%s12434_s10 + $0x1c8] sm:$0xff] }
0x26cb   :  { %v5740_v51 = vpop.permute.xlu1 %5739 }
0x26cc   :  { %5744 = vst.msk [vmem:[#allocation3 + $0x8] sm:$0xff] %vm1776_vm13, %v5740_v51 }
0x26d6   :  { %4667 = vrot.lane.b32.xlu0 %v11621_v0, %s12502_s22 }
0x26da   :  { %5095 = vrot.lane.b32.xlu0 %v11673_v63, %s12504_s19 }
0x26de   :  { %5309 = vrot.lane.b32.xlu0 %v11699_v39, %s12505_s1 }
0x26e2   :  { %5523 = vrot.lane.b32.xlu0 %v11725_v25, %s12506_s28 }
0x26e6   :  { %5737 = vrot.lane.b32.xlu0 %v5726_v23, %s12507_s7 }
0x2749   :  { %v5854_v61 = vpop.xlane.xlu0 %5853 }
0x274a   :  { %10416 = vrcp.f32 %v5854_v61  ;;  %v8486_v61 = vcombine.low %v8451_v59, %v8459_v7 }
0x274d   :  { %v5857_v56 = vpop.xlane.xlu0 %5856 }
0x274e   :  { %10418 = vrcp.f32 %v5857_v56  ;;  %v8487_v56 = vcombine.high %v8451_v59, %v8459_v7  ;;  %v8448_v7 = vld [vmem:[%s12434_s10 + $0x170] sm:$0xff] }
0x2751   :  { %v4668_v14 = vpop.permute.xlu0 %4667 }
0x2752   :  { %4673 = vst.msk [vmem:[#allocation3] sm:$0xff] %vm701_vm8, %v4668_v14  ;;  %v8436_v14 = vld [vmem:[%s12434_s10 + $0x110] sm:$0xff] }
0x2753   :  { %4887 = vst.msk [vmem:[#allocation3] sm:$0xff] %vm916_vm9, %v4882_v38  ;;  %v8443_v38 = vld [vmem:[%s12434_s10 + $0x148] sm:$0xff] }
0x2754   :  { %v10417_v0 = vpop.eup %10416  ;;  %v8470_v41 = vcombine.low %v8435_v49, %v8443_v38  ;;  %v8471_v42 = vcombine.high %v8435_v49, %v8443_v38  ;;  %v8462_v38 = vld [vmem:[%s12434_s10 + $0x1e0] sm:$0xff] }
0x2755   :  { %v5096_v60 = vpop.permute.xlu0 %5095  ;;  %v5860_v63 = vmul.f32 %v10417_v0, %v10413_v24  ;;  %v8444_v0 = vld [vmem:[%s12434_s10 + $0x150] sm:$0xff] }
0x2756   :  { %5101 = vst.msk [vmem:[#allocation3] sm:$0xff] %vm1131_vm10, %v5096_v60  ;;  %v8437_v60 = vld [vmem:[%s12434_s10 + $0x118] sm:$0xff] }
0x2757   :  { %9646 = vmatprep.mubr.msk.f32.mxu0 %vm72_vm0, %v5860_v63  ;;  %v8473_v63 = vcombine.high %v8436_v14, %v8444_v0 }
0x2758   :  { %v10419_v39 = vpop.eup %10418 }
0x2759   :  { %v5861_v25 = vmul.f32 %v10419_v39, %v10415_v45  ;;  %v5310_v46 = vpop.permute.xlu0 %5309  ;;  %v8450_v45 = vld [vmem:[%s12434_s10 + $0x180] sm:$0xff]  ;;  %v8445_v39 = vld [vmem:[%s12434_s10 + $0x158] sm:$0xff] }
0x275a   :  { %5315 = vst.msk [vmem:[#allocation3] sm:$0xff] %vm1346_vm11, %v5310_v46  ;;  %v8485_v43 = vcombine.high %v8450_v45, %v8458_v55  ;;  %v8484_v51 = vcombine.low %v8450_v45, %v8458_v55  ;;  %v8474_v46 = vcombine.low %v8437_v60, %v8445_v39 }
0x275b   :  { %9647 = vmatmul.mubr.msk.f32.vlgmr.msra.gmra.mrb[68].mxu0 %vm72_vm0, %v5861_v25  ;;  %v8472_v25 = vcombine.low %v8436_v14, %v8444_v0  ;;  %vm8087_vm0 = vcmask 254976  }
0x275c   :  { %9653 = vmatprep.mubr.msk.bf16.mxu0 %vm10451_vm2, %v10450_v27  ;;  %9650 = vmatpush3.bf16.msra.mxu0 %v10150_v12 }
0x275d   :  { %v5524_v3 = vpop.permute.xlu0 %5523  ;;  %9651 = vmatprep.subr.bf16.mxu0 %v10450_v27  ;;  %v8426_v27 = vld [vmem:[%s12433_s9 + $0x1] ss:$0 sm:$0xff] }
0x275e   :  { %5529 = vst.msk [vmem:[#allocation3] sm:$0xff] %vm1561_vm12, %v5524_v3  ;;  %v8475_v3 = vcombine.high %v8437_v60, %v8445_v39  ;;  %v8464_v39 = vld [vmem:[%s12434_s10 + $0x1f0] sm:$0xff] }
0x2760   :  { %9652 = vmatpush3.bf16.msra.mxu0 %v10151_v9 }
0x2761   :  { %v5738_v47 = vpop.permute.xlu0 %5737  ;;  %6410 = vmatprep.subr.bf16.mxu0 %v8471_v42 }
0x2762   :  { %5743 = vst.msk [vmem:[#allocation3] sm:$0xff] %vm1776_vm13, %v5738_v47 }
0x282e   :  { %v9648_v34 = vpop.f32.mrb[68].mxu0 }
0x282f   :  { %5953 = vrot.lane.b32.xlu1 %v9648_v34, %s12508_s25  ;;  %v5940_v19 = vpop.f32.mrb[69].mxu0 }
0x2830   :  { %5951 = vrot.lane.b32.xlu0 %v5940_v19, %s12508_s25 }
0x28a1   :  { %v5954_v35 = vpop.permute.xlu1 %5953 }
0x28a2   :  { %5958 = vst.msk [vmem:[#allocation3 + $0x8] sm:$0xff] %vm1991_vm14, %v5954_v35  ;;  %v5952_v8 = vpop.permute.xlu0 %5951 }
0x28a3   :  { %5957 = vst.msk [vmem:[#allocation3] sm:$0xff] %vm1991_vm14, %v5952_v8 }
0x28a9   :  { %v5960_v13 = vld [vmem:[#allocation3 + $0x8] sm:$0xff] }
0x28aa   :  { %v5959_v36 = vld [vmem:[#allocation3] sm:$0xff] }
0x28ab   :  { %v5961_v37 = vpack.c.bf16 %v5960_v13, %v5959_v36  ;;  %v8432_v13 = vld [vmem:[%s12438_s14 + $0x1] ss:$0 sm:$0xff] }
0x28ad   :  { %9654 = vmatmul.mubr.msk.bf16.vlgmr.msra.gmra.mrb[72].mxu0 %vm160_vm1, %v5961_v37 }
0x28ae   :  { %6442 = vmatprep.mubr.bf16.mxu0 %v10483_v57  ;;  %6411 = vmatpush1.bf16.msra.mxu0 %v8470_v41  ;;  %v8463_v41 = vld [vmem:[%s12434_s10 + $0x1e8] sm:$0xff] }
0x28af   :  { %6412 = vmatprep.subr.bf16.mxu0 %v8487_v56 }
0x28b2   :  { %6413 = vmatpush1.bf16.msra.mxu0 %v8486_v61  ;;  %v8449_v61 = vld [vmem:[%s12434_s10 + $0x178] sm:$0xff] }
0x28b3   :  { %6492 = vmatprep.subr.bf16.mxu0 %v8475_v3 }
0x2980   :  { %v6024_v11 = vpop.f32.mrb[72].mxu0 }
0x2981   :  { %v6025_v18 = vadd.f32 %v8426_v27, %v6024_v11  ;;  %v9655_v22 = vpop.f32.mrb[73].mxu0  ;;  %v8433_v11 = vld [vmem:[%s12439_s15 + $0x1] ss:$0 sm:$0xff] }
0x2982   :  { %v6027_v53 = vpop.f32.mrb[74].mxu0 }
0x2983   :  { %v6031_v23 = vadd.f32 %v6025_v18, %v11543_v29  ;;  %v6028_v10 = vadd.f32 %v8426_v27, %v6027_v53  ;;  %v9656_v54 = vpop.f32.mrb[75].mxu0 }
0x2985   :  { %v6032_v26 = vadd.f32 %v6028_v10, %v11545_v30  ;;  %v6037_v28 = vsel %vm160_vm1, %v6031_v23, 0.0  ;;  %v8434_v30 = vld [vmem:[%s12434_s10 + $0x100] sm:$0xff]  ;;  %v8452_v10 = vld [vmem:[%s12434_s10 + $0x190] sm:$0xff] }
0x2986   :  { %6038 = vadd.xlane.f32.xlu0 %v6037_v28  ;;  %v8469_v40 = vcombine.high %v8434_v30, %v8442_v32  ;;  %v8468_v24 = vcombine.low %v8434_v30, %v8442_v32  ;;  %v8460_v28 = vld [vmem:[%s12434_s10 + $0x1d0] sm:$0xff] }
0x2987   :  { %v6040_v20 = vsel %vm160_vm1, %v6032_v26, 0.0 }
0x2988   :  { %6041 = vadd.xlane.f32.xlu1 %v6040_v20  ;;  %6369 = vmatprep.subr.bf16.mxu1 %v8469_v40  ;;  %v8453_v20 = vld [vmem:[%s12434_s10 + $0x198] sm:$0xff]  ;;  %v8454_v40 = vld [vmem:[%s12434_s10 + $0x1a0] sm:$0xff] }
0x2989   :  { %6370 = vmatpush1.bf16.msra.mxu1 %v8468_v24  ;;  %v8455_v24 = vld [vmem:[%s12434_s10 + $0x1a8] sm:$0xff]  ;;  %v8493_v55 = vcombine.high %v8454_v40, %v8462_v38  ;;  %v8492_v56 = vcombine.low %v8454_v40, %v8462_v38  ;;  %v10181_v40 = vld [vmem:[%s12436_s12 + $0x4f8] sm:$0xff]  }
0x298a   :  { %6371 = vmatprep.subr.bf16.mxu1 %v8485_v43  ;;  %v8495_v59 = vcombine.high %v8455_v24, %v8463_v41  ;;  %v8440_v43 = vld [vmem:[%s12434_s10 + $0x130] sm:$0xff]  ;;  %v8494_v14 = vcombine.low %v8455_v24, %v8463_v41  ;;  %v10182_v38 = vld [vmem:[%s12436_s12 + $0x438] sm:$0xff]   ;;  %v10184_v41 = vld [vmem:[%s12436_s12 + $0x540] sm:$0xff]  }
0x298b   :  { %v8481_v0 = vcombine.high %v8440_v43, %v8448_v7  ;;  %v8480_v3 = vcombine.low %v8440_v43, %v8448_v7  ;;  %v10183_v24 = vld [vmem:[%s12436_s12 + $0x4b8] sm:$0xff]  }
0x298d   :  { %6372 = vmatpush1.bf16.msra.mxu1 %v8484_v51  ;;  %v8441_v51 = vld [vmem:[%s12434_s10 + $0x138] sm:$0xff] }
0x298e   :  { %6451 = vmatprep.subr.bf16.mxu1 %v8473_v63  ;;  %v8483_v60 = vcombine.high %v8441_v51, %v8449_v61  ;;  %v8456_v63 = vld [vmem:[%s12434_s10 + $0x1b0] sm:$0xff] }
0x2a13   :  { %v6039_v62 = vpop.xlane.xlu0 %6038 }
0x2a14   :  { %v6043_v16 = vmul.f32 0.03125, %v6039_v62  ;;  %v8461_v62 = vld [vmem:[%s12434_s10 + $0x1d8] sm:$0xff] }
0x2a15   :  { %v6042_v17 = vpop.xlane.xlu1 %6041  ;;  %v8490_v30 = vcombine.low %v8453_v20, %v8461_v62 }
0x2a16   :  { %v6045_v48 = vsub.f32 %v6031_v23, %v6043_v16  ;;  %v6044_v15 = vmul.f32 0.03125, %v6042_v17 }
0x2a18   :  { %v6046_v21 = vsub.f32 %v6032_v26, %v6044_v15  ;;  %v6047_v44 = vmul.f32 %v6045_v48, %v6045_v48  ;;  %v8491_v15 = vcombine.high %v8453_v20, %v8461_v62  ;;  %v10168_v20 = vld [vmem:[%s12436_s12 + $0x460] sm:$0xff]  }
0x2a19   :  { %v10169_v62 = vld [vmem:[%s12436_s12 + $0x4e0] sm:$0xff]  }
0x2a1a   :  { %v6049_v31 = vsel %vm160_vm1, %v6047_v44, 0.0  ;;  %v6048_v29 = vmul.f32 %v6046_v21, %v6046_v21  ;;  %v8446_v44 = vld [vmem:[%s12434_s10 + $0x160] sm:$0xff] }
0x2a1b   :  { %6050 = vadd.xlane.f32.xlu0 %v6049_v31  ;;  %v8439_v31 = vld [vmem:[%s12434_s10 + $0x128] sm:$0xff] }
0x2a1c   :  { %v6052_v4 = vsel %vm160_vm1, %v6048_v29, 0.0  ;;  %v8447_v29 = vld [vmem:[%s12434_s10 + $0x168] sm:$0xff] }
0x2a1d   :  { %v8479_v49 = vcombine.high %v8439_v31, %v8447_v29  ;;  %v8478_v45 = vcombine.low %v8439_v31, %v8447_v29  ;;  %v10175_v31 = vld [vmem:[%s12436_s12 + $0x4a8] sm:$0xff]   ;;  %v10176_v29 = vld [vmem:[%s12436_s12 + $0x470] sm:$0xff]  }
0x2a1f   :  { %6053 = vadd.xlane.f32.xlu0 %v6052_v4  ;;  %v8488_v4 = vcombine.low %v8452_v10, %v8460_v28 }
0x2aa8   :  { %v6051_v47 = vpop.xlane.xlu0 %6050 }
0x2aa9   :  { %v6055_v12 = vmul.f32 0.03125, %v6051_v47  ;;  %v8482_v47 = vcombine.low %v8441_v51, %v8449_v61 }
0x2aab   :  { %v6057_v9 = vadd.f32 1e-05, %v6055_v12  ;;  %v8497_v12 = vcombine.high %v8456_v63, %v8464_v39 }
0x2aac   :  { %v6054_v34 = vpop.xlane.xlu0 %6053 }
0x2aad   :  { %10420 = vrsqrt.f32 %v6057_v9  ;;  %v6056_v19 = vmul.f32 0.03125, %v6054_v34  ;;  %v8496_v34 = vcombine.low %v8456_v63, %v8464_v39 }
0x2aaf   :  { %v6058_v35 = vadd.f32 1e-05, %v6056_v19 }
0x2ab1   :  { %10422 = vrsqrt.f32 %v6058_v35  ;;  %v10152_v35 = vld [vmem:[%s12436_s12 + $0x440] sm:$0xff]  }
0x2ab7   :  { %v10421_v8 = vpop.eup %10420 }
0x2ab8   :  { %v6061_v36 = vmul.f32 %v10421_v8, %v6045_v48  ;;  %v8489_v48 = vcombine.high %v8452_v10, %v8460_v28  ;;  %v10153_v8 = vld [vmem:[%s12436_s12 + $0x4c0] sm:$0xff]   ;;  %v10164_v10 = vld [vmem:[%s12436_s12 + $0x458] sm:$0xff]  }
0x2ab9   :  { %v10167_v28 = vld [vmem:[%s12436_s12 + $0x498] sm:$0xff]  }
0x2aba   :  { %v6069_v37 = vmul.f32 %v8432_v13, %v6061_v36  ;;  %v10155_v36 = vld [vmem:[%s12436_s12 + $0x480] sm:$0xff]  }
0x2abb   :  { %v10423_v27 = vpop.eup %10422 }
0x2abc   :  { %v6062_v18 = vmul.f32 %v10423_v27, %v6046_v21  ;;  %v6077_v22 = vadd.f32 %v8433_v11, %v6069_v37  ;;  %v8438_v21 = vld [vmem:[%s12434_s10 + $0x120] sm:$0xff]  ;;  %v10156_v37 = vld [vmem:[%s12436_s12 + $0x448] sm:$0xff]  }
0x2abd   :  { %v8477_v32 = vcombine.high %v8438_v21, %v8446_v44  ;;  %v8476_v42 = vcombine.low %v8438_v21, %v8446_v44  ;;  %v10158_v27 = vld [vmem:[%s12436_s12 + $0x408] sm:$0xff]  }
0x2abe   :  { %v6070_v53 = vmul.f32 %v8432_v13, %v6062_v18  ;;  %v6080_v54 = vrot.slane %v6077_v22, 7  ;;  %v10154_v13 = vld [vmem:[%s12436_s12 + $0x400] sm:$0xff]   ;;  %v10160_v18 = vld [vmem:[%s12436_s12 + $0x450] sm:$0xff]   ;;  %v10173_v21 = vld [vmem:[%s12436_s12 + $0x4e8] sm:$0xff]  }
0x2abf   :  { %v10161_v22 = vld [vmem:[%s12436_s12 + $0x4d0] sm:$0xff]   ;;  %v10174_v44 = vld [vmem:[%s12436_s12 + $0x428] sm:$0xff]  }
0x2ac0   :  { %v6078_v23 = vadd.f32 %v8433_v11, %v6070_v53  ;;  %v10159_v11 = vld [vmem:[%s12436_s12 + $0x488] sm:$0xff]   ;;  %v10162_v53 = vld [vmem:[%s12436_s12 + $0x410] sm:$0xff]  }
0x2ac2   :  { %v6083_v26 = vrot.slane %v6078_v23, 6  ;;  %v10163_v23 = vld [vmem:[%s12436_s12 + $0x490] sm:$0xff]  }
0x2ac4   :  { %v11873_v16 = vsel %vm6085_vm15, %v6080_v54, %v6083_v26  ;;  %v10165_v54 = vld [vmem:[%s12436_s12 + $0x4d8] sm:$0xff]  }
0x2ac5   :  { %v11877_v17 = vpack.c.bf16 %v11873_v16, %v11873_v16  ;;  %v10166_v26 = vld [vmem:[%s12436_s12 + $0x418] sm:$0xff]  }
0x2ac7   :  { %8500 = vmatmul.mubr.msk.bf16.vlgmr.msra.gmra.mrb[72].mxu1 %vm160_vm1, %v11877_v17  ;;  %8501 = vmatmul.mubr.msk.bf16.vlgmr.msra.gmra.mrb[76].mxu0 %vm160_vm1, %v11877_v17 }
0x2ac8   :  { %6452 = vmatpush1.bf16.msra.mxu1 %v8472_v25  ;;  %6493 = vmatpush1.bf16.msra.mxu0 %v8474_v46  ;;  %v8457_v25 = vld [vmem:[%s12434_s10 + $0x1b8] sm:$0xff] }
0x2ac9   :  { %6453 = vmatprep.subr.bf16.mxu1 %v8489_v48  ;;  %6494 = vmatprep.subr.bf16.mxu0 %v8491_v15  ;;  %v8465_v46 = vld [vmem:[%s12434_s10 + $0x1f8] sm:$0xff]  ;;  %v10171_v48 = vld [vmem:[%s12436_s12 + $0x4a0] sm:$0xff]   ;;  %v10172_v15 = vld [vmem:[%s12436_s12 + $0x468] sm:$0xff]  }
0x2aca   :  { %6483 = vmatprep.mubr.bf16.mxu1 %v10483_v57  ;;  %6524 = vmatprep.mubr.bf16.mxu0 %v10483_v57  ;;  %v8499_v9 = vcombine.high %v8457_v25, %v8465_v46  ;;  %v8498_v19 = vcombine.low %v8457_v25, %v8465_v46 }
0x2acc   :  { %6454 = vmatpush1.bf16.msra.mxu1 %v8488_v4  ;;  %6495 = vmatpush1.bf16.msra.mxu0 %v8490_v30  ;;  %v10177_v4 = vld [vmem:[%s12436_s12 + $0x4f0] sm:$0xff]  }
0x2acd   :  { %6533 = vmatprep.subr.bf16.mxu1 %v8477_v32  ;;  %6574 = vmatprep.subr.bf16.mxu0 %v8479_v49  ;;  %v10178_v30 = vld [vmem:[%s12436_s12 + $0x430] sm:$0xff]   ;;  %v10180_v49 = vld [vmem:[%s12436_s12 + $0x478] sm:$0xff]  }
0x2ace   :  { %v10179_v32 = vld [vmem:[%s12436_s12 + $0x4b0] sm:$0xff]  }
0x2acf   :  { %8502 = vmatmul.mubr.msk.bf16.vlgmr.msra.gmra.mrb[76].mxu1 %vm160_vm1, %v11877_v17  ;;  %8503 = vmatmul.mubr.msk.bf16.vlgmr.msra.gmra.mrb[80].mxu0 %vm160_vm1, %v11877_v17 }
0x2ad0   :  { %6534 = vmatpush1.bf16.msra.mxu1 %v8476_v42  ;;  %6575 = vmatpush1.bf16.msra.mxu0 %v8478_v45  ;;  %v10185_v42 = vld [vmem:[%s12436_s12 + $0x5c0] sm:$0xff]   ;;  %v12054_v45 = vld [vmem:[%s12435_s11 + $0x10] sm:$0xff] }
0x2ad1   :  { %6535 = vmatprep.subr.bf16.mxu1 %v8493_v55  ;;  %6576 = vmatprep.subr.bf16.mxu0 %v8495_v59  ;;  %v6129_v55 = vrot.slane %v12054_v45, %v11151_v58  ;;  %v6137_v59 = vrot.slane %v12054_v45, %v11154_v50  ;;  %v6133_v43 = vrot.slane %v12054_v45, %v11160_v33 }
0x2ad2   :  { %6565 = vmatprep.mubr.bf16.mxu1 %v10483_v57  ;;  %6606 = vmatprep.mubr.bf16.mxu0 %v10483_v57  ;;  %v6141_v7 = vrot.slane %v12054_v45, %v11163_v52 }
0x2ad4   :  { %6536 = vmatpush1.bf16.msra.mxu1 %v8492_v56  ;;  %6577 = vmatpush1.bf16.msra.mxu0 %v8494_v14 }
0x2ad5   :  { %6615 = vmatprep.subr.bf16.mxu1 %v8481_v0  ;;  %6656 = vmatprep.subr.bf16.mxu0 %v8483_v60 }
0x2ad7   :  { %8504 = vmatmul.mubr.msk.bf16.vlgmr.msra.gmra.mrb[80].mxu1 %vm160_vm1, %v11877_v17  ;;  %8505 = vmatmul.mubr.msk.bf16.vlgmr.msra.gmra.mrb[84].mxu0 %vm160_vm1, %v11877_v17 }
0x2ad8   :  { %6616 = vmatpush1.bf16.msra.mxu1 %v8480_v3  ;;  %6657 = vmatpush1.bf16.msra.mxu0 %v8482_v47 }
0x2ad9   :  { %6617 = vmatprep.subr.bf16.mxu1 %v8497_v12  ;;  %6658 = vmatprep.subr.bf16.mxu0 %v8499_v9 }
0x2ada   :  { %6647 = vmatprep.mubr.bf16.mxu1 %v10483_v57  ;;  %6688 = vmatprep.mubr.bf16.mxu0 %v10483_v57  ;;  %v10157_v57 = vld [vmem:[%s12436_s12 + $0x4c8] sm:$0xff]  }
0x2adc   :  { %6618 = vmatpush1.bf16.msra.mxu1 %v8496_v34  ;;  %6659 = vmatpush1.bf16.msra.mxu0 %v8498_v19 }
0x2add   :  { %9218 = vmatprep.subr.bf16.mxu1 %v10152_v35  ;;  %9240 = vmatprep.subr.bf16.mxu0 %v10153_v8 }
0x2adf   :  { %8506 = vmatmul.mubr.msk.bf16.vlgmr.msra.gmra.mrb[84].mxu1 %vm160_vm1, %v11877_v17  ;;  %8507 = vmatmul.mubr.msk.bf16.vlgmr.msra.gmra.mrb[88].mxu0 %vm160_vm1, %v11877_v17  ;;  %v10170_v17 = vld [vmem:[%s12436_s12 + $0x420] sm:$0xff]  }
0x2ae0   :  { %9219 = vmatpush3.bf16.msra.mxu1 %v10154_v13  ;;  %9241 = vmatpush3.bf16.msra.mxu0 %v10155_v36  ;;  %v6149_v13 = vrot.slane %v12054_v45, %v11176_v5  ;;  %v6157_v36 = vrot.slane %v12054_v45, %v11179_v6 }
0x2ae1   :  { %9220 = vmatprep.subr.bf16.mxu1 %v10156_v37  ;;  %9242 = vmatprep.subr.bf16.mxu0 %v10157_v57  ;;  %v10186_v37 = vld [vmem:[%s12436_s12 + $0x500] sm:$0xff]  }
0x2ae2   :  { %v10187_v57 = vld [vmem:[%s12436_s12 + $0x580] sm:$0xff]  }
0x2ae4   :  { %9221 = vmatpush3.bf16.msra.mxu1 %v10158_v27  ;;  %9243 = vmatpush3.bf16.msra.mxu0 %v10159_v11 }
0x2ae5   :  { %9222 = vmatprep.subr.bf16.mxu1 %v10160_v18  ;;  %9244 = vmatprep.subr.bf16.mxu0 %v10161_v22  ;;  %v10188_v18 = vld [vmem:[%s12436_s12 + $0x548] sm:$0xff]  }
0x2ae6   :  { %v10189_v22 = vld [vmem:[%s12436_s12 + $0x5c8] sm:$0xff]  }
0x2ae8   :  { %9223 = vmatpush3.bf16.msra.mxu1 %v10162_v53  ;;  %9245 = vmatpush3.bf16.msra.mxu0 %v10163_v23 }
0x2ae9   :  { %9224 = vmatprep.subr.bf16.mxu1 %v10164_v10  ;;  %9246 = vmatprep.subr.bf16.mxu0 %v10165_v54 }
0x2aec   :  { %9225 = vmatpush3.bf16.msra.mxu1 %v10166_v26  ;;  %9247 = vmatpush3.bf16.msra.mxu0 %v10167_v28 }
0x2aed   :  { %9226 = vmatprep.subr.bf16.mxu1 %v10168_v20  ;;  %9248 = vmatprep.subr.bf16.mxu0 %v10169_v62 }
0x2af0   :  { %9227 = vmatpush3.bf16.msra.mxu1 %v10170_v17  ;;  %9249 = vmatpush3.bf16.msra.mxu0 %v10171_v48  ;;  %v10190_v17 = vld [vmem:[%s12436_s12 + $0x508] sm:$0xff]  }
0x2af1   :  { %9228 = vmatprep.subr.bf16.mxu1 %v10172_v15  ;;  %9250 = vmatprep.subr.bf16.mxu0 %v10173_v21  ;;  %v10191_v48 = vld [vmem:[%s12436_s12 + $0x588] sm:$0xff]  }
0x2af4   :  { %9229 = vmatpush3.bf16.msra.mxu1 %v10174_v44  ;;  %9251 = vmatpush3.bf16.msra.mxu0 %v10175_v31  ;;  %v10192_v44 = vld [vmem:[%s12436_s12 + $0x550] sm:$0xff]  }
0x2af5   :  { %9230 = vmatprep.subr.bf16.mxu1 %v10176_v29  ;;  %9252 = vmatprep.subr.bf16.mxu0 %v10177_v4  ;;  %v10193_v31 = vld [vmem:[%s12436_s12 + $0x5d0] sm:$0xff]  }
0x2af8   :  { %9231 = vmatpush3.bf16.msra.mxu1 %v10178_v30  ;;  %9253 = vmatpush3.bf16.msra.mxu0 %v10179_v32 }
0x2af9   :  { %9232 = vmatprep.subr.bf16.mxu1 %v10180_v49  ;;  %9254 = vmatprep.subr.bf16.mxu0 %v10181_v40  ;;  %v10194_v49 = vld [vmem:[%s12436_s12 + $0x510] sm:$0xff]  }
0x2afa   :  { %v10195_v40 = vld [vmem:[%s12436_s12 + $0x590] sm:$0xff]  }
0x2afc   :  { %9233 = vmatpush3.bf16.msra.mxu1 %v10182_v38  ;;  %9255 = vmatpush3.bf16.msra.mxu0 %v10183_v24  ;;  %v10196_v38 = vld [vmem:[%s12436_s12 + $0x558] sm:$0xff]  }
0x2afd   :  { %9262 = vmatprep.subr.bf16.mxu1 %v10184_v41  ;;  %9284 = vmatprep.subr.bf16.mxu0 %v10185_v42  ;;  %v10197_v24 = vld [vmem:[%s12436_s12 + $0x5d8] sm:$0xff]  }
0x2b9a   :  { %v6403_v51 = vpop.f32.mrb[72].mxu1  ;;  %v6444_v61 = vpop.f32.mrb[76].mxu0 }
0x2b9b   :  { %v6404_v56 = vadd.f32 %v6403_v51, %v6129_v55  ;;  %v6445_v14 = vadd.f32 %v6444_v61, %v6137_v59  ;;  %v6405_v0 = vpop.f32.mrb[73].mxu1  ;;  %v6446_v60 = vpop.f32.mrb[77].mxu0  ;;  %v10198_v51 = vld [vmem:[%s12436_s12 + $0x518] sm:$0xff]  }
0x2b9c   :  { %v6406_v63 = vadd.f32 %v6405_v0, %v6133_v43  ;;  %v6447_v39 = vadd.f32 %v6446_v60, %v6141_v7  ;;  %v6407_v25 = vpop.f32.mrb[74].mxu1  ;;  %v6448_v46 = vpop.f32.mrb[78].mxu0  ;;  %v10199_v61 = vld [vmem:[%s12436_s12 + $0x598] sm:$0xff]   ;;  %v10200_v0 = vld [vmem:[%s12436_s12 + $0x560] sm:$0xff]  }
0x2b9d   :  { %v6697_v3 = vmax.f32 %v6404_v56, 0.0  ;;  %v6699_v47 = vmax.f32 %v6445_v14, 0.0  ;;  %v6408_v12 = vpop.f32.mrb[75].mxu1  ;;  %v6449_v9 = vpop.f32.mrb[79].mxu0  ;;  %v10201_v60 = vld [vmem:[%s12436_s12 + $0x5e0] sm:$0xff]  }
0x2b9e   :  { %v6698_v34 = vmax.f32 %v6406_v63, 0.0  ;;  %v6700_v19 = vmax.f32 %v6447_v39, 0.0  ;;  %v12127_v63 = vld [vmem:[%s12435_s11 + $0x18] sm:$0xff]  ;;  %v10202_v25 = vld [vmem:[%s12436_s12 + $0x520] sm:$0xff]   ;;  %s10426_s11 = scalar_lea.vmem %s8123_s30, 32 }
0x2b9f   :  { %v6713_v27 = vpack.c.bf16 %v6697_v3, %v6697_v3  ;;  %v6715_v11 = vpack.c.bf16 %v6699_v47, %v6699_v47  ;;  %v6185_v39 = vrot.slane %v12127_v63, %v11173_v2  ;;  %v10203_v46 = vld [vmem:[%s12436_s12 + $0x5a0] sm:$0xff]   ;;  %v10204_v3 = vld [vmem:[%s12436_s12 + $0x568] sm:$0xff]   ;;  %p10427_p0 = scmp.ne.s32.totalorder %s8123_s30, %s10426_s11  ;;  %p10432_p2 = scmp.lt.s32.totalorder %s10426_s11, %s10426_s11 }
0x2ba0   :  { %v6714_v35 = vpack.c.bf16 %v6698_v34, %v6698_v34  ;;  %v6716_v8 = vpack.c.bf16 %v6700_v19, %v6700_v19  ;;  %v10205_v47 = vld [vmem:[%s12436_s12 + $0x5e8] sm:$0xff]  }
0x2ba1   :  { %p10433_p3 = por %p10432_p2, %p10431_p1 }
0x2ba2   :  { %v12080_v53 = vpop.f32.mrb[76].mxu1  ;;  %v12082_v23 = vpop.f32.mrb[80].mxu0  ;;  %7794 = vmatprep.mubr.bf16.mxu1 %v6714_v35  ;;  %7834 = vmatprep.mubr.bf16.mxu0 %v6716_v8 }
0x2ba3   :  { %v6487_v10 = vpop.f32.mrb[77].mxu1  ;;  %v6528_v54 = vpop.f32.mrb[81].mxu0  ;;  %7795 = vmatmul.mubr.bf16.vlgmr.msra.gmra.mrb[88].mxu1 %v6713_v27  ;;  %7835 = vmatmul.mubr.bf16.vlgmr.msra.gmra.mrb[92].mxu0 %v6715_v11  ;;  %v6153_v27 = vrot.slane %v12054_v45, %v11173_v2  ;;  %v10210_v2 = vld [vmem:[%s12436_s12 + $0x530] sm:$0xff]   ;;  %p10434_p4 = pnand %p10433_p3, %p10427_p0 }
0x2ba4   :  { %v6488_v26 = vadd.f32 %v6487_v10, %v6149_v13  ;;  %v6529_v28 = vadd.f32 %v6528_v54, %v6157_v36  ;;  %9263 = vmatpush3.bf16.msra.mxu1 %v10186_v37  ;;  %9285 = vmatpush3.bf16.msra.mxu0 %v10187_v57  ;;  %v6489_v20 = vpop.f32.mrb[78].mxu1  ;;  %v6530_v62 = vpop.f32.mrb[82].mxu0  ;;  %v10206_v36 = vld [vmem:[%s12436_s12 + $0x528] sm:$0xff]   ;;  %v6145_v57 = vrot.slane %v12054_v45, %v11170_v1  ;;  %v10209_v10 = vld [vmem:[%s12436_s12 + $0x5f0] sm:$0xff]  }
0x2ba5   :  { %v6490_v15 = vpop.f32.mrb[79].mxu1  ;;  %v6531_v21 = vpop.f32.mrb[83].mxu0  ;;  %9264 = vmatprep.subr.bf16.mxu1 %v10188_v18  ;;  %9286 = vmatprep.subr.bf16.mxu0 %v10189_v22  ;;  %v10207_v37 = vld [vmem:[%s12436_s12 + $0x5a8] sm:$0xff]   ;;  %v10208_v22 = vld [vmem:[%s12436_s12 + $0x570] sm:$0xff]   ;;  %v6165_v54 = vrot.slane %v12127_v63, %v11160_v33  ;;  %v6527_v20 = vadd.f32 %v12082_v23, %v6153_v27  ;;  %v10212_v33 = vld [vmem:[%s12436_s12 + $0x578] sm:$0xff]   ;;  %v6169_v27 = vrot.slane %v12127_v63, %v11154_v50 }
0x2ba6   :  { %v6702_v29 = vmax.f32 %v6488_v26, 0.0  ;;  %v6704_v4 = vmax.f32 %v6529_v28, 0.0  ;;  %v6173_v26 = vrot.slane %v12127_v63, %v11163_v52  ;;  %v10211_v45 = vld [vmem:[%s12436_s12 + $0x5b0] sm:$0xff]   ;;  %v6486_v28 = vadd.f32 %v12080_v53, %v6145_v57  ;;  %v10213_v52 = vld [vmem:[%s12436_s12 + $0x5f8] sm:$0xff]   ;;  %v10216_v21 = vld [vmem:[%s12436_s12 + $0x640] sm:$0xff]  }
0x2ba7   :  { %v10214_v53 = vld [vmem:[%s12436_s12 + $0x538] sm:$0xff]   ;;  %v6703_v15 = vmax.f32 %v6527_v20, 0.0  ;;  %v10240_v57 = vld [vmem:[%s12436_s12 + $0x670] sm:$0xff]  }
0x2ba8   :  { %v6718_v30 = vpack.c.bf16 %v6702_v29, %v6702_v29  ;;  %v6720_v32 = vpack.c.bf16 %v6704_v4, %v6704_v4  ;;  %9265 = vmatpush3.bf16.msra.mxu1 %v10190_v17  ;;  %9287 = vmatpush3.bf16.msra.mxu0 %v10191_v48  ;;  %v10215_v23 = vld [vmem:[%s12436_s12 + $0x5b8] sm:$0xff]   ;;  %v6701_v48 = vmax.f32 %v6486_v28, 0.0  ;;  %v10218_v4 = vld [vmem:[%s12436_s12 + $0x600] sm:$0xff]   ;;  %v10243_v50 = vld [vmem:[%s12436_s12 + $0x6b0] sm:$0xff]  }
0x2ba9   :  { %9266 = vmatprep.subr.bf16.mxu1 %v10192_v44  ;;  %9288 = vmatprep.subr.bf16.mxu0 %v10193_v31  ;;  %v10217_v44 = vld [vmem:[%s12436_s12 + $0x6c0] sm:$0xff]  }
0x2baa   :  { %v12108_v41 = vpop.f32.mrb[80].mxu1  ;;  %v12110_v42 = vpop.f32.mrb[84].mxu0  ;;  %7874 = vmatprep.mubr.bf16.mxu1 %v6718_v30  ;;  %7914 = vmatprep.mubr.bf16.mxu0 %v6720_v32  ;;  %v6717_v30 = vpack.c.bf16 %v6701_v48, %v6701_v48  ;;  %v6719_v32 = vpack.c.bf16 %v6703_v15, %v6703_v15  ;;  %v10248_v28 = vld [vmem:[%s12436_s12 + $0x740] sm:$0xff]   ;;  %v10253_v15 = vld [vmem:[%s12436_s12 + $0x7c8] sm:$0xff]  }
0x2bab   :  { %v6569_v55 = vpop.f32.mrb[81].mxu1  ;;  %v6610_v59 = vpop.f32.mrb[85].mxu0 }
0x2bac   :  { %9267 = vmatpush3.bf16.msra.mxu1 %v10194_v49  ;;  %9289 = vmatpush3.bf16.msra.mxu0 %v10195_v40  ;;  %v6571_v43 = vpop.f32.mrb[82].mxu1  ;;  %v6612_v7 = vpop.f32.mrb[86].mxu0  ;;  %v6570_v62 = vadd.f32 %v6569_v55, %v6165_v54  ;;  %v6611_v17 = vadd.f32 %v6610_v59, %v6173_v26  ;;  %v10219_v49 = vld [vmem:[%s12436_s12 + $0x680] sm:$0xff]   ;;  %v10222_v59 = vld [vmem:[%s12436_s12 + $0x608] sm:$0xff]   ;;  %v6609_v54 = vadd.f32 %v12110_v42, %v6169_v27  ;;  %v10247_v42 = vld [vmem:[%s12436_s12 + $0x6b8] sm:$0xff]  }
0x2bad   :  { %v6572_v56 = vpop.f32.mrb[83].mxu1  ;;  %v6613_v14 = vpop.f32.mrb[87].mxu0  ;;  %9268 = vmatprep.subr.bf16.mxu1 %v10196_v38  ;;  %9290 = vmatprep.subr.bf16.mxu0 %v10197_v24  ;;  %v10220_v38 = vld [vmem:[%s12436_s12 + $0x648] sm:$0xff]   ;;  %v10224_v7 = vld [vmem:[%s12436_s12 + $0x650] sm:$0xff]   ;;  %v8765_v27 = vld [vmem:[%s12437_s13 + $0x1] ss:$0 sm:$0xff] }
0x2bae   :  { %v6706_v31 = vmax.f32 %v6570_v62, 0.0  ;;  %v6708_v29 = vmax.f32 %v6611_v17, 0.0  ;;  %v10221_v24 = vld [vmem:[%s12436_s12 + $0x6c8] sm:$0xff]   ;;  %v10227_v56 = vld [vmem:[%s12436_s12 + $0x690] sm:$0xff]   ;;  %v10228_v14 = vld [vmem:[%s12436_s12 + $0x658] sm:$0xff]   ;;  %v6707_v20 = vmax.f32 %v6609_v54, 0.0 }
0x2baf   :  { %v10223_v43 = vld [vmem:[%s12436_s12 + $0x688] sm:$0xff]   ;;  %v10251_v17 = vld [vmem:[%s12436_s12 + $0x780] sm:$0xff]  }
0x2bb0   :  { %9269 = vmatpush3.bf16.msra.mxu1 %v10198_v51  ;;  %9291 = vmatpush3.bf16.msra.mxu0 %v10199_v61  ;;  %v6722_v40 = vpack.c.bf16 %v6706_v31, %v6706_v31  ;;  %v6724_v55 = vpack.c.bf16 %v6708_v29, %v6708_v29  ;;  %v10225_v51 = vld [vmem:[%s12436_s12 + $0x6d0] sm:$0xff]   ;;  %v10255_v31 = vld [vmem:[%s12436_s12 + $0x788] sm:$0xff]  }
0x2bb1   :  { %9270 = vmatprep.subr.bf16.mxu1 %v10200_v0  ;;  %9292 = vmatprep.subr.bf16.mxu0 %v10201_v60  ;;  %v10226_v61 = vld [vmem:[%s12436_s12 + $0x610] sm:$0xff]   ;;  %v10229_v0 = vld [vmem:[%s12436_s12 + $0x6d8] sm:$0xff]  }
0x2bb2   :  { %v12143_v12 = vpop.f32.mrb[84].mxu1  ;;  %v6690_v9 = vpop.f32.mrb[88].mxu0  ;;  %v10230_v60 = vld [vmem:[%s12436_s12 + $0x618] sm:$0xff]   ;;  %v10256_v29 = vld [vmem:[%s12436_s12 + $0x750] sm:$0xff]  }
0x2bb3   :  { %v12145_v34 = vadd.f32 %v6690_v9, %v6185_v39  ;;  %v12147_v19 = vpop.f32.mrb[85].mxu1  ;;  %v12149_v35 = vpop.f32.mrb[89].mxu0  ;;  %v10231_v39 = vld [vmem:[%s12436_s12 + $0x698] sm:$0xff]   ;;  %v10236_v9 = vld [vmem:[%s12436_s12 + $0x668] sm:$0xff]  }
0x2bb4   :  { %9271 = vmatpush3.bf16.msra.mxu1 %v10202_v25  ;;  %9293 = vmatpush3.bf16.msra.mxu0 %v10203_v46  ;;  %v6653_v8 = vpop.f32.mrb[86].mxu1  ;;  %v6694_v13 = vpop.f32.mrb[90].mxu0  ;;  %v10232_v25 = vld [vmem:[%s12436_s12 + $0x660] sm:$0xff]  }
0x2bb5   :  { %v6654_v11 = vpop.f32.mrb[87].mxu1  ;;  %v6695_v18 = vpop.f32.mrb[91].mxu0  ;;  %9272 = vmatprep.subr.bf16.mxu1 %v10204_v3  ;;  %9294 = vmatprep.subr.bf16.mxu0 %v10205_v47  ;;  %v10233_v46 = vld [vmem:[%s12436_s12 + $0x6e0] sm:$0xff]   ;;  %v10237_v8 = vld [vmem:[%s12436_s12 + $0x6e8] sm:$0xff]  }
0x2bb6   :  { %v10234_v3 = vld [vmem:[%s12436_s12 + $0x620] sm:$0xff]   ;;  %v10238_v13 = vld [vmem:[%s12436_s12 + $0x628] sm:$0xff]   ;;  %v10241_v11 = vld [vmem:[%s12436_s12 + $0x6f0] sm:$0xff]   ;;  %v6189_v18 = vrot.slane %v12127_v63, %v11179_v6 }
0x2bb7   :  { %v10235_v47 = vld [vmem:[%s12436_s12 + $0x6a0] sm:$0xff]   ;;  %v10245_v6 = vld [vmem:[%s12436_s12 + $0x6f8] sm:$0xff]  }
0x2bb8   :  { %9273 = vmatpush3.bf16.msra.mxu1 %v10206_v36  ;;  %9295 = vmatpush3.bf16.msra.mxu0 %v10207_v37  ;;  %v6161_v36 = vrot.slane %v12127_v63, %v11151_v58  ;;  %v10239_v37 = vld [vmem:[%s12436_s12 + $0x6a8] sm:$0xff]   ;;  %v6181_v58 = vrot.slane %v12127_v63, %v11176_v5  ;;  %v10244_v5 = vld [vmem:[%s12436_s12 + $0x678] sm:$0xff]  }
0x2bb9   :  { %9274 = vmatprep.subr.bf16.mxu1 %v10208_v22  ;;  %9296 = vmatprep.subr.bf16.mxu0 %v10209_v10  ;;  %v10242_v22 = vld [vmem:[%s12436_s12 + $0x630] sm:$0xff]  }
0x2bba   :  { %v6568_v10 = vadd.f32 %v12108_v41, %v6161_v36  ;;  %v6652_v26 = vadd.f32 %v12147_v19, %v6181_v58  ;;  %v6693_v41 = vadd.f32 %v12149_v35, %v6189_v18  ;;  %v10249_v19 = vld [vmem:[%s12436_s12 + $0x7c0] sm:$0xff]  }
0x2bbc   :  { %9275 = vmatpush3.bf16.msra.mxu1 %v10210_v2  ;;  %9297 = vmatpush3.bf16.msra.mxu0 %v10211_v45  ;;  %v10246_v2 = vld [vmem:[%s12436_s12 + $0x638] sm:$0xff]   ;;  %v6705_v45 = vmax.f32 %v6568_v10, 0.0  ;;  %v6710_v35 = vmax.f32 %v6652_v26, 0.0 }
0x2bbd   :  { %9276 = vmatprep.subr.bf16.mxu1 %v10212_v33  ;;  %9298 = vmatprep.subr.bf16.mxu0 %v10213_v52  ;;  %v6712_v33 = vmax.f32 %v6693_v41, 0.0  ;;  %v10250_v52 = vld [vmem:[%s12436_s12 + $0x700] sm:$0xff]  }
0x2bbe   :  { %v6721_v62 = vpack.c.bf16 %v6705_v45, %v6705_v45  ;;  %v6726_v48 = vpack.c.bf16 %v6710_v35, %v6710_v35 }
0x2bc0   :  { %9277 = vmatpush3.bf16.msra.mxu1 %v10214_v53  ;;  %9299 = vmatpush3.bf16.msra.mxu0 %v10215_v23  ;;  %v6723_v53 = vpack.c.bf16 %v6707_v20, %v6707_v20  ;;  %v10252_v23 = vld [vmem:[%s12436_s12 + $0x748] sm:$0xff]  }
0x2bc1   :  { %9306 = vmatprep.subr.bf16.mxu1 %v10216_v21  ;;  %9328 = vmatprep.subr.bf16.mxu0 %v10217_v44  ;;  %v6728_v21 = vpack.c.bf16 %v6712_v33, %v6712_v33  ;;  %v10254_v44 = vld [vmem:[%s12436_s12 + $0x708] sm:$0xff]  }
0x2bc3   :  { %7875 = vmatmul.mubr.bf16.vlgmr.msra.gmra.mrb[92].mxu1 %v6717_v30  ;;  %7915 = vmatmul.mubr.bf16.vlgmr.msra.gmra.mrb[96].mxu0 %v6719_v32  ;;  %v10258_v30 = vld [vmem:[%s12436_s12 + $0x710] sm:$0xff]  }
0x2bc4   :  { %9307 = vmatpush3.bf16.msra.mxu1 %v10218_v4  ;;  %7954 = vmatprep.mubr.bf16.mxu1 %v6722_v40  ;;  %v10257_v4 = vld [vmem:[%s12436_s12 + $0x7d0] sm:$0xff]   ;;  %v10261_v40 = vld [vmem:[%s12436_s12 + $0x7d8] sm:$0xff]  }
0x2bc5   :  { %9329 = vmatpush3.bf16.msra.mxu0 %v10219_v49  ;;  %7994 = vmatprep.mubr.bf16.mxu0 %v6724_v55  ;;  %v10259_v32 = vld [vmem:[%s12436_s12 + $0x790] sm:$0xff]   ;;  %v10260_v49 = vld [vmem:[%s12436_s12 + $0x758] sm:$0xff]   ;;  %v10264_v55 = vld [vmem:[%s12436_s12 + $0x760] sm:$0xff]  }
0x2bc6   :  { %9308 = vmatprep.subr.bf16.mxu1 %v10220_v38  ;;  %9330 = vmatprep.subr.bf16.mxu0 %v10221_v24  ;;  %v10262_v38 = vld [vmem:[%s12436_s12 + $0x718] sm:$0xff]  }
0x2bc7   :  { %v10263_v24 = vld [vmem:[%s12436_s12 + $0x798] sm:$0xff]  }
0x2bc8   :  { %9309 = vmatpush3.bf16.msra.mxu1 %v10222_v59  ;;  %v10265_v59 = vld [vmem:[%s12436_s12 + $0x7e0] sm:$0xff]  }
0x2bc9   :  { %9331 = vmatpush3.bf16.msra.mxu0 %v10223_v43  ;;  %9310 = vmatprep.subr.bf16.mxu1 %v10224_v7  ;;  %v10266_v43 = vld [vmem:[%s12436_s12 + $0x720] sm:$0xff]  }
0x2bca   :  { %9332 = vmatprep.subr.bf16.mxu0 %v10225_v51  ;;  %v10267_v7 = vld [vmem:[%s12436_s12 + $0x7a0] sm:$0xff]   ;;  %v10268_v51 = vld [vmem:[%s12436_s12 + $0x768] sm:$0xff]  }
0x2bcc   :  { %9311 = vmatpush3.bf16.msra.mxu1 %v10226_v61  ;;  %v10269_v61 = vld [vmem:[%s12436_s12 + $0x7e8] sm:$0xff]  }
0x2bcd   :  { %9333 = vmatpush3.bf16.msra.mxu0 %v10227_v56  ;;  %9312 = vmatprep.subr.bf16.mxu1 %v10228_v14  ;;  %v10270_v56 = vld [vmem:[%s12436_s12 + $0x728] sm:$0xff]   ;;  %v6177_v14 = vrot.slane %v12127_v63, %v11170_v1  ;;  %v10274_v1 = vld [vmem:[%s12436_s12 + $0x730] sm:$0xff]  }
0x2bce   :  { %9334 = vmatprep.subr.bf16.mxu0 %v10229_v0  ;;  %v10271_v0 = vld [vmem:[%s12436_s12 + $0x7a8] sm:$0xff]  }
0x2bcf   :  { %v6650_v63 = vadd.f32 %v12143_v12, %v6177_v14  ;;  %v10278_v12 = vld [vmem:[%s12436_s12 + $0x738] sm:$0xff]  }
0x2bd0   :  { %9313 = vmatpush3.bf16.msra.mxu1 %v10230_v60  ;;  %v10272_v60 = vld [vmem:[%s12436_s12 + $0x770] sm:$0xff]  }
0x2bd1   :  { %9335 = vmatpush3.bf16.msra.mxu0 %v10231_v39  ;;  %9314 = vmatprep.subr.bf16.mxu1 %v10232_v25  ;;  %v10273_v39 = vld [vmem:[%s12436_s12 + $0x7f0] sm:$0xff]  }
0x2bd2   :  { %9336 = vmatprep.subr.bf16.mxu0 %v10233_v46  ;;  %v10275_v25 = vld [vmem:[%s12436_s12 + $0x7b0] sm:$0xff]   ;;  %v10276_v46 = vld [vmem:[%s12436_s12 + $0x778] sm:$0xff]  }
0x2bd4   :  { %9315 = vmatpush3.bf16.msra.mxu1 %v10234_v3  ;;  %v10277_v3 = vld [vmem:[%s12436_s12 + $0x7f8] sm:$0xff]  }
0x2bd5   :  { %9337 = vmatpush3.bf16.msra.mxu0 %v10235_v47  ;;  %9316 = vmatprep.subr.bf16.mxu1 %v10236_v9  ;;  %v6709_v47 = vmax.f32 %v6650_v63, 0.0  ;;  %v10279_v9 = vld [vmem:[%s12436_s12 + $0x7b8] sm:$0xff]  }
0x2bd6   :  { %9338 = vmatprep.subr.bf16.mxu0 %v10237_v8  ;;  %v6711_v8 = vmax.f32 %v12145_v34, 0.0 }
0x2bd8   :  { %9317 = vmatpush3.bf16.msra.mxu1 %v10238_v13  ;;  %v6725_v13 = vpack.c.bf16 %v6709_v47, %v6709_v47  ;;  %v6727_v36 = vpack.c.bf16 %v6711_v8, %v6711_v8  ;;  %v8896_v8 = vld [vmem:[%s12440_s16 + $0x1] ss:$0 sm:$0xff] }
0x2bd9   :  { %9339 = vmatpush3.bf16.msra.mxu0 %v10239_v37  ;;  %9318 = vmatprep.subr.bf16.mxu1 %v10240_v57 }
0x2bda   :  { %9340 = vmatprep.subr.bf16.mxu0 %v10241_v11 }
0x2bdc   :  { %9319 = vmatpush3.bf16.msra.mxu1 %v10242_v22 }
0x2bdd   :  { %9341 = vmatpush3.bf16.msra.mxu0 %v10243_v50  ;;  %9320 = vmatprep.subr.bf16.mxu1 %v10244_v5 }
0x2bde   :  { %9342 = vmatprep.subr.bf16.mxu0 %v10245_v6 }
0x2be0   :  { %9321 = vmatpush3.bf16.msra.mxu1 %v10246_v2 }
0x2be1   :  { %9343 = vmatpush3.bf16.msra.mxu0 %v10247_v42  ;;  %9350 = vmatprep.subr.bf16.mxu1 %v10248_v28 }
0x2be2   :  { %9372 = vmatprep.subr.bf16.mxu0 %v10249_v19 }
0x2be3   :  { %7955 = vmatmul.mubr.bf16.vlgmr.msra.gmra.mrb[96].mxu1 %v6721_v62 }
0x2be4   :  { %7995 = vmatmul.mubr.bf16.vlgmr.msra.gmra.mrb[100].mxu0 %v6723_v53  ;;  %9351 = vmatpush3.bf16.msra.mxu1 %v10250_v52 }
0x2be5   :  { %8034 = vmatprep.mubr.bf16.mxu1 %v6726_v48  ;;  %9373 = vmatpush3.bf16.msra.mxu0 %v10251_v17 }
0x2be6   :  { %8074 = vmatprep.mubr.bf16.mxu0 %v6728_v21  ;;  %9352 = vmatprep.subr.bf16.mxu1 %v10252_v23 }
0x2be7   :  { %9374 = vmatprep.subr.bf16.mxu0 %v10253_v15 }
0x2be8   :  { %9353 = vmatpush3.bf16.msra.mxu1 %v10254_v44 }
0x2be9   :  { %9375 = vmatpush3.bf16.msra.mxu0 %v10255_v31  ;;  %9354 = vmatprep.subr.bf16.mxu1 %v10256_v29 }
0x2bea   :  { %9376 = vmatprep.subr.bf16.mxu0 %v10257_v4 }
0x2bec   :  { %9355 = vmatpush3.bf16.msra.mxu1 %v10258_v30 }
0x2bed   :  { %9377 = vmatpush3.bf16.msra.mxu0 %v10259_v32  ;;  %9356 = vmatprep.subr.bf16.mxu1 %v10260_v49 }
0x2bee   :  { %9378 = vmatprep.subr.bf16.mxu0 %v10261_v40 }
0x2bf0   :  { %9357 = vmatpush3.bf16.msra.mxu1 %v10262_v38 }
0x2bf1   :  { %9379 = vmatpush3.bf16.msra.mxu0 %v10263_v24  ;;  %9358 = vmatprep.subr.bf16.mxu1 %v10264_v55 }
0x2bf2   :  { %9380 = vmatprep.subr.bf16.mxu0 %v10265_v59 }
0x2bf4   :  { %9359 = vmatpush3.bf16.msra.mxu1 %v10266_v43 }
0x2bf5   :  { %9381 = vmatpush3.bf16.msra.mxu0 %v10267_v7  ;;  %9360 = vmatprep.subr.bf16.mxu1 %v10268_v51 }
0x2bf6   :  { %9382 = vmatprep.subr.bf16.mxu0 %v10269_v61 }
0x2bf8   :  { %9361 = vmatpush3.bf16.msra.mxu1 %v10270_v56 }
0x2bf9   :  { %9383 = vmatpush3.bf16.msra.mxu0 %v10271_v0  ;;  %9362 = vmatprep.subr.bf16.mxu1 %v10272_v60 }
0x2bfa   :  { %9384 = vmatprep.subr.bf16.mxu0 %v10273_v39 }
0x2bfc   :  { %9363 = vmatpush3.bf16.msra.mxu1 %v10274_v1 }
0x2bfd   :  { %9385 = vmatpush3.bf16.msra.mxu0 %v10275_v25  ;;  %9364 = vmatprep.subr.bf16.mxu1 %v10276_v46 }
0x2bfe   :  { %9386 = vmatprep.subr.bf16.mxu0 %v10277_v3 }
0x2c00   :  { %9365 = vmatpush3.bf16.msra.mxu1 %v10278_v12 }
0x2c01   :  { %9387 = vmatpush3.bf16.msra.mxu0 %v10279_v9 }
0x2c03   :  { %8035 = vmatmul.mubr.bf16.vlgmr.msra.gmra.mrb[100].mxu1 %v6725_v13  ;;  %v8897_v13 = vld [vmem:[%s12441_s17 + $0x1] ss:$0 sm:$0xff] }
0x2c04   :  { %8075 = vmatmul.mubr.bf16.vlgmr.msra.gmra.mrb[104].mxu0 %v6727_v36 }
0x2c76   :  { %v9234_v37 = vpop.f32.mrb[88].mxu1  ;;  %v9256_v57 = vpop.f32.mrb[92].mxu0 }
0x2c77   :  { %v9235_v11 = vpop.f32.mrb[89].mxu1  ;;  %v9257_v58 = vpop.f32.mrb[93].mxu0 }
0x2c78   :  { %v9236_v18 = vadd.f32 %v9235_v11, %v9234_v37  ;;  %v9258_v22 = vadd.f32 %v9257_v58, %v9256_v57  ;;  %v9237_v10 = vpop.f32.mrb[90].mxu1  ;;  %v9259_v50 = vpop.f32.mrb[94].mxu0 }
0x2c79   :  { %v9238_v34 = vpop.f32.mrb[91].mxu1  ;;  %v9260_v5 = vpop.f32.mrb[95].mxu0 }
0x2c7a   :  { %v7797_v54 = vadd.f32 %v9236_v18, %v8765_v27 }
0x2c7c   :  { %v7837_v6 = vadd.f32 %v9258_v22, %v7797_v54 }
0x2c96   :  { %v9278_v26 = vpop.f32.mrb[92].mxu1  ;;  %v9300_v41 = vpop.f32.mrb[96].mxu0 }
0x2c97   :  { %v9279_v2 = vpop.f32.mrb[93].mxu1  ;;  %v9301_v45 = vpop.f32.mrb[97].mxu0 }
0x2c98   :  { %v9280_v42 = vadd.f32 %v9279_v2, %v9278_v26  ;;  %v9302_v28 = vadd.f32 %v9301_v45, %v9300_v41  ;;  %v9281_v20 = vpop.f32.mrb[94].mxu1  ;;  %v9303_v19 = vpop.f32.mrb[98].mxu0 }
0x2c99   :  { %v9282_v35 = vpop.f32.mrb[95].mxu1  ;;  %v9304_v33 = vpop.f32.mrb[99].mxu0 }
0x2c9a   :  { %v7877_v52 = vadd.f32 %v9280_v42, %v7837_v6 }
0x2c9c   :  { %v7917_v62 = vadd.f32 %v9302_v28, %v7877_v52 }
0x2cb6   :  { %v9322_v17 = vpop.f32.mrb[96].mxu1 }
0x2cb7   :  { %v9344_v53 = vpop.f32.mrb[100].mxu0  ;;  %v9323_v23 = vpop.f32.mrb[97].mxu1 }
0x2cb8   :  { %v9324_v48 = vadd.f32 %v9323_v23, %v9322_v17  ;;  %v9345_v15 = vpop.f32.mrb[101].mxu0  ;;  %v9325_v21 = vpop.f32.mrb[98].mxu1 }
0x2cb9   :  { %v9346_v44 = vadd.f32 %v9345_v15, %v9344_v53  ;;  %v9347_v31 = vpop.f32.mrb[102].mxu0  ;;  %v9326_v29 = vpop.f32.mrb[99].mxu1 }
0x2cba   :  { %v7957_v4 = vadd.f32 %v9324_v48, %v7917_v62  ;;  %v9348_v30 = vpop.f32.mrb[103].mxu0 }
0x2cbc   :  { %v7997_v32 = vadd.f32 %v9346_v44, %v7957_v4 }
0x2cd6   :  { %v9366_v49 = vpop.f32.mrb[100].mxu1 }
0x2cd7   :  { %v9388_v40 = vpop.f32.mrb[104].mxu0  ;;  %v9367_v38 = vpop.f32.mrb[101].mxu1 }
0x2cd8   :  { %v9368_v24 = vadd.f32 %v9367_v38, %v9366_v49  ;;  %v9389_v55 = vpop.f32.mrb[105].mxu0  ;;  %v9369_v59 = vpop.f32.mrb[102].mxu1 }
0x2cd9   :  { %v9390_v43 = vadd.f32 %v9389_v55, %v9388_v40  ;;  %v9391_v7 = vpop.f32.mrb[106].mxu0  ;;  %v9370_v51 = vpop.f32.mrb[103].mxu1 }
0x2cda   :  { %v8037_v61 = vadd.f32 %v9368_v24, %v7997_v32  ;;  %v9392_v56 = vpop.f32.mrb[107].mxu0 }
0x2cdc   :  { %v8077_v14 = vadd.f32 %v9390_v43, %v8037_v61 }
0x2cde   :  { %v8082_v0 = vadd.f32 %v8077_v14, %v11873_v16 }
0x2ce0   :  { %v8088_v60 = vsel %vm8087_vm0, %v8082_v0, 0.0 }
0x2ce1   :  { %8089 = vadd.xlane.f32.xlu0 %v8088_v60 }
0x2d6e   :  { %v8090_v39 = vpop.xlane.xlu0 %8089 }
0x2d6f   :  { %v8091_v1 = vmul.f32 0.03125, %v8090_v39 }
0x2d71   :  { %v8092_v63 = vsub.f32 %v8082_v0, %v8091_v1 }
0x2d73   :  { %v8093_v25 = vmul.f32 %v8092_v63, %v8092_v63 }
0x2d75   :  { %v8094_v46 = vsel %vm8087_vm0, %v8093_v25, 0.0 }
0x2d76   :  { %8095 = vadd.xlane.f32.xlu1 %v8094_v46 }
0x2e03   :  { %v8096_v3 = vpop.xlane.xlu1 %8095 }
0x2e04   :  { %v8097_v12 = vmul.f32 0.03125, %v8096_v3 }
0x2e06   :  { %v8098_v47 = vadd.f32 1e-05, %v8097_v12 }
0x2e08   :  { %10424 = vrsqrt.f32 %v8098_v47 }
0x2e12   :  { %v10425_v9 = vpop.eup %10424 }
0x2e13   :  { %v8100_v16 = vmul.f32 %v10425_v9, %v8092_v63 }
0x2e15   :  { %v8107_v36 = vmul.f32 %v8896_v8, %v8100_v16 }
0x2e17   :  { %v8114_v37 = vadd.f32 %v8897_v13, %v8107_v36 }
0x2e19   :  { %8115 = vst.msk [vmem:[#allocation4] sm:$0x3] %vm8087_vm0, %v8114_v37 }
0x2e1a   :  { %10437 = shalt.err (!%p10434_p4)
}
0x2e1b   :  { %s10438_s20 = scalar_lea.hbm %s12442_s18, 32 }
0x2e1c   :  { %p10439_p5 = scmp.ne.s32.totalorder %s12442_s18, %s10438_s20  ;;  %p10442_p6 = scmp.lt.u32.totalorder %s10438_s20, %s12442_s18 }
0x2e1e   :  { %p10444_p7 = pnand %p10442_p6, %p10439_p5 }
0x2e20   :  { %10447 = shalt.err (!%p10444_p7)
}
0x2e21   :  { %8125 = dma.vmem_to_hbm [thread:$0]  %s8123_s30, 32, %s12442_s18, [#allocation5]  }
0x2e22   :  { %10448 = dma.done.wait [#allocation5], 32  }
0x2e23   :  { %10449 = vsyncadd [#allocation5], 4294967264 }
0x2e24   :  { %8129 = vsyncpa [#allocation5], 1 }

</bundles_post_ra>
